<compile_context>
chip_gen: v7x
topology: tpu7x:2x2x1
jax: 0.10.0
libtpu: 0.0.40
codegen_flags: <defaults>
</compile_context>

<pallas_src>
import numpy as np
import jax
import jax.numpy as jnp
from jax import lax
from jax.experimental import pallas as pl
from jax.experimental.pallas import tpu as pltpu

EPS = 1e-5          # InstanceNorm2d eps
NEG_SLOPE = 0.01    # LeakyReLU negative_slope


def _zero_border(pad_ref, Hp, Wp):
    """Zero only the 1-pixel halo of a (Hp+2, Wp+2, C) scratch buffer."""
    Hpad, Wpad, C = pad_ref.shape
    dt = pad_ref.dtype
    pad_ref[0:1, :, :] = jnp.zeros((1, Wpad, C), dt)
    pad_ref[Hp + 1:Hp + 2, :, :] = jnp.zeros((1, Wpad, C), dt)
    pad_ref[:, 0:1, :] = jnp.zeros((Hpad, 1, C), dt)
    pad_ref[:, Wp + 1:Wp + 2, :] = jnp.zeros((Hpad, 1, C), dt)


def _conv3x3_im2col(pad_ref, w_ref, Hp, Wp, cin):
    """3x3 conv (stride 1) over a zero-padded VMEM buffer as ONE matmul.

    Taps are concatenated along the contraction axis in (dh, dw, cin) order, matching a
    row-major flatten of HWIO weights to (9*cin, cout). Result is f32 (Hp*Wp, cout)."""
    taps = []
    for dh in range(3):
        for dw in range(3):
            taps.append(pad_ref[dh:dh + Hp, dw:dw + Wp, :].reshape(Hp * Wp, cin))
    patches = jnp.concatenate(taps, axis=-1)                      # (Hp*Wp, 9*cin) bf16
    return jnp.dot(patches, w_ref[...], preferred_element_type=jnp.float32)


def _instance_norm_lrelu(y2d):
    """InstanceNorm2d(affine=False, eps=1e-5) over spatial rows + LeakyReLU(0.01).

    y2d is a (Hp*Wp, C) f32 slab for one batch element, so the axis-0 reduction is
    exactly PyTorch's per-(N, C) spatial normalization (biased variance)."""
    mean = jnp.mean(y2d, axis=0, keepdims=True)
    centered = y2d - mean
    var = jnp.mean(centered * centered, axis=0, keepdims=True)
    yn = centered * lax.rsqrt(var + EPS)
    return jnp.where(yn > 0, yn, NEG_SLOPE * yn)


def down_kernel(x_ref, w1_ref, w2_ref, o_ref, pad1_ref, pad2_ref):
    # x_ref:  (1, H, W, Cin)  bf16  one batch element (grid axis 0 = batch)
    # w1_ref: (9*Cin, Cmid)   bf16  conv1 weights (im2col-flattened HWIO)
    # w2_ref: (9*Cmid, Cout)  bf16  conv2 weights
    # o_ref:  (1, H//2, W//2, Cout) f32
    _, H, W, Cin = x_ref.shape
    Hp, Wp = H // 2, W // 2
    Cmid = w1_ref.shape[1]
    Cout = w2_ref.shape[1]

    # ---- MaxPool2d(2): contiguous load, reshape, two max reductions (no strided ds) --
    x = x_ref[0]                                                  # (H, W, Cin)
    xw = jnp.max(x.reshape(H, Wp, 2, Cin), axis=2)                # pool W -> (H, Wp, Cin)
    pooled = jnp.max(xw.reshape(Hp, 2, Wp, Cin), axis=1)          # pool H -> (Hp, Wp, Cin)

    # ---- conv3x3(pad=1, no bias) -> InstanceNorm -> LeakyReLU  (block 1) ----
    _zero_border(pad1_ref, Hp, Wp)
    pad1_ref[1:Hp + 1, 1:Wp + 1, :] = pooled.astype(pad1_ref.dtype)
    y1 = _conv3x3_im2col(pad1_ref, w1_ref, Hp, Wp, Cin)           # (Hp*Wp, Cmid) f32
    y1 = _instance_norm_lrelu(y1)

    # ---- conv3x3(pad=1, no bias) -> InstanceNorm -> LeakyReLU  (block 2) ----
    _zero_border(pad2_ref, Hp, Wp)
    pad2_ref[1:Hp + 1, 1:Wp + 1, :] = y1.reshape(Hp, Wp, Cmid).astype(pad2_ref.dtype)
    y2 = _conv3x3_im2col(pad2_ref, w2_ref, Hp, Wp, Cmid)          # (Hp*Wp, Cout) f32
    y2 = _instance_norm_lrelu(y2)

    o_ref[0] = y2.reshape(Hp, Wp, Cout).astype(o_ref.dtype)


def down_forward(x_nchw, w1, w2):
    """Down(in_channels, out_channels).forward — NCHW in / NCHW out (f32)."""
    B, Cin, H, W = x_nchw.shape
    assert H % 2 == 0 and W % 2 == 0, "MaxPool2d(2) path assumes even H, W"
    Cmid, Cout = w1.shape[3], w2.shape[3]
    Hp, Wp = H // 2, W // 2

    # bf16 activations/weights into the kernel (MXU-native); accumulation stays f32.
    x = jnp.transpose(x_nchw, (0, 2, 3, 1)).astype(jnp.bfloat16)      # NHWC
    w1_flat = w1.reshape(9 * Cin, Cmid).astype(jnp.bfloat16)          # (dh,dw,cin) flat
    w2_flat = w2.reshape(9 * Cmid, Cout).astype(jnp.bfloat16)

    # TODO(synk): at large UNet resolutions add a spatial row-tile grid axis with a
    # 1-row halo and a two-phase (sum/sumsq) InstanceNorm so the per-step working set
    # fits v7x's 64 MiB VMEM; at these sizes one image per step fits comfortably.
    out_nhwc = pl.pallas_call(
        down_kernel,
        out_shape=jax.ShapeDtypeStruct((B, Hp, Wp, Cout), jnp.float32),
        grid=(B,),
        in_specs=[
            pl.BlockSpec((1, H, W, Cin), lambda b: (b, 0, 0, 0)),
            pl.BlockSpec((9 * Cin, Cmid), lambda b: (0, 0)),
            pl.BlockSpec((9 * Cmid, Cout), lambda b: (0, 0)),
        ],
        out_specs=pl.BlockSpec((1, Hp, Wp, Cout), lambda b: (b, 0, 0, 0)),
        scratch_shapes=[
            pltpu.VMEM((Hp + 2, Wp + 2, Cin), jnp.bfloat16),   # zero-padded pooled input
            pltpu.VMEM((Hp + 2, Wp + 2, Cmid), jnp.bfloat16),  # zero-padded mid activations
        ],
        compiler_params=pltpu.CompilerParams(
            dimension_semantics=("parallel",),        # batch is independent -> megacore
            vmem_limit_bytes=64 * 1024 * 1024,
        ),
    )(x, w1_flat, w2_flat)
    return jnp.transpose(out_nhwc, (0, 3, 1, 2))                      # back to NCHW


def down_reference(x_nchw, w1, w2):
    """Pure-JAX f32 reference matching the PyTorch forward (validation only)."""
    B, Cin, H, W = x_nchw.shape
    pooled = x_nchw.reshape(B, Cin, H // 2, 2, W // 2, 2).max(axis=(3, 5))
    x = jnp.transpose(pooled, (0, 2, 3, 1))                           # NHWC

    def conv(inp, w):
        return lax.conv_general_dilated(
            inp, w, window_strides=(1, 1), padding=((1, 1), (1, 1)),
            dimension_numbers=("NHWC", "HWIO", "NHWC"))

    def in_lrelu(y):
        mean = jnp.mean(y, axis=(1, 2), keepdims=True)
        var = jnp.mean((y - mean) ** 2, axis=(1, 2), keepdims=True)
        yn = (y - mean) * lax.rsqrt(var + EPS)
        return jnp.where(yn > 0, yn, NEG_SLOPE * yn)

    y = in_lrelu(conv(x, w1))
    y = in_lrelu(conv(y, w2))
    return jnp.transpose(y, (0, 3, 1, 2))


if __name__ == "__main__":
    key = jax.random.PRNGKey(0)
    kx, k1, k2 = jax.random.split(key, 3)

    # Down(in_channels=4, out_channels=8), small synthetic shapes.
    B, Cin, H, W = 2, 4, 16, 16
    Cout = 8
    Cmid = Cout  # DoubleConv uses mid_channels = out_channels by default

    x = jax.random.normal(kx, (B, Cin, H, W), jnp.float32)
    # Deterministic synthetic weights (HWIO layout), kernel_size=3, bias=False.
    w1 = jax.random.normal(k1, (3, 3, Cin, Cmid), jnp.float32) * 0.1
    w2 = jax.random.normal(k2, (3, 3, Cmid, Cout), jnp.float32) * 0.1

    out = jax.jit(down_forward)(x, w1, w2)
    out = jax.block_until_ready(out)

    ref = down_reference(x, w1, w2)
    np.testing.assert_allclose(np.asarray(out), np.asarray(ref), atol=5e-2, rtol=5e-2)
    assert out.shape == (B, Cout, H // 2, W // 2)

    print("KERNEL_OK")
</pallas_src>

<mosaic_0001>
module attributes {stable_mosaic.version = 11 : i64} {
  func.func @down_kernel(%arg0: i32, %arg1: memref<1x16x16x4xbf16, #tpu.memory_space<vmem>>, %arg2: memref<36x8xbf16, #tpu.memory_space<vmem>>, %arg3: memref<72x8xbf16, #tpu.memory_space<vmem>>, %arg4: memref<1x8x8x8xf32, #tpu.memory_space<vmem>>, %arg5: memref<10x10x4xbf16, #tpu.memory_space<vmem>>, %arg6: memref<10x10x8xbf16, #tpu.memory_space<vmem>>) attributes {dimension_semantics = [#tpu.dimension_semantics<parallel>], iteration_bounds = array<i64: 2>, scalar_prefetch = 0 : i64, scratch_operands = 2 : i64, tpu.core_type = #tpu.core_type<tc>, window_params = [{transform_indices = @transform_0, window_bounds = array<i64: 1, 16, 16, 4>}, {pipeline_mode = #tpu.pipeline_mode<synchronous>, transform_indices = @transform_1, window_bounds = array<i64: 36, 8>}, {pipeline_mode = #tpu.pipeline_mode<synchronous>, transform_indices = @transform_2, window_bounds = array<i64: 72, 8>}, {transform_indices = @transform_3, window_bounds = array<i64: 1, 8, 8, 8>}]} {
    %c0 = arith.constant 0 : index
    %c0_0 = arith.constant 0 : index
    %c0_1 = arith.constant 0 : index
    %c0_2 = arith.constant 0 : index
    %0 = vector.load %arg1[%c0, %c0_0, %c0_1, %c0_2] : memref<1x16x16x4xbf16, #tpu.memory_space<vmem>>, vector<1x16x16x4xbf16>
    %1 = vector.shape_cast %0 : vector<1x16x16x4xbf16> to vector<16x16x4xbf16>
    %2 = vector.shape_cast %1 : vector<16x16x4xbf16> to vector<16x8x2x4xbf16>
    %cst = arith.constant dense<0xFF80> : vector<16x8x4xbf16>
    %3 = vector.multi_reduction <maximumf>, %2, %cst [2] : vector<16x8x2x4xbf16> to vector<16x8x4xbf16>
    %4 = vector.shape_cast %3 : vector<16x8x4xbf16> to vector<8x2x8x4xbf16>
    %cst_3 = arith.constant dense<0xFF80> : vector<8x8x4xbf16>
    %5 = vector.multi_reduction <maximumf>, %4, %cst_3 [1] : vector<8x2x8x4xbf16> to vector<8x8x4xbf16>
    %cst_4 = arith.constant 0.000000e+00 : bf16
    %6 = vector.broadcast %cst_4 : bf16 to vector<1x10x4xbf16>
    %c0_5 = arith.constant 0 : index
    %c0_6 = arith.constant 0 : index
    %c0_7 = arith.constant 0 : index
    %7 = vector.load %arg5[%c0_5, %c0_6, %c0_7] : memref<10x10x4xbf16, #tpu.memory_space<vmem>>, vector<1x10x4xbf16>
    tpu.vector_store %arg5[%c0_5, %c0_6, %c0_7], %6 {strides = array<i32>} : memref<10x10x4xbf16, #tpu.memory_space<vmem>>, vector<1x10x4xbf16>,
    %cst_8 = arith.constant 0.000000e+00 : bf16
    %8 = vector.broadcast %cst_8 : bf16 to vector<1x10x4xbf16>
    %c9 = arith.constant 9 : index
    %c0_9 = arith.constant 0 : index
    %c0_10 = arith.constant 0 : index
    %9 = vector.load %arg5[%c9, %c0_9, %c0_10] : memref<10x10x4xbf16, #tpu.memory_space<vmem>>, vector<1x10x4xbf16>
    tpu.vector_store %arg5[%c9, %c0_9, %c0_10], %8 {strides = array<i32>} : memref<10x10x4xbf16, #tpu.memory_space<vmem>>, vector<1x10x4xbf16>,
    %cst_11 = arith.constant 0.000000e+00 : bf16
    %10 = vector.broadcast %cst_11 : bf16 to vector<10x1x4xbf16>
    %c0_12 = arith.constant 0 : index
    %c0_13 = arith.constant 0 : index
    %c0_14 = arith.constant 0 : index
    %11 = vector.load %arg5[%c0_12, %c0_13, %c0_14] : memref<10x10x4xbf16, #tpu.memory_space<vmem>>, vector<10x1x4xbf16>
    tpu.vector_store %arg5[%c0_12, %c0_13, %c0_14], %10 {strides = array<i32>} : memref<10x10x4xbf16, #tpu.memory_space<vmem>>, vector<10x1x4xbf16>,
    %cst_15 = arith.constant 0.000000e+00 : bf16
    %12 = vector.broadcast %cst_15 : bf16 to vector<10x1x4xbf16>
    %c0_16 = arith.constant 0 : index
    %c9_17 = arith.constant 9 : index
    %c0_18 = arith.constant 0 : index
    %13 = vector.load %arg5[%c0_16, %c9_17, %c0_18] : memref<10x10x4xbf16, #tpu.memory_space<vmem>>, vector<10x1x4xbf16>
    tpu.vector_store %arg5[%c0_16, %c9_17, %c0_18], %12 {strides = array<i32>} : memref<10x10x4xbf16, #tpu.memory_space<vmem>>, vector<10x1x4xbf16>,
    %c1 = arith.constant 1 : index
    %c1_19 = arith.constant 1 : index
    %c0_20 = arith.constant 0 : index
    %14 = vector.load %arg5[%c1, %c1_19, %c0_20] : memref<10x10x4xbf16, #tpu.memory_space<vmem>>, vector<8x8x4xbf16>
    tpu.vector_store %arg5[%c1, %c1_19, %c0_20], %5 {strides = array<i32>} : memref<10x10x4xbf16, #tpu.memory_space<vmem>>, vector<8x8x4xbf16>,
    %c0_21 = arith.constant 0 : index
    %c0_22 = arith.constant 0 : index
    %c0_23 = arith.constant 0 : index
    %15 = vector.load %arg5[%c0_21, %c0_22, %c0_23] : memref<10x10x4xbf16, #tpu.memory_space<vmem>>, vector<8x8x4xbf16>
    %16 = vector.shape_cast %15 : vector<8x8x4xbf16> to vector<64x4xbf16>
    %c0_24 = arith.constant 0 : index
    %c1_25 = arith.constant 1 : index
    %c0_26 = arith.constant 0 : index
    %17 = vector.load %arg5[%c0_24, %c1_25, %c0_26] : memref<10x10x4xbf16, #tpu.memory_space<vmem>>, vector<8x8x4xbf16>
    %18 = vector.shape_cast %17 : vector<8x8x4xbf16> to vector<64x4xbf16>
    %c0_27 = arith.constant 0 : index
    %c2 = arith.constant 2 : index
    %c0_28 = arith.constant 0 : index
    %19 = vector.load %arg5[%c0_27, %c2, %c0_28] : memref<10x10x4xbf16, #tpu.memory_space<vmem>>, vector<8x8x4xbf16>
    %20 = vector.shape_cast %19 : vector<8x8x4xbf16> to vector<64x4xbf16>
    %c1_29 = arith.constant 1 : index
    %c0_30 = arith.constant 0 : index
    %c0_31 = arith.constant 0 : index
    %21 = vector.load %arg5[%c1_29, %c0_30, %c0_31] : memref<10x10x4xbf16, #tpu.memory_space<vmem>>, vector<8x8x4xbf16>
    %22 = vector.shape_cast %21 : vector<8x8x4xbf16> to vector<64x4xbf16>
    %c1_32 = arith.constant 1 : index
    %c1_33 = arith.constant 1 : index
    %c0_34 = arith.constant 0 : index
    %23 = vector.load %arg5[%c1_32, %c1_33, %c0_34] : memref<10x10x4xbf16, #tpu.memory_space<vmem>>, vector<8x8x4xbf16>
    %24 = vector.shape_cast %23 : vector<8x8x4xbf16> to vector<64x4xbf16>
    %c1_35 = arith.constant 1 : index
    %c2_36 = arith.constant 2 : index
    %c0_37 = arith.constant 0 : index
    %25 = vector.load %arg5[%c1_35, %c2_36, %c0_37] : memref<10x10x4xbf16, #tpu.memory_space<vmem>>, vector<8x8x4xbf16>
    %26 = vector.shape_cast %25 : vector<8x8x4xbf16> to vector<64x4xbf16>
    %c2_38 = arith.constant 2 : index
    %c0_39 = arith.constant 0 : index
    %c0_40 = arith.constant 0 : index
    %27 = vector.load %arg5[%c2_38, %c0_39, %c0_40] : memref<10x10x4xbf16, #tpu.memory_space<vmem>>, vector<8x8x4xbf16>
    %28 = vector.shape_cast %27 : vector<8x8x4xbf16> to vector<64x4xbf16>
    %c2_41 = arith.constant 2 : index
    %c1_42 = arith.constant 1 : index
    %c0_43 = arith.constant 0 : index
    %29 = vector.load %arg5[%c2_41, %c1_42, %c0_43] : memref<10x10x4xbf16, #tpu.memory_space<vmem>>, vector<8x8x4xbf16>
    %30 = vector.shape_cast %29 : vector<8x8x4xbf16> to vector<64x4xbf16>
    %c2_44 = arith.constant 2 : index
    %c2_45 = arith.constant 2 : index
    %c0_46 = arith.constant 0 : index
    %31 = vector.load %arg5[%c2_44, %c2_45, %c0_46] : memref<10x10x4xbf16, #tpu.memory_space<vmem>>, vector<8x8x4xbf16>
    %32 = vector.shape_cast %31 : vector<8x8x4xbf16> to vector<64x4xbf16>
    %33 = tpu.concatenate %16, %18, %20, %22, %24, %26, %28, %30, %32 in 1 : vector<64x4xbf16>, vector<64x4xbf16>, vector<64x4xbf16>, vector<64x4xbf16>, vector<64x4xbf16>, vector<64x4xbf16>, vector<64x4xbf16>, vector<64x4xbf16>, vector<64x4xbf16> -> vector<64x36xbf16>
    %c0_47 = arith.constant 0 : index
    %c0_48 = arith.constant 0 : index
    %34 = vector.load %arg2[%c0_47, %c0_48] : memref<36x8xbf16, #tpu.memory_space<vmem>>, vector<36x8xbf16>
    %cst_49 = arith.constant dense<0.000000e+00> : vector<64x8xf32>
    %35 = tpu.matmul %33, %34, %cst_49 {dimension_numbers = #tpu.dot_dimension_numbers<[1], [0], [0], [1], [0, 0, 1, 1], [], []>} : vector<64x36xbf16>, vector<36x8xbf16>, vector<64x8xf32> -> vector<64x8xf32>
    %cst_50 = arith.constant dense<0.000000e+00> : vector<8xf32>
    %36 = vector.multi_reduction <add>, %35, %cst_50 [0] : vector<64x8xf32> to vector<8xf32>
    %37 = vector.shape_cast %36 : vector<8xf32> to vector<1x8xf32>
    %cst_51 = arith.constant 6.400000e+01 : f32
    %38 = vector.broadcast %cst_51 : f32 to vector<1x8xf32>
    %39 = arith.divf %37, %38 : vector<1x8xf32>
    %40 = vector.broadcast %39 : vector<1x8xf32> to vector<64x8xf32>
    %41 = arith.subf %35, %40 : vector<64x8xf32>
    %42 = arith.mulf %41, %41 : vector<64x8xf32>
    %cst_52 = arith.constant dense<0.000000e+00> : vector<8xf32>
    %43 = vector.multi_reduction <add>, %42, %cst_52 [0] : vector<64x8xf32> to vector<8xf32>
    %44 = vector.shape_cast %43 : vector<8xf32> to vector<1x8xf32>
    %cst_53 = arith.constant 6.400000e+01 : f32
    %45 = vector.broadcast %cst_53 : f32 to vector<1x8xf32>
    %46 = arith.divf %44, %45 : vector<1x8xf32>
    %cst_54 = arith.constant 9.99999974E-6 : f32
    %47 = vector.broadcast %cst_54 : f32 to vector<1x8xf32>
    %48 = arith.addf %46, %47 : vector<1x8xf32>
    %49 = math.rsqrt %48 : vector<1x8xf32>
    %50 = vector.broadcast %49 : vector<1x8xf32> to vector<64x8xf32>
    %51 = arith.mulf %41, %50 : vector<64x8xf32>
    %cst_55 = arith.constant 0.000000e+00 : f32
    %52 = vector.broadcast %cst_55 : f32 to vector<64x8xf32>
    %53 = arith.cmpf ogt, %51, %52 : vector<64x8xf32>
    %cst_56 = arith.constant 0.00999999977 : f32
    %54 = vector.broadcast %cst_56 : f32 to vector<64x8xf32>
    %55 = arith.mulf %54, %51 : vector<64x8xf32>
    %56 = arith.select %53, %51, %55 : vector<64x8xi1>, vector<64x8xf32>
    %cst_57 = arith.constant 0.000000e+00 : bf16
    %57 = vector.broadcast %cst_57 : bf16 to vector<1x10x8xbf16>
    %c0_58 = arith.constant 0 : index
    %c0_59 = arith.constant 0 : index
    %c0_60 = arith.constant 0 : index
    %58 = vector.load %arg6[%c0_58, %c0_59, %c0_60] : memref<10x10x8xbf16, #tpu.memory_space<vmem>>, vector<1x10x8xbf16>
    tpu.vector_store %arg6[%c0_58, %c0_59, %c0_60], %57 {strides = array<i32>} : memref<10x10x8xbf16, #tpu.memory_space<vmem>>, vector<1x10x8xbf16>,
    %cst_61 = arith.constant 0.000000e+00 : bf16
    %59 = vector.broadcast %cst_61 : bf16 to vector<1x10x8xbf16>
    %c9_62 = arith.constant 9 : index
    %c0_63 = arith.constant 0 : index
    %c0_64 = arith.constant 0 : index
    %60 = vector.load %arg6[%c9_62, %c0_63, %c0_64] : memref<10x10x8xbf16, #tpu.memory_space<vmem>>, vector<1x10x8xbf16>
    tpu.vector_store %arg6[%c9_62, %c0_63, %c0_64], %59 {strides = array<i32>} : memref<10x10x8xbf16, #tpu.memory_space<vmem>>, vector<1x10x8xbf16>,
    %cst_65 = arith.constant 0.000000e+00 : bf16
    %61 = vector.broadcast %cst_65 : bf16 to vector<10x1x8xbf16>
    %c0_66 = arith.constant 0 : index
    %c0_67 = arith.constant 0 : index
    %c0_68 = arith.constant 0 : index
    %62 = vector.load %arg6[%c0_66, %c0_67, %c0_68] : memref<10x10x8xbf16, #tpu.memory_space<vmem>>, vector<10x1x8xbf16>
    tpu.vector_store %arg6[%c0_66, %c0_67, %c0_68], %61 {strides = array<i32>} : memref<10x10x8xbf16, #tpu.memory_space<vmem>>, vector<10x1x8xbf16>,
    %cst_69 = arith.constant 0.000000e+00 : bf16
    %63 = vector.broadcast %cst_69 : bf16 to vector<10x1x8xbf16>
    %c0_70 = arith.constant 0 : index
    %c9_71 = arith.constant 9 : index
    %c0_72 = arith.constant 0 : index
    %64 = vector.load %arg6[%c0_70, %c9_71, %c0_72] : memref<10x10x8xbf16, #tpu.memory_space<vmem>>, vector<10x1x8xbf16>
    tpu.vector_store %arg6[%c0_70, %c9_71, %c0_72], %63 {strides = array<i32>} : memref<10x10x8xbf16, #tpu.memory_space<vmem>>, vector<10x1x8xbf16>,
    %65 = vector.shape_cast %56 : vector<64x8xf32> to vector<8x8x8xf32>
    %66 = arith.truncf %65 : vector<8x8x8xf32> to vector<8x8x8xbf16>
    %c1_73 = arith.constant 1 : index
    %c1_74 = arith.constant 1 : index
    %c0_75 = arith.constant 0 : index
    %67 = vector.load %arg6[%c1_73, %c1_74, %c0_75] : memref<10x10x8xbf16, #tpu.memory_space<vmem>>, vector<8x8x8xbf16>
    tpu.vector_store %arg6[%c1_73, %c1_74, %c0_75], %66 {strides = array<i32>} : memref<10x10x8xbf16, #tpu.memory_space<vmem>>, vector<8x8x8xbf16>,
    %c0_76 = arith.constant 0 : index
    %c0_77 = arith.constant 0 : index
    %c0_78 = arith.constant 0 : index
    %68 = vector.load %arg6[%c0_76, %c0_77, %c0_78] : memref<10x10x8xbf16, #tpu.memory_space<vmem>>, vector<8x8x8xbf16>
    %69 = vector.shape_cast %68 : vector<8x8x8xbf16> to vector<64x8xbf16>
    %c0_79 = arith.constant 0 : index
    %c1_80 = arith.constant 1 : index
    %c0_81 = arith.constant 0 : index
    %70 = vector.load %arg6[%c0_79, %c1_80, %c0_81] : memref<10x10x8xbf16, #tpu.memory_space<vmem>>, vector<8x8x8xbf16>
    %71 = vector.shape_cast %70 : vector<8x8x8xbf16> to vector<64x8xbf16>
    %c0_82 = arith.constant 0 : index
    %c2_83 = arith.constant 2 : index
    %c0_84 = arith.constant 0 : index
    %72 = vector.load %arg6[%c0_82, %c2_83, %c0_84] : memref<10x10x8xbf16, #tpu.memory_space<vmem>>, vector<8x8x8xbf16>
    %73 = vector.shape_cast %72 : vector<8x8x8xbf16> to vector<64x8xbf16>
    %c1_85 = arith.constant 1 : index
    %c0_86 = arith.constant 0 : index
    %c0_87 = arith.constant 0 : index
    %74 = vector.load %arg6[%c1_85, %c0_86, %c0_87] : memref<10x10x8xbf16, #tpu.memory_space<vmem>>, vector<8x8x8xbf16>
    %75 = vector.shape_cast %74 : vector<8x8x8xbf16> to vector<64x8xbf16>
    %c1_88 = arith.constant 1 : index
    %c1_89 = arith.constant 1 : index
    %c0_90 = arith.constant 0 : index
    %76 = vector.load %arg6[%c1_88, %c1_89, %c0_90] : memref<10x10x8xbf16, #tpu.memory_space<vmem>>, vector<8x8x8xbf16>
    %77 = vector.shape_cast %76 : vector<8x8x8xbf16> to vector<64x8xbf16>
    %c1_91 = arith.constant 1 : index
    %c2_92 = arith.constant 2 : index
    %c0_93 = arith.constant 0 : index
    %78 = vector.load %arg6[%c1_91, %c2_92, %c0_93] : memref<10x10x8xbf16, #tpu.memory_space<vmem>>, vector<8x8x8xbf16>
    %79 = vector.shape_cast %78 : vector<8x8x8xbf16> to vector<64x8xbf16>
    %c2_94 = arith.constant 2 : index
    %c0_95 = arith.constant 0 : index
    %c0_96 = arith.constant 0 : index
    %80 = vector.load %arg6[%c2_94, %c0_95, %c0_96] : memref<10x10x8xbf16, #tpu.memory_space<vmem>>, vector<8x8x8xbf16>
    %81 = vector.shape_cast %80 : vector<8x8x8xbf16> to vector<64x8xbf16>
    %c2_97 = arith.constant 2 : index
    %c1_98 = arith.constant 1 : index
    %c0_99 = arith.constant 0 : index
    %82 = vector.load %arg6[%c2_97, %c1_98, %c0_99] : memref<10x10x8xbf16, #tpu.memory_space<vmem>>, vector<8x8x8xbf16>
    %83 = vector.shape_cast %82 : vector<8x8x8xbf16> to vector<64x8xbf16>
    %c2_100 = arith.constant 2 : index
    %c2_101 = arith.constant 2 : index
    %c0_102 = arith.constant 0 : index
    %84 = vector.load %arg6[%c2_100, %c2_101, %c0_102] : memref<10x10x8xbf16, #tpu.memory_space<vmem>>, vector<8x8x8xbf16>
    %85 = vector.shape_cast %84 : vector<8x8x8xbf16> to vector<64x8xbf16>
    %86 = tpu.concatenate %69, %71, %73, %75, %77, %79, %81, %83, %85 in 1 : vector<64x8xbf16>, vector<64x8xbf16>, vector<64x8xbf16>, vector<64x8xbf16>, vector<64x8xbf16>, vector<64x8xbf16>, vector<64x8xbf16>, vector<64x8xbf16>, vector<64x8xbf16> -> vector<64x72xbf16>
    %c0_103 = arith.constant 0 : index
    %c0_104 = arith.constant 0 : index
    %87 = vector.load %arg3[%c0_103, %c0_104] : memref<72x8xbf16, #tpu.memory_space<vmem>>, vector<72x8xbf16>
    %cst_105 = arith.constant dense<0.000000e+00> : vector<64x8xf32>
    %88 = tpu.matmul %86, %87, %cst_105 {dimension_numbers = #tpu.dot_dimension_numbers<[1], [0], [0], [1], [0, 0, 1, 1], [], []>} : vector<64x72xbf16>, vector<72x8xbf16>, vector<64x8xf32> -> vector<64x8xf32>
    %cst_106 = arith.constant dense<0.000000e+00> : vector<8xf32>
    %89 = vector.multi_reduction <add>, %88, %cst_106 [0] : vector<64x8xf32> to vector<8xf32>
    %90 = vector.shape_cast %89 : vector<8xf32> to vector<1x8xf32>
    %cst_107 = arith.constant 6.400000e+01 : f32
    %91 = vector.broadcast %cst_107 : f32 to vector<1x8xf32>
    %92 = arith.divf %90, %91 : vector<1x8xf32>
    %93 = vector.broadcast %92 : vector<1x8xf32> to vector<64x8xf32>
    %94 = arith.subf %88, %93 : vector<64x8xf32>
    %95 = arith.mulf %94, %94 : vector<64x8xf32>
    %cst_108 = arith.constant dense<0.000000e+00> : vector<8xf32>
    %96 = vector.multi_reduction <add>, %95, %cst_108 [0] : vector<64x8xf32> to vector<8xf32>
    %97 = vector.shape_cast %96 : vector<8xf32> to vector<1x8xf32>
    %cst_109 = arith.constant 6.400000e+01 : f32
    %98 = vector.broadcast %cst_109 : f32 to vector<1x8xf32>
    %99 = arith.divf %97, %98 : vector<1x8xf32>
    %cst_110 = arith.constant 9.99999974E-6 : f32
    %100 = vector.broadcast %cst_110 : f32 to vector<1x8xf32>
    %101 = arith.addf %99, %100 : vector<1x8xf32>
    %102 = math.rsqrt %101 : vector<1x8xf32>
    %103 = vector.broadcast %102 : vector<1x8xf32> to vector<64x8xf32>
    %104 = arith.mulf %94, %103 : vector<64x8xf32>
    %cst_111 = arith.constant 0.000000e+00 : f32
    %105 = vector.broadcast %cst_111 : f32 to vector<64x8xf32>
    %106 = arith.cmpf ogt, %104, %105 : vector<64x8xf32>
    %cst_112 = arith.constant 0.00999999977 : f32
    %107 = vector.broadcast %cst_112 : f32 to vector<64x8xf32>
    %108 = arith.mulf %107, %104 : vector<64x8xf32>
    %109 = arith.select %106, %104, %108 : vector<64x8xi1>, vector<64x8xf32>
    %110 = vector.shape_cast %109 : vector<64x8xf32> to vector<8x8x8xf32>
    %c0_113 = arith.constant 0 : index
    %c0_114 = arith.constant 0 : index
    %c0_115 = arith.constant 0 : index
    %c0_116 = arith.constant 0 : index
    %111 = vector.load %arg4[%c0_113, %c0_114, %c0_115, %c0_116] : memref<1x8x8x8xf32, #tpu.memory_space<vmem>>, vector<1x8x8x8xf32>
    %112 = vector.shape_cast %111 : vector<1x8x8x8xf32> to vector<8x8x8xf32>
    %113 = vector.shape_cast %110 : vector<8x8x8xf32> to vector<1x8x8x8xf32>
    tpu.vector_store %arg4[%c0_113, %c0_114, %c0_115, %c0_116], %113 {strides = array<i32>} : memref<1x8x8x8xf32, #tpu.memory_space<vmem>>, vector<1x8x8x8xf32>,
    return
  }
  func.func @transform_0(%arg0: i32) -> (i32, i32, i32, i32) {
    %c0_i32 = arith.constant 0 : i32
    %c0_i32_0 = arith.constant 0 : i32
    %c0_i32_1 = arith.constant 0 : i32
    %c0_i32_2 = arith.constant 0 : i32
    return %arg0, %c0_i32, %c0_i32_0, %c0_i32_1 : i32, i32, i32, i32
  }
  func.func @transform_1(%arg0: i32) -> (i32, i32) {
    %c0_i32 = arith.constant 0 : i32
    %c0_i32_0 = arith.constant 0 : i32
    %c0_i32_1 = arith.constant 0 : i32
    return %c0_i32, %c0_i32_0 : i32, i32
  }
  func.func @transform_2(%arg0: i32) -> (i32, i32) {
    %c0_i32 = arith.constant 0 : i32
    %c0_i32_0 = arith.constant 0 : i32
    %c0_i32_1 = arith.constant 0 : i32
    return %c0_i32, %c0_i32_0 : i32, i32
  }
  func.func @transform_3(%arg0: i32) -> (i32, i32, i32, i32) {
    %c0_i32 = arith.constant 0 : i32
    %c0_i32_0 = arith.constant 0 : i32
    %c0_i32_1 = arith.constant 0 : i32
    %c0_i32_2 = arith.constant 0 : i32
    return %arg0, %c0_i32, %c0_i32_0, %c0_i32_1 : i32, i32, i32, i32
  }
}

</mosaic_0001>

<bundles_post_ra>
// kernel: down_forward.1
= control target key start
LH: loop header
LB: loop body
LE: loop exit
PB: predicated region body
PF: predicated region fallthrough
CT: control target
= control target key end

     0   :  { %8 = vsyncpa [#allocation5], 0  ;;  %s9642_s0 = inlined_call_operand.hbm [shape: bf16[2,16,16,4], index: 0, kind: input, shape index: {}]   ;;  %s9643_s1 = inlined_call_operand.hbm [shape: bf16[36,8], index: 1, kind: input, shape index: {}]   ;;  %s9644_s2 = inlined_call_operand.hbm [shape: bf16[72,8], index: 2, kind: input, shape index: {}]   ;;  %s9645_s3 = inlined_call_operand.hbm [shape: f32[2,8,8,8], index: 3, kind: output, shape index: {}]  }
   0x1   :  { %10 = vsyncpa [#allocation5 + $0x1], 0 }
   0x2   :  { %11 = vsyncpa [#allocation8], 0 }
   0x3   :  { %12 = vsyncpa [#allocation6], 0 }
   0x4   :  { %14 = vsyncpa [#allocation6 + $0x1], 0  ;;  %s6684_s12 = smov 0   ;;  %s6686_s13 = smov 0  }
   0x5   :  { %s6688_s14 = smov 0   ;;  %s6690_s15 = smov 0  }
   0x6 LB: > { %s6705_s16 = sadd.s32 4294967295, %s6641_s15   ;;  %s6030_s17 = sadd.s32 4294967294, %s6641_s15   ;;  %s6641_s15 = sphi %s6690_s15, %s9868_s15   ;;  %s6637_s14 = sphi %s6688_s14, %s9867_s14   ;;  %s6633_s13 = sphi %s6686_s13, %s9866_s13   ;;  %s6629_s12 = sphi %s6684_s12, %s9865_s12  }
   0x7   : > { %p40_p0 = scmp.ne.s32.totalorder %s6633_s13, %s6629_s12  ;;  %p9646_p1 = scmp.eq.s32.totalorder %s6705_s16, 0 }
   0x8   : > { %p112_p3 = scmp.eq.s32.totalorder %s6030_s17, 1  ;;  %p6031_p5 = scmp.ge.s32.totalorder %s6641_s15, 1 }
   0x9   : > { %p6714_p4 = por %p9646_p1, %p40_p0  ;;  %p119_p7 = scmp.lt.s32.totalorder %s6641_s15, 3 }
   0xa   : > { %p6719_p6 = por %p112_p3, %p40_p0  ;;  %s6643_s21 = smov [#allocation7]  }
   0xb   : > { %s9666_s18 = scalar_select %p6714_p4, 1, 0 }
   0xc   : > { %s9667_s19 = scalar_select %p6719_p6, 1, 0 }
   0xd   : > { %p6724_p8 = pnand %p6031_p5, %p119_p7  ;;  %s131_s22 = sshll.u32 %s6643_s21, 4  ;;  %s6728_s22 = int_to_ptr.vmem [resolvable:$true] %s131_s22 }
   0xe   : > { %s6644_s24 = smov [#allocation9]   ;;  %s6485_s28 = scalar_lea.hbm %s9643_s1, 320 }
   0xf   : > { %p6376_p9 = pneg %p6724_p8  ;;  %s144_s25 = sshll.u32 %s6644_s24, 4  ;;  %s6739_s25 = int_to_ptr.vmem [resolvable:$true] %s144_s25 }
  0x10   : > { %p6486_p12 = scmp.ne.s32.totalorder %s9643_s1, %s6485_s28  ;;  %p6492_p5 = scmp.lt.u32.totalorder %s6485_s28, %s9643_s1 }
  0x11   : > { %p6735_p11 = pnand %p6376_p9, %p9646_p1 }
  0x13   : > { %p6487_p13 = pneg %p6735_p11 }
  0x15   : > { %p6488_p0 = pnand %p6487_p13, %p6486_p12 }
  0x17   : > { %p6489_p3 = pneg %p6488_p0 }
  0x19   : > { %p6494_p7 = pnand %p6492_p5, %p6489_p3 }
  0x1b   : > { %6497 = shalt.err (!%p6494_p7)
}
  0x1c   : > { %s6498_s6 = scalar_lea.vmem %s6728_s22, 320  ;;  %p6506_p2 = scmp.lt.s32.totalorder %s6728_s22, %s6728_s22 }
  0x1d   : > { %p6499_p9 = scmp.ne.s32.totalorder %s6728_s22, %s6498_s6  ;;  %p6507_p12 = scmp.lt.s32.totalorder %s6498_s6, %s6498_s6 }
  0x1f   : > { %p6501_p10 = pnand %p6499_p9, %p6487_p13  ;;  %p6508_p0 = por %p6507_p12, %p6506_p2 }
  0x21   : > { %p6502_p1 = pneg %p6501_p10 }
  0x23   : > { %p6509_p6 = pnand %p6508_p0, %p6502_p1 }
  0x25   : > { %6512 = shalt.err (!%p6509_p6)
}
  0x26   : > { %s6645_s7 = smov 64   ;;  %s6646_s8 = smov 4  }
  0x27   : > { %6379 = dma.hbm_to_vmem [thread:$0]  (!%p6735_p11), %s9643_s1, 320, %s6728_s22, [#allocation8], %s6645_s7, %s6645_s7, %s6646_s8  }
  0x28   : > { %s6513_s21 = scalar_lea.hbm %s9644_s2, 576 }
  0x29   : > { %p6514_p1 = scmp.ne.s32.totalorder %s9644_s2, %s6513_s21  ;;  %p6520_p10 = scmp.lt.u32.totalorder %s6513_s21, %s9644_s2 }
  0x2b   : > { %p6516_p2 = pnand %p6514_p1, %p6487_p13 }
  0x2d   : > { %p6517_p6 = pneg %p6516_p2 }
  0x2f   : > { %p6522_p3 = pnand %p6520_p10, %p6517_p6 }
  0x31   : > { %6525 = shalt.err (!%p6522_p3)
}
  0x32   : > { %s6526_s22 = scalar_lea.vmem %s6739_s25, 576  ;;  %p6534_p12 = scmp.lt.s32.totalorder %s6739_s25, %s6739_s25 }
  0x33   : > { %p6527_p5 = scmp.ne.s32.totalorder %s6739_s25, %s6526_s22  ;;  %p6535_p0 = scmp.lt.s32.totalorder %s6526_s22, %s6526_s22 }
  0x35   : > { %p6529_p7 = pnand %p6527_p5, %p6487_p13  ;;  %p6536_p1 = por %p6535_p0, %p6534_p12 }
  0x37   : > { %p6530_p9 = pneg %p6529_p7 }
  0x39   : > { %p6537_p2 = pnand %p6536_p1, %p6530_p9 }
  0x3b   : > { %6540 = shalt.err (!%p6537_p2)
}
  0x3c   : > { %6382 = dma.hbm_to_vmem [thread:$0]  (!%p6735_p11), %s9644_s2, 576, %s6739_s25, [#allocation8], %s6645_s7, %s6645_s7, %s6646_s8  }
  0x3d   : > { %s6800_s23 = sadd.s32 1, %s6641_s15   ;;  %s27_s4 = sadd.s32 1, %s6637_s14 }
  0x3e   : > { %s24_s5 = ssub.s32 %s6641_s15, %s6800_s23  ;;  %p34_p13 = scmp.ne.s32.totalorder %s6637_s14, %s6633_s13 }
  0x3f   : > { %p25_p6 = scmp.eq.s32.totalorder %s24_s5, 0  ;;  %p35_p10 = scmp.eq.s32.totalorder %s6641_s15, 0 }
  0x40   : > { %p9670_p3 = scmp.eq.s32.totalorder %s6705_s16, 1  ;;  %p6393_p7 = scmp.lt.s32.totalorder %s6641_s15, 2 }
  0x41   : > { %s6816_s9 = scalar_select %p25_p6, %s6637_s14, %s27_s4  }
  0x42   : > { %p6810_p5 = por %p9670_p3, %p34_p13  ;;  %p36_p9 = por %p35_p10, %p34_p13 }
  0x43   : > { %s158_s10 = sand.u32 1, %s6637_s14   ;;  %s6296_s25 = sshll.u32 %s6641_s15, 11 }
  0x44   : > { %s9671_s6 = scalar_select %p6810_p5, 1, 0 }
  0x45   : > { %s6035_s11 = sshll.u32 %s158_s10, 7  ;;  %s6823_s24 = scalar_lea.hbm %s9642_s0, %s6296_s25 }
  0x46   : > { %s162_s26 = scalar_lea.vmem [#allocation4], %s6035_s11  ;;  %p6827_p11 = pnand %p6393_p7, %p36_p9 }
  0x47   : > { %s169_s27 = sshll.u32 %s162_s26, 4  ;;  %s6831_s22 = scalar_lea.sflag [#allocation5], %s158_s10  ;;  %s6825_s27 = int_to_ptr.vmem [resolvable:$true] %s169_s27 }
  0x48   : > { %s6541_s29 = scalar_lea.hbm %s6823_s24, 2048  ;;  %p6543_p0 = pneg %p6827_p11 }
  0x49   : > { %p6542_p12 = scmp.ne.s32.totalorder %s6823_s24, %s6541_s29  ;;  %s6546_s5 = scalar_lea.hbm %s9642_s0, 4096 }
  0x4a   : > { %p6547_p13 = scmp.lt.u32.totalorder %s6823_s24, %s9642_s0  ;;  %p6548_p6 = scmp.lt.u32.totalorder %s6546_s5, %s6541_s29 }
  0x4b   : > { %p6544_p1 = pnand %p6543_p0, %p6542_p12  ;;  %p6550_p3 = scmp.lt.u32.totalorder %s6541_s29, %s6823_s24 }
  0x4c   : > { %p6549_p10 = por %p6548_p6, %p6547_p13 }
  0x4d   : > { %p6545_p2 = pneg %p6544_p1 }
  0x4e   : > { %p6551_p7 = por %p6550_p3, %p6549_p10 }
  0x50   : > { %p6552_p9 = pnand %p6551_p7, %p6545_p2 }
  0x52   : > { %6555 = shalt.err (!%p6552_p9)
}
  0x53   : > { %s6556_s10 = scalar_lea.vmem %s6825_s27, 2048  ;;  %s6647_s17 = smov [#allocation4]  }
  0x54   : > { %p6557_p12 = scmp.ne.s32.totalorder %s6825_s27, %s6556_s10  ;;  %s6561_s21 = sshll.u32 %s6647_s17, 4  ;;  %s6562_s21 = int_to_ptr.vmem [resolvable:$false] %s6561_s21 }
  0x55   : > { %s6563_s26 = scalar_lea.vmem %s6562_s21, 4096  ;;  %p6564_p4 = scmp.lt.s32.totalorder %s6825_s27, %s6562_s21 }
  0x56   : > { %p6559_p1 = pnand %p6557_p12, %p6543_p0  ;;  %p6565_p13 = scmp.lt.s32.totalorder %s6563_s26, %s6556_s10 }
  0x58   : > { %p6560_p5 = pneg %p6559_p1  ;;  %p6566_p6 = por %p6565_p13, %p6564_p4 }
  0x5a   : > { %p6567_p10 = pnand %p6566_p6, %p6560_p5 }
  0x5c   : > { %6570 = shalt.err (!%p6567_p10)
}
  0x5d   : > { %6386 = dma.hbm_to_vmem [thread:$0]  (!%p6827_p11), %s6823_s24, 2048, %s6825_s27, %s6831_s22, %s6645_s7, %s6645_s7, %s6646_s8  }
  0x5e   : > { %181 = sbr.rel (%p6724_p8) target bundleno = 1636 (0x664), region = 32 }
  0x65   : > { %s6865_s29 = sand.u32 1, %s6633_s13   ;;  %p9673_p4 = scmp.ne.s32.totalorder %s9666_s18, 0 }
  0x66   : > { %s6039_s30 = sshll.u32 %s6865_s29, 7  ;;  %s184_s4 = scalar_lea.sflag [#allocation5], %s6865_s29 }
  0x67   : > { %s6869_s5 = scalar_lea.vmem [#allocation4], %s6039_s30 }
  0x68   : > { %6616 = dma.done.wait (%p9673_p4), %s184_s4, 2048  }
  0x69   : > { %6618 = vsyncadd (%p9673_p4), %s184_s4, 4294965248  ;;  %p9674_p5 = scmp.eq.s32.totalorder %s6705_s16, 0 }
  0x6b   : > { %6620 = dma.done.wait (%p9674_p5), [#allocation8], 896   ;;  %p9675_p8 = pmov %p9674_p5 }
  0x6c   : > { %v295_v0 = vlaneseq  ;;  %v6648_v1 = vmov 1966171168   ;;  %vm3174_vm0 = vsmask.f32 256  ;;  %vm1052_vm1 = vcmask 24576   ;;  %s6649_s18 = smov 12  }
  0x6d   : > { %6622 = vsyncadd (%p9675_p8), [#allocation8], 4294966400  ;;  %v293_v2 = vunpack.c.l.s4 %v6648_v1  ;;  %v6051_v7 = vld.sshfl [vmem:[%s6869_s5 + $0x20] sm:$0x33 pattern:$0x75316420] }
  0x6e   : > { %v296_v3 = vshrl.u32 %v295_v0, 7  ;;  %vm6883_vm2 = vmand %vm1052_vm1, %vm3174_vm0  ;;  %v3185_v8 = vld [vmem:[#allocation2 + $0x18] sm:$0x1]  ;;  %v483_v10 = vcombine.high %v6051_v7, %v6051_v7  ;;  %vm2718_vm3 = vcmask 31744   ;;  %vm3494_vm4 = vcmask 1042434   ;;  %s6650_s20 = smov 24  }
  0x6f   : > { %v294_v4 = vunpack.c.0.s8 %v293_v2  ;;  %v6052_v9 = vld.sshfl [vmem:[%s6869_s5 + $0x24] sm:$0x33 pattern:$0x75316420]  ;;  %v3186_v12 = vsel %vm6883_vm2, 0, %v3185_v8  ;;  %vm3496_vm5 = vcmask 1043459  }
  0x70   : > { %v6053_v13 = vld.sshfl [vmem:[%s6869_s5 + $0x28] sm:$0x33 pattern:$0x75316420]  ;;  %v507_v14 = vcombine.high %v6052_v9, %v6052_v9  ;;  %3187 = vst [vmem:[#allocation2 + $0x18] sm:$0x1] %v3186_v12 }
  0x71   : > { %v6879_v5 = vsub.s32 %v294_v4, %v296_v3  ;;  %v6054_v16 = vld.sshfl [vmem:[%s6869_s5 + $0x2c] sm:$0x33 pattern:$0x75316420]  ;;  %v531_v19 = vcombine.high %v6053_v13, %v6053_v13  ;;  %vm3498_vm6 = vcmask 1044484   ;;  %vm3500_vm7 = vcmask 1045509  }
  0x72   : > { %v6055_v21 = vld.sshfl [vmem:[%s6869_s5 + $0x30] sm:$0x33 pattern:$0x75316420]  ;;  %v555_v24 = vcombine.high %v6054_v16, %v6054_v16  ;;  %vm3502_vm8 = vcmask 1046534   ;;  %vm3167_vm9 = vcmask 27648  }
  0x73   : > { %v490_v11 = vrot.slane %v6051_v7, %v6879_v5  ;;  %v6894_v15 = vrot.slane %v6052_v9, %v6879_v5  ;;  %v497_v17 = vrot.slane %v483_v10, %v6879_v5  ;;  %v6899_v20 = vrot.slane %v6053_v13, %v6879_v5  ;;  %v6056_v26 = vld.sshfl [vmem:[%s6869_s5 + $0x34] sm:$0x33 pattern:$0x75316420]  ;;  %s6652_s7 = smov 8   ;;  %s6653_s8 = smov 20  }
  0x74   : > { %v6903_v22 = vrot.slane %v507_v14, %v6879_v5  ;;  %v6908_v25 = vrot.slane %v6054_v16, %v6879_v5  ;;  %v6912_v28 = vrot.slane %v531_v19, %v6879_v5  ;;  %v579_v30 = vcombine.high %v6055_v21, %v6055_v21  ;;  %v6057_v31 = vld.sshfl [vmem:[%s6869_s5 + $0x38] sm:$0x33 pattern:$0x75316420]  ;;  %s6654_s24 = smov 32   ;;  %s6655_s27 = smov 4  }
  0x75   : > { %v498_v18 = vcombine.high %v490_v11, %v490_v11  ;;  %v522_v23 = vcombine.high %v6894_v15, %v6894_v15  ;;  %v499_v27 = vcombine.high %v497_v17, %v497_v17  ;;  %v546_v29 = vcombine.high %v6899_v20, %v6899_v20  ;;  %v6058_v36 = vld.sshfl [vmem:[%s6869_s5 + $0x3c] sm:$0x33 pattern:$0x75316420]  ;;  %s6656_s28 = smov 16   ;;  %s6657_s22 = smov 28  }
  0x76   : > { %v6918_v32 = vrot.slane %v555_v24, %v6879_v5  ;;  %v570_v33 = vcombine.high %v6908_v25, %v6908_v25  ;;  %v6923_v34 = vrot.slane %v6055_v21, %v6879_v5  ;;  %v603_v35 = vcombine.high %v6056_v26, %v6056_v26  ;;  %s6658_s11 = smov 48   ;;  %s6659_s25 = smov 40  }
  0x77   : > { %v547_v37 = vcombine.high %v6912_v28, %v6912_v28  ;;  %v6929_v38 = vrot.slane %v579_v30, %v6879_v5  ;;  %v6932_v39 = vrot.slane %v6056_v26, %v6879_v5  ;;  %v627_v40 = vcombine.high %v6057_v31, %v6057_v31  ;;  %s6660_s10 = smov 64   ;;  %s6661_s17 = smov 56  }
  0x78   : > { %v594_v41 = vcombine.high %v6923_v34, %v6923_v34  ;;  %v6937_v42 = vrot.slane %v603_v35, %v6879_v5  ;;  %v6940_v43 = vrot.slane %v6057_v31, %v6879_v5  ;;  %v651_v44 = vcombine.high %v6058_v36, %v6058_v36  ;;  %s6042_s21 = sshll.u32 %s6865_s29, 6  ;;  %s6313_s26 = sshll.u32 %s6705_s16, 10 }
  0x79   : > { %v595_v45 = vcombine.high %v6929_v38, %v6929_v38  ;;  %v618_v46 = vcombine.high %v6932_v39, %v6932_v39  ;;  %v6947_v47 = vrot.slane %v627_v40, %v6879_v5  ;;  %v6950_v48 = vrot.slane %v6058_v36, %v6879_v5  ;;  %s217_s30 = scalar_lea.vmem [#allocation10], %s6042_s21  ;;  %s5925_s16 = scalar_lea.sflag [#allocation6], %s6865_s29 }
  0x7a   : > { %v642_v49 = vcombine.high %v6940_v43, %v6940_v43  ;;  %v6955_v50 = vrot.slane %v651_v44, %v6879_v5  ;;  %v1471_v51 = vsel %vm1052_vm1, %v490_v11, 4286644096  ;;  %v1484_v52 = vsel %vm1052_vm1, %v497_v17, 4286644096  ;;  %s5938_s4 = sshll.u32 %s217_s30, 4  ;;  %p9862_p0 = scmp.ne.s32.totalorder %s9671_s6, 0  ;;  %s9589_s4 = int_to_ptr.vmem [resolvable:$true] %s5938_s4 }
  0x7b   : > { %v643_v53 = vcombine.high %v6947_v47, %v6947_v47  ;;  %v666_v54 = vcombine.high %v6950_v48, %v6950_v48  ;;  %v1473_v55 = vunpack.i.l.bf16 %v1471_v51  ;;  %v1474_v56 = vunpack.i.h.bf16 %v1471_v51 }
  0x7c   : > { %v1486_v57 = vunpack.i.l.bf16 %v1484_v52  ;;  %v1487_v58 = vunpack.i.h.bf16 %v1484_v52  ;;  %v1497_v59 = vsel %vm1052_vm1, %v498_v18, 4286644096  ;;  %v1510_v60 = vsel %vm1052_vm1, %v499_v27, 4286644096 }
  0x7d   : > { %v1475_v61 = vmax.f32 %v1473_v55, %v1474_v56  ;;  %v1499_v62 = vunpack.i.l.bf16 %v1497_v59  ;;  %v1500_v63 = vunpack.i.h.bf16 %v1497_v59  ;;  %v1512_v0 = vunpack.i.l.bf16 %v1510_v60 }
  0x7e   : > { %v1488_v1 = vmax.f32 %v1486_v57, %v1487_v58  ;;  %v1513_v2 = vunpack.i.h.bf16 %v1510_v60  ;;  %v1523_v3 = vsel %vm1052_vm1, %v6894_v15, 4286644096  ;;  %v1536_v4 = vsel %vm1052_vm1, %v6903_v22, 4286644096 }
  0x7f   : > { %v1476_v7 = vrot.slane %v1475_v61, 4  ;;  %v1501_v8 = vmax.f32 %v1499_v62, %v1500_v63  ;;  %v1525_v9 = vunpack.i.l.bf16 %v1523_v3  ;;  %v1526_v10 = vunpack.i.h.bf16 %v1523_v3 }
  0x80   : > { %v1489_v11 = vrot.slane %v1488_v1, 4  ;;  %v1514_v12 = vmax.f32 %v1512_v0, %v1513_v2  ;;  %v1538_v13 = vunpack.i.l.bf16 %v1536_v4  ;;  %v1539_v14 = vunpack.i.h.bf16 %v1536_v4 }
  0x81   : > { %v1477_v16 = vmax.f32 %v1475_v61, %v1476_v7  ;;  %v1502_v17 = vrot.slane %v1501_v8, 4  ;;  %v1527_v18 = vmax.f32 %v1525_v9, %v1526_v10  ;;  %v1549_v19 = vsel %vm1052_vm1, %v522_v23, 4286644096 }
  0x82   : > { %v1490_v21 = vmax.f32 %v1488_v1, %v1489_v11  ;;  %v1515_v24 = vrot.slane %v1514_v12, 4  ;;  %v1540_v26 = vmax.f32 %v1538_v13, %v1539_v14  ;;  %v1551_v15 = vunpack.i.l.bf16 %v1549_v19 }
  0x83   : > { %v1478_v27 = vrot.slane %v1477_v16, 2  ;;  %v1503_v30 = vmax.f32 %v1501_v8, %v1502_v17  ;;  %v1528_v31 = vrot.slane %v1527_v18, 4  ;;  %v1552_v35 = vunpack.i.h.bf16 %v1549_v19 }
  0x84   : > { %v1491_v36 = vrot.slane %v1490_v21, 2  ;;  %v1516_v40 = vmax.f32 %v1514_v12, %v1515_v24  ;;  %v1541_v44 = vrot.slane %v1540_v26, 4  ;;  %v1575_v51 = vsel %vm1052_vm1, %v6899_v20, 4286644096 }
  0x85   : > { %v1479_v52 = vmax.f32 %v1477_v16, %v1478_v27  ;;  %v1504_v55 = vrot.slane %v1503_v30, 2  ;;  %v1529_v56 = vmax.f32 %v1527_v18, %v1528_v31  ;;  %v1553_v57 = vmax.f32 %v1551_v15, %v1552_v35 }
  0x86   : > { %v1492_v58 = vmax.f32 %v1490_v21, %v1491_v36  ;;  %v1517_v23 = vrot.slane %v1516_v40, 2  ;;  %v1542_v59 = vmax.f32 %v1540_v26, %v1541_v44  ;;  %v1577_v60 = vunpack.i.l.bf16 %v1575_v51 }
  0x87   : > { %v1480_v61 = vrot.slane %v1479_v52, 1  ;;  %v1505_v62 = vmax.f32 %v1503_v30, %v1504_v55  ;;  %v1530_v63 = vrot.slane %v1529_v56, 2  ;;  %v1554_v0 = vrot.slane %v1553_v57, 4 }
  0x88   : > { %v1493_v1 = vrot.slane %v1492_v58, 1  ;;  %v1518_v2 = vmax.f32 %v1516_v40, %v1517_v23  ;;  %v1543_v3 = vrot.slane %v1542_v59, 2  ;;  %v1578_v4 = vunpack.i.h.bf16 %v1575_v51 }
  0x89   : > { %v6972_v7 = vmax.f32 %v1479_v52, %v1480_v61  ;;  %v1506_v8 = vrot.slane %v1505_v62, 1  ;;  %v1531_v9 = vmax.f32 %v1529_v56, %v1530_v63  ;;  %v1555_v10 = vmax.f32 %v1553_v57, %v1554_v0 }
  0x8a   : > { %v6974_v11 = vmax.f32 %v1492_v58, %v1493_v1  ;;  %v1519_v12 = vrot.slane %v1518_v2, 1  ;;  %v1544_v13 = vmax.f32 %v1542_v59, %v1543_v3  ;;  %v1579_v14 = vmax.f32 %v1577_v60, %v1578_v4 }
  0x8b   : > { %v1482_v16 = vpack.i.bf16 %v6972_v7, %v6972_v7  ;;  %v6978_v17 = vmax.f32 %v1505_v62, %v1506_v8  ;;  %v1532_v18 = vrot.slane %v1531_v9, 1  ;;  %v1556_v19 = vrot.slane %v1555_v10, 2 }
  0x8c   : > { %v1495_v21 = vpack.i.bf16 %v6974_v11, %v6974_v11  ;;  %v6982_v24 = vmax.f32 %v1518_v2, %v1519_v12  ;;  %v1545_v26 = vrot.slane %v1544_v13, 1  ;;  %v1580_v15 = vrot.slane %v1579_v14, 4 }
  0x8d   : > { %v1508_v27 = vpack.i.bf16 %v6978_v17, %v6978_v17  ;;  %v6986_v30 = vmax.f32 %v1531_v9, %v1532_v18  ;;  %v1557_v31 = vmax.f32 %v1555_v10, %v1556_v19  ;;  %v1588_v35 = vsel %vm1052_vm1, %v6912_v28, 4286644096 }
  0x8e   : > { %v1521_v36 = vpack.i.bf16 %v6982_v24, %v6982_v24  ;;  %v6992_v40 = vmax.f32 %v1544_v13, %v1545_v26  ;;  %v1581_v44 = vmax.f32 %v1579_v14, %v1580_v15  ;;  %v1590_v51 = vunpack.i.l.bf16 %v1588_v35 }
  0x8f   : > { %v1534_v52 = vpack.i.bf16 %v6986_v30, %v6986_v30  ;;  %v1558_v55 = vrot.slane %v1557_v31, 1  ;;  %v1591_v56 = vunpack.i.h.bf16 %v1588_v35  ;;  %v1601_v57 = vsel %vm1052_vm1, %v546_v29, 4286644096 }
  0x90   : > { %v1582_v23 = vrot.slane %v1581_v44, 2  ;;  %v1603_v59 = vunpack.i.l.bf16 %v1601_v57  ;;  %v1604_v60 = vunpack.i.h.bf16 %v1601_v57  ;;  %v1614_v63 = vsel %vm1052_vm1, %v547_v37, 4286644096 }
  0x91   : > { %v7002_v61 = vmax.f32 %v1557_v31, %v1558_v55  ;;  %v1592_v62 = vmax.f32 %v1590_v51, %v1591_v56  ;;  %v1627_v0 = vsel %vm1052_vm1, %v6908_v25, 4286644096  ;;  %v1616_v29 = vunpack.i.l.bf16 %v1614_v63 }
  0x92   : > { %v1583_v20 = vmax.f32 %v1581_v44, %v1582_v23  ;;  %v1605_v1 = vmax.f32 %v1603_v59, %v1604_v60  ;;  %v1617_v2 = vunpack.i.h.bf16 %v1614_v63  ;;  %v1629_v8 = vunpack.i.l.bf16 %v1627_v0 }
  0x93   : > { %v1593_v4 = vrot.slane %v1592_v62, 4  ;;  %v1630_v9 = vunpack.i.h.bf16 %v1627_v0  ;;  %v1640_v28 = vsel %vm1052_vm1, %v6918_v32, 4286644096  ;;  %v1653_v35 = vsel %vm1052_vm1, %v570_v33, 4286644096 }
  0x94   : > { %v1584_v10 = vrot.slane %v1583_v20, 1  ;;  %v1606_v12 = vrot.slane %v1605_v1, 4  ;;  %v1618_v13 = vmax.f32 %v1616_v29, %v1617_v2  ;;  %v1642_v18 = vunpack.i.l.bf16 %v1640_v28 }
  0x95   : > { %v1594_v37 = vmax.f32 %v1592_v62, %v1593_v4  ;;  %v1631_v14 = vmax.f32 %v1629_v8, %v1630_v9  ;;  %v1643_v19 = vunpack.i.h.bf16 %v1640_v28  ;;  %v1655_v56 = vunpack.i.l.bf16 %v1653_v35 }
  0x96   : > { %v7014_v26 = vmax.f32 %v1583_v20, %v1584_v10  ;;  %v1607_v15 = vmax.f32 %v1605_v1, %v1606_v12  ;;  %v1619_v31 = vrot.slane %v1618_v13, 4  ;;  %v1656_v60 = vunpack.i.h.bf16 %v1653_v35 }
  0x97   : > { %v1595_v44 = vrot.slane %v1594_v37, 2  ;;  %v1632_v51 = vrot.slane %v1631_v14, 4  ;;  %v1644_v55 = vmax.f32 %v1642_v18, %v1643_v19  ;;  %v1679_v20 = vsel %vm1052_vm1, %v6923_v34, 4286644096 }
  0x98   : > { %v1586_v57 = vpack.i.bf16 %v7014_v26, %v7014_v26  ;;  %v1608_v23 = vrot.slane %v1607_v15, 2  ;;  %v1620_v59 = vmax.f32 %v1618_v13, %v1619_v31  ;;  %v1657_v29 = vmax.f32 %v1655_v56, %v1656_v60 }
  0x99   : > { %v1596_v62 = vmax.f32 %v1594_v37, %v1595_v44  ;;  %v1633_v63 = vmax.f32 %v1631_v14, %v1632_v51  ;;  %v1645_v0 = vrot.slane %v1644_v55, 4  ;;  %v1681_v33 = vunpack.i.l.bf16 %v1679_v20 }
  0x9a   : > { %v1609_v1 = vmax.f32 %v1607_v15, %v1608_v23  ;;  %v1621_v25 = vrot.slane %v1620_v59, 2  ;;  %v1682_v9 = vunpack.i.h.bf16 %v1679_v20  ;;  %v1658_v28 = vrot.slane %v1657_v29, 4 }
  0x9b   : > { %v1597_v2 = vrot.slane %v1596_v62, 1  ;;  %v1634_v4 = vrot.slane %v1633_v63, 2  ;;  %v1646_v8 = vmax.f32 %v1644_v55, %v1645_v0  ;;  %v1692_v13 = vsel %vm1052_vm1, %v6929_v38, 4286644096 }
  0x9c   : > { %v1610_v10 = vrot.slane %v1609_v1, 1  ;;  %v1622_v12 = vmax.f32 %v1620_v59, %v1621_v25  ;;  %v1683_v19 = vmax.f32 %v1681_v33, %v1682_v9  ;;  %v1659_v35 = vmax.f32 %v1657_v29, %v1658_v28 }
  0x9d   : > { %v7026_v37 = vmax.f32 %v1596_v62, %v1597_v2  ;;  %v1635_v14 = vmax.f32 %v1633_v63, %v1634_v4  ;;  %v1647_v18 = vrot.slane %v1646_v8, 2  ;;  %v1694_v44 = vunpack.i.l.bf16 %v1692_v13 }
  0x9e   : > { %v7028_v31 = vmax.f32 %v1609_v1, %v1610_v10  ;;  %v1623_v15 = vrot.slane %v1622_v12, 1  ;;  %v1684_v23 = vrot.slane %v1683_v19, 4  ;;  %v1660_v62 = vrot.slane %v1659_v35, 2 }
  0x9f   : > { %v1599_v51 = vpack.i.bf16 %v7026_v37, %v7026_v37  ;;  %v1636_v55 = vrot.slane %v1635_v14, 1  ;;  %v1648_v56 = vmax.f32 %v1646_v8, %v1647_v18  ;;  %v1695_v63 = vunpack.i.h.bf16 %v1692_v13 }
  0xa0   : > { %v1612_v59 = vpack.i.bf16 %v7028_v31, %v7028_v31  ;;  %v7034_v60 = vmax.f32 %v1622_v12, %v1623_v15  ;;  %v1685_v1 = vmax.f32 %v1683_v19, %v1684_v23  ;;  %v1705_v25 = vsel %vm1052_vm1, %v594_v41, 4286644096 }
  0xa1   : > { %v7036_v0 = vmax.f32 %v1635_v14, %v1636_v55  ;;  %v1649_v20 = vrot.slane %v1648_v56, 1  ;;  %v1661_v33 = vmax.f32 %v1659_v35, %v1660_v62  ;;  %v1696_v2 = vmax.f32 %v1694_v44, %v1695_v63 }
  0xa2   : > { %v1625_v29 = vpack.i.bf16 %v7034_v60, %v7034_v60  ;;  %v1707_v4 = vunpack.i.l.bf16 %v1705_v25  ;;  %v1686_v10 = vrot.slane %v1685_v1, 2  ;;  %v1708_v12 = vunpack.i.h.bf16 %v1705_v25 }
  0xa3   : > { %v7046_v9 = vmax.f32 %v1648_v56, %v1649_v20  ;;  %v1662_v28 = vrot.slane %v1661_v33, 1  ;;  %v1697_v13 = vrot.slane %v1696_v2, 4  ;;  %v1718_v34 = vsel %vm1052_vm1, %v595_v45, 4286644096 }
  0xa4   : > { %v1731_v41 = vsel %vm1052_vm1, %v6932_v39, 4286644096  ;;  %v1687_v18 = vmax.f32 %v1685_v1, %v1686_v10  ;;  %v1709_v19 = vmax.f32 %v1707_v4, %v1708_v12  ;;  %v1720_v15 = vunpack.i.l.bf16 %v1718_v34 }
  0xa5   : > { %v7056_v35 = vmax.f32 %v1661_v33, %v1662_v28  ;;  %v1698_v44 = vmax.f32 %v1696_v2, %v1697_v13  ;;  %v1721_v55 = vunpack.i.h.bf16 %v1718_v34  ;;  %v1733_v56 = vunpack.i.l.bf16 %v1731_v41 }
  0xa6   : > { %v1688_v23 = vrot.slane %v1687_v18, 1  ;;  %v1710_v62 = vrot.slane %v1709_v19, 4  ;;  %v1734_v63 = vunpack.i.h.bf16 %v1731_v41  ;;  %v1744_v38 = vsel %vm1052_vm1, %v6937_v42, 4286644096 }
  0xa7   : > { %v1699_v20 = vrot.slane %v1698_v44, 2  ;;  %v1722_v25 = vmax.f32 %v1720_v15, %v1721_v55  ;;  %v1746_v3 = vunpack.i.l.bf16 %v1744_v38  ;;  %v1747_v10 = vunpack.i.h.bf16 %v1744_v38 }
  0xa8   : > { %v7062_v1 = vmax.f32 %v1687_v18, %v1688_v23  ;;  %v1711_v4 = vmax.f32 %v1709_v19, %v1710_v62  ;;  %v1735_v33 = vmax.f32 %v1733_v56, %v1734_v63  ;;  %v1757_v28 = vsel %vm1052_vm1, %v618_v46, 4286644096 }
  0xa9   : > { %v1700_v2 = vmax.f32 %v1698_v44, %v1699_v20  ;;  %v1723_v12 = vrot.slane %v1722_v25, 4  ;;  %v1783_v13 = vsel %vm1052_vm1, %v6940_v43, 4286644096  ;;  %v1748_v18 = vmax.f32 %v1746_v3, %v1747_v10 }
  0xaa   : > { %v1712_v41 = vrot.slane %v1711_v4, 2  ;;  %v1736_v15 = vrot.slane %v1735_v33, 4  ;;  %v1759_v56 = vunpack.i.l.bf16 %v1757_v28  ;;  %v1760_v23 = vunpack.i.h.bf16 %v1757_v28 }
  0xab   : > { %v1701_v55 = vrot.slane %v1700_v2, 1  ;;  %v1724_v19 = vmax.f32 %v1722_v25, %v1723_v12  ;;  %v1749_v63 = vrot.slane %v1748_v18, 4  ;;  %v1785_v38 = vunpack.i.l.bf16 %v1783_v13 }
  0xac   : > { %v1713_v44 = vmax.f32 %v1711_v4, %v1712_v41  ;;  %v1737_v62 = vmax.f32 %v1735_v33, %v1736_v15  ;;  %v1761_v20 = vmax.f32 %v1759_v56, %v1760_v23  ;;  %v1786_v45 = vunpack.i.h.bf16 %v1783_v13 }
  0xad   : > { %v7072_v39 = vmax.f32 %v1700_v2, %v1701_v55  ;;  %v1725_v46 = vrot.slane %v1724_v19, 2  ;;  %v1750_v8 = vmax.f32 %v1748_v18, %v1749_v63  ;;  %v1796_v34 = vsel %vm1052_vm1, %v6947_v47, 4286644096 }
  0xae   : > { %v1714_v14 = vrot.slane %v1713_v44, 1  ;;  %v1738_v58 = vrot.slane %v1737_v62, 2  ;;  %v1762_v10 = vrot.slane %v1761_v20, 4  ;;  %v1787_v4 = vmax.f32 %v1785_v38, %v1786_v45 }
  0xaf   : > { %v1703_v3 = vpack.i.bf16 %v7072_v39, %v7072_v39  ;;  %v1726_v25 = vmax.f32 %v1724_v19, %v1725_v46  ;;  %v1751_v2 = vrot.slane %v1750_v8, 2  ;;  %v1798_v28 = vunpack.i.l.bf16 %v1796_v34  ;;  %v3188_v46 = vld [vmem:[#allocation2 + $0x20] sm:$0x1] }
  0xb0   : > { %v7078_v33 = vmax.f32 %v1713_v44, %v1714_v14  ;;  %v1739_v12 = vmax.f32 %v1737_v62, %v1738_v58  ;;  %v1763_v15 = vmax.f32 %v1761_v20, %v1762_v10  ;;  %v1788_v13 = vrot.slane %v1787_v4, 4 }
  0xb1   : > { %v1727_v41 = vrot.slane %v1726_v25, 1  ;;  %v1799_v55 = vunpack.i.h.bf16 %v1796_v34  ;;  %v1752_v23 = vmax.f32 %v1750_v8, %v1751_v2  ;;  %v1809_v19 = vsel %vm1052_vm1, %v642_v49, 4286644096 }
  0xb2   : > { %v1740_v56 = vrot.slane %v1739_v12, 1  ;;  %v1764_v58 = vrot.slane %v1763_v15, 2  ;;  %v1789_v45 = vmax.f32 %v1787_v4, %v1788_v13  ;;  %v1811_v34 = vunpack.i.l.bf16 %v1809_v19 }
  0xb3   : > { %v7086_v14 = vmax.f32 %v1726_v25, %v1727_v41  ;;  %v1800_v44 = vmax.f32 %v1798_v28, %v1799_v55  ;;  %v1753_v63 = vrot.slane %v1752_v23, 1  ;;  %v1812_v38 = vunpack.i.h.bf16 %v1809_v19 }
  0xb4   : > { %v7088_v62 = vmax.f32 %v1739_v12, %v1740_v56  ;;  %v1765_v8 = vmax.f32 %v1763_v15, %v1764_v58  ;;  %v1790_v20 = vrot.slane %v1789_v45, 2  ;;  %v1822_v4 = vsel %vm1052_vm1, %v643_v53, 4286644096 }
  0xb5   : > { %v1801_v10 = vrot.slane %v1800_v44, 4  ;;  %v7094_v49 = vmax.f32 %v1752_v23, %v1753_v63  ;;  %v1813_v25 = vmax.f32 %v1811_v34, %v1812_v38  ;;  %v1824_v41 = vunpack.i.l.bf16 %v1822_v4 }
  0xb6   : > { %v1766_v12 = vrot.slane %v1765_v8, 1  ;;  %v1791_v2 = vmax.f32 %v1789_v45, %v1790_v20  ;;  %v1825_v55 = vunpack.i.h.bf16 %v1822_v4  ;;  %v1835_v56 = vsel %vm1052_vm1, %v6950_v48, 4286644096 }
  0xb7   : > { %v1802_v28 = vmax.f32 %v1800_v44, %v1801_v10  ;;  %v1814_v13 = vrot.slane %v1813_v25, 4  ;;  %v1837_v63 = vunpack.i.l.bf16 %v1835_v56  ;;  %v1838_v53 = vunpack.i.h.bf16 %v1835_v56 }
  0xb8   : > { %v7104_v23 = vmax.f32 %v1765_v8, %v1766_v12  ;;  %v1792_v19 = vrot.slane %v1791_v2, 1  ;;  %v1826_v34 = vmax.f32 %v1824_v41, %v1825_v55  ;;  %v1848_v45 = vsel %vm1052_vm1, %v6955_v50, 4286644096 }
  0xb9   : > { %v1803_v58 = vrot.slane %v1802_v28, 2  ;;  %v1815_v47 = vmax.f32 %v1813_v25, %v1814_v13  ;;  %v1850_v10 = vunpack.i.l.bf16 %v1848_v45  ;;  %v1839_v8 = vmax.f32 %v1837_v63, %v1838_v53 }
  0xba   : > { %v7110_v38 = vmax.f32 %v1791_v2, %v1792_v19  ;;  %v1827_v15 = vrot.slane %v1826_v34, 4  ;;  %v1851_v12 = vunpack.i.h.bf16 %v1848_v45  ;;  %v1861_v41 = vsel %vm1052_vm1, %v666_v54, 4286644096 }
  0xbb   : > { %v1804_v20 = vmax.f32 %v1802_v28, %v1803_v58  ;;  %v1816_v4 = vrot.slane %v1815_v47, 2  ;;  %v2832_v2 = vsel %vm2718_vm3, %v1482_v16, 4286644096  ;;  %v1840_v55 = vrot.slane %v1839_v8, 4 }
  0xbc   : > { %v1794_v43 = vpack.i.bf16 %v7110_v38, %v7110_v38  ;;  %v1828_v13 = vmax.f32 %v1826_v34, %v1827_v15  ;;  %v1852_v56 = vmax.f32 %v1850_v10, %v1851_v12  ;;  %v1863_v58 = vunpack.i.l.bf16 %v1861_v41 }
  0xbd   : > { %v1805_v25 = vrot.slane %v1804_v20, 1  ;;  %v1817_v28 = vmax.f32 %v1815_v47, %v1816_v4  ;;  %v1864_v63 = vunpack.i.h.bf16 %v1861_v41  ;;  %v2835_v53 = vsel %vm2718_vm3, %v1586_v57, 4286644096 }
  0xbe   : > { %v1829_v45 = vrot.slane %v1828_v13, 2  ;;  %v1841_v54 = vmax.f32 %v1839_v8, %v1840_v55  ;;  %v1853_v44 = vrot.slane %v1852_v56, 4  ;;  %v7126_v16 = vmax.bf16 %v2835_v53, %v2832_v2 }
  0xbf   : > { %v1806_v19 = vmax.f32 %v1804_v20, %v1805_v25  ;;  %v1818_v48 = vrot.slane %v1817_v28, 1  ;;  %v1865_v18 = vmax.f32 %v1863_v58, %v1864_v63  ;;  %v2839_v15 = vsel %vm2718_vm3, %v1495_v21, 4286644096 }
  0xc0   : > { %v1830_v34 = vmax.f32 %v1828_v13, %v1829_v45  ;;  %v1842_v20 = vrot.slane %v1841_v54, 2  ;;  %v1854_v26 = vmax.f32 %v1852_v56, %v1853_v44  ;;  %v2842_v57 = vsel %vm2718_vm3, %v1599_v51, 4286644096 }
  0xc1   : > { %v1807_v7 = vpack.i.bf16 %v1806_v19, %v1806_v19  ;;  %v1819_v47 = vmax.f32 %v1817_v28, %v1818_v48  ;;  %v1866_v10 = vrot.slane %v1865_v18, 4  ;;  %v2846_v4 = vsel %vm2718_vm3, %v1508_v27, 4286644096 }
  0xc2   : > { %v3189_v11 = vsel %vm6883_vm2, 0, %v3188_v46  ;;  %v1831_v21 = vrot.slane %v1830_v34, 1  ;;  %v1843_v12 = vmax.f32 %v1841_v54, %v1842_v20  ;;  %v1855_v25 = vrot.slane %v1854_v26, 2 }
  0xc3   : > { %v1820_v8 = vpack.i.bf16 %v1819_v47, %v1819_v47  ;;  %3190 = vst [vmem:[#allocation2 + $0x20] sm:$0x1] %v3189_v11  ;;  %v1867_v44 = vmax.f32 %v1865_v18, %v1866_v10  ;;  %v7142_v41 = vmax.bf16 %v2842_v57, %v2839_v15  ;;  %v2849_v37 = vsel %vm2718_vm3, %v1612_v59, 4286644096 }
  0xc4   : > { %v2853_v17 = vsel %vm2718_vm3, %v1521_v36, 4286644096  ;;  %v1832_v27 = vmax.f32 %v1830_v34, %v1831_v21  ;;  %v1844_v51 = vrot.slane %v1843_v12, 1  ;;  %v1856_v46 = vmax.f32 %v1854_v26, %v1855_v25 }
  0xc5   : > { %v7152_v2 = vmax.bf16 %v2849_v37, %v2846_v4  ;;  %v1868_v28 = vrot.slane %v1867_v44, 2  ;;  %v2856_v18 = vsel %vm2718_vm3, %v1625_v29, 4286644096  ;;  %v2860_v31 = vsel %vm2718_vm3, %v1534_v52, 4286644096 }
  0xc6   : > { %v6091_v24 = vcombine.low %v7126_v16, %v7126_v16  ;;  %v1833_v36 = vpack.i.bf16 %v1832_v27, %v1832_v27  ;;  %v1845_v59 = vmax.f32 %v1843_v12, %v1844_v51  ;;  %v1857_v13 = vrot.slane %v1856_v46, 1 }
  0xc7   : > { %v2858_v55 = vmax.bf16 %v2856_v18, %v2853_v17  ;;  %v1869_v56 = vmax.f32 %v1867_v44, %v1868_v28  ;;  %v9678_v19 = vpack.i.bf16 %v7036_v0, %v7036_v0  ;;  %v9679_v29 = vpack.i.bf16 %v6992_v40, %v6992_v40 }
  0xc8   : > { %v9680_v52 = vpack.i.bf16 %v7046_v9, %v7046_v9  ;;  %v1846_v63 = vpack.i.bf16 %v1845_v59, %v1845_v59  ;;  %v1858_v53 = vmax.f32 %v1856_v46, %v1857_v13  ;;  %v9681_v0 = vpack.i.bf16 %v7002_v61, %v7002_v61 }
  0xc9   : > { %v2863_v60 = vsel %vm2718_vm3, %v9678_v19, 4286644096  ;;  %v2867_v30 = vsel %vm2718_vm3, %v9679_v29, 4286644096  ;;  %v1870_v54 = vrot.slane %v1869_v56, 1  ;;  %v9682_v40 = vpack.i.bf16 %v7056_v35, %v7056_v35 }
  0xca   : > { %v2870_v58 = vsel %vm2718_vm3, %v9680_v52, 4286644096  ;;  %v2865_v48 = vmax.bf16 %v2863_v60, %v2860_v31  ;;  %v2874_v16 = vsel %vm2718_vm3, %v9681_v0, 4286644096  ;;  %v6092_v9 = vcombine.low %v7142_v41, %v7142_v41 }
  0xcb   : > { %v2872_v45 = vmax.bf16 %v2870_v58, %v2867_v30  ;;  %v2877_v15 = vsel %vm2718_vm3, %v9682_v40, 4286644096  ;;  %v1859_v47 = vpack.i.bf16 %v1858_v53, %v1858_v53  ;;  %v9683_v20 = vpack.i.bf16 %v7062_v1, %v7062_v1  ;;  %v6044_v40 = vld.sshfl [vmem:[%s6869_s5 + $0x4] sm:$0x33 pattern:$0x75316420] }
  0xcc   : > { %v2879_v34 = vmax.bf16 %v2877_v15, %v2874_v16  ;;  %v2891_v61 = vsel %vm2718_vm3, %v1794_v43, 4286644096  ;;  %v1871_v10 = vmax.f32 %v1869_v56, %v1870_v54  ;;  %v2895_v35 = vsel %vm2718_vm3, %v1703_v3, 4286644096 }
  0xcd   : > { %v2888_v26 = vsel %vm2718_vm3, %v9683_v20, 4286644096  ;;  %v2898_v4 = vsel %vm2718_vm3, %v1807_v7, 4286644096  ;;  %v9684_v1 = vpack.i.bf16 %v7078_v33, %v7078_v33  ;;  %v2905_v38 = vsel %vm2718_vm3, %v1820_v8, 4286644096 }
  0xce   : > { %v2893_v57 = vmax.bf16 %v2891_v61, %v2888_v26  ;;  %v2900_v11 = vmax.bf16 %v2898_v4, %v2895_v35  ;;  %v9685_v43 = vpack.i.bf16 %v7086_v14, %v7086_v14  ;;  %v1872_v39 = vpack.i.bf16 %v1871_v10, %v1871_v10  ;;  %v6045_v4 = vld.sshfl [vmem:[%s6869_s5 + $0x8] sm:$0x33 pattern:$0x75316420] }
  0xcf   : > { %v2902_v21 = vsel %vm2718_vm3, %v9684_v1, 4286644096  ;;  %v2912_v3 = vsel %vm2718_vm3, %v1833_v36, 4286644096  ;;  %v9686_v7 = vpack.i.bf16 %v7088_v62, %v7088_v62  ;;  %v2919_v41 = vsel %vm2718_vm3, %v1846_v63, 4286644096 }
  0xd0   : > { %v2909_v12 = vsel %vm2718_vm3, %v9685_v43, 4286644096  ;;  %v2907_v25 = vmax.bf16 %v2905_v38, %v2902_v21  ;;  %v9687_v8 = vpack.i.bf16 %v7094_v49, %v7094_v49  ;;  %v2926_v37 = vsel %vm2718_vm3, %v1859_v47, 4286644096 }
  0xd1   : > { %v2916_v44 = vsel %vm2718_vm3, %v9686_v7, 4286644096  ;;  %v2914_v33 = vmax.bf16 %v2912_v3, %v2909_v12  ;;  %v9688_v51 = vpack.i.bf16 %v7104_v23, %v7104_v23  ;;  %v2933_v46 = vsel %vm2718_vm3, %v1872_v39, 4286644096 }
  0xd2   : > { %v2923_v14 = vsel %vm2718_vm3, %v9687_v8, 4286644096  ;;  %v2921_v17 = vmax.bf16 %v2919_v41, %v2916_v44  ;;  %vm3206_vm10 = vsmask.f32 7938  ;;  %v6093_v49 = vcombine.low %v7152_v2, %v7152_v2  ;;  %v3595_v8 = vld [vmem:[#allocation2 + $0x18] sm:$0xf] }
  0xd3   : > { %v2928_v27 = vmax.bf16 %v2926_v37, %v2923_v14  ;;  %v2930_v62 = vsel %vm2718_vm3, %v9688_v51, 4286644096  ;;  %v6094_v18 = vcombine.low %v2858_v55, %v2858_v55  ;;  %v6095_v31 = vcombine.low %v2865_v48, %v2865_v48  ;;  %v6043_v55 = vld.sshfl [vmem:[%s6869_s5] sm:$0x33 pattern:$0x75316420]  ;;  %vm7253_vm12 = vmand %vm3167_vm9, %vm3206_vm10 }
  0xd4   : > { %v2935_v28 = vmax.bf16 %v2933_v46, %v2930_v62  ;;  %v6096_v36 = vcombine.low %v2872_v45, %v2872_v45  ;;  %v6097_v59 = vcombine.low %v2879_v34, %v2879_v34  ;;  %v6099_v13 = vcombine.low %v2893_v57, %v2893_v57  ;;  %v6046_v38 = vld.sshfl [vmem:[%s6869_s5 + $0xc] sm:$0x33 pattern:$0x75316420]  ;;  %v3601_v51 = vld [vmem:[#allocation2 + $0x20] sm:$0xf]  ;;  %vm8343_vm13 = vmand %vm1052_vm1, %vm3206_vm10 }
  0xd5   : > { %v6100_v56 = vcombine.low %v2900_v11, %v2900_v11  ;;  %v6101_v19 = vcombine.low %v2907_v25, %v2907_v25  ;;  %v6102_v23 = vcombine.low %v2914_v33, %v2914_v33  ;;  %v6103_v60 = vcombine.low %v2921_v17, %v2921_v17  ;;  %v6047_v25 = vld.sshfl [vmem:[%s6869_s5 + $0x10] sm:$0x33 pattern:$0x75316420] }
  0xd6   : > { %v6104_v29 = vcombine.low %v2928_v27, %v2928_v27  ;;  %v3446_v30 = vunpack.c.l.b16 %v6091_v24  ;;  %v3447_v52 = vunpack.c.l.b16 %v6092_v9  ;;  %v3448_v58 = vunpack.c.l.b16 %v6093_v49  ;;  %v6048_v62 = vld.sshfl [vmem:[%s6869_s5 + $0x14] sm:$0x33 pattern:$0x75316420] }
  0xd7   : > { %vm3504_vm11 = vcmask 1047559   ;;  %v6105_v63 = vcombine.low %v2935_v28, %v2935_v28  ;;  %v3449_v53 = vunpack.c.l.b16 %v6094_v18  ;;  %v3450_v54 = vunpack.c.l.b16 %v6095_v31  ;;  %v6049_v18 = vld.sshfl [vmem:[%s6869_s5 + $0x18] sm:$0x33 pattern:$0x75316420] }
  0xd8   : > { %v3451_v2 = vunpack.c.l.b16 %v6096_v36  ;;  %v3454_v48 = vunpack.c.l.b16 %v6099_v13  ;;  %v3455_v45 = vunpack.c.l.b16 %v6100_v56  ;;  %v3456_v0 = vunpack.c.l.b16 %v6101_v19  ;;  %v6050_v56 = vld.sshfl [vmem:[%s6869_s5 + $0x1c] sm:$0x33 pattern:$0x75316420] }
  0xd9   : > { %v3457_v16 = vunpack.c.l.b16 %v6102_v23  ;;  %v3452_v15 = vunpack.c.l.b16 %v6097_v59  ;;  %v3458_v47 = vunpack.c.l.b16 %v6103_v60  ;;  %v3459_v34 = vunpack.c.l.b16 %v6104_v29 }
  0xda   : > { %v3512_v24 = vsel %vm3494_vm4, %v3447_v52, %v3446_v30  ;;  %v3518_v20 = vsel %vm3494_vm4, %v3455_v45, %v3454_v48  ;;  %v291_v26 = vcombine.high %v6043_v55, %v6043_v55  ;;  %v7232_v61 = vrot.slane %v6043_v55, %v6879_v5 }
  0xdb   : > { %v3513_v9 = vsel %vm3496_vm5, %v3448_v58, %v3512_v24  ;;  %v3460_v10 = vunpack.c.l.b16 %v6105_v63  ;;  %v3519_v35 = vsel %vm3496_vm5, %v3456_v0, %v3518_v20  ;;  %v315_v11 = vcombine.high %v6044_v40, %v6044_v40 }
  0xdc   : > { %v3514_v57 = vsel %vm3498_vm6, %v3449_v53, %v3513_v9  ;;  %v3520_v21 = vsel %vm3498_vm6, %v3457_v16, %v3519_v35  ;;  %v7241_v43 = vrot.slane %v6044_v40, %v6879_v5  ;;  %v305_v3 = vrot.slane %v291_v26, %v6879_v5 }
  0xdd   : > { %v3515_v1 = vsel %vm3500_vm7, %v3450_v54, %v3514_v57  ;;  %v3521_v39 = vsel %vm3500_vm7, %v3458_v47, %v3520_v21  ;;  %v306_v7 = vcombine.high %v7232_v61, %v7232_v61  ;;  %v7258_v14 = vrot.slane %v315_v11, %v6879_v5 }
  0xde   : > { %v3516_v12 = vsel %vm3502_vm8, %v3451_v2, %v3515_v1  ;;  %v3522_v33 = vsel %vm3502_vm8, %v3459_v34, %v3521_v39  ;;  %v339_v37 = vcombine.high %v6045_v4, %v6045_v4  ;;  %v7263_v46 = vrot.slane %v6045_v4, %v6879_v5 }
  0xdf   : > { %v3517_v44 = vsel %vm3504_vm11, %v3452_v15, %v3516_v12  ;;  %v3523_v17 = vsel %vm3504_vm11, %v3460_v10, %v3522_v33  ;;  %v363_v28 = vcombine.high %v6046_v38, %v6046_v38  ;;  %v7270_v36 = vrot.slane %v6046_v38, %v6879_v5 }
  0xe0   : > { %v3552_v27 = vpack.c.b16 %v3517_v44, %v3517_v44  ;;  %v3554_v49 = vpack.c.b16 %v3523_v17, %v3523_v17  ;;  %v7267_v31 = vrot.slane %v339_v37, %v6879_v5  ;;  %v387_v59 = vcombine.high %v6047_v25, %v6047_v25 }
  0xe1   : > { %v307_v19 = vcombine.high %v305_v3, %v305_v3  ;;  %v330_v23 = vcombine.high %v7241_v43, %v7241_v43  ;;  %v7278_v60 = vrot.slane %v6047_v25, %v6879_v5  ;;  %v354_v30 = vcombine.high %v7263_v46, %v7263_v46 }
  0xe2   : > { %v3596_v13 = vsel %vm7253_vm12, %v3552_v27, %v3595_v8  ;;  %v3602_v29 = vsel %vm7253_vm12, %v3554_v49, %v3601_v51  ;;  %v7285_v52 = vrot.slane %v363_v28, %v6879_v5  ;;  %v7288_v58 = vrot.slane %v387_v59, %v6879_v5 }
  0xe3   : > { %3597 = vst [vmem:[#allocation2 + $0x18] sm:$0xf] %v3596_v13  ;;  %3603 = vst [vmem:[#allocation2 + $0x20] sm:$0xf] %v3602_v29  ;;  %v355_v63 = vcombine.high %v7267_v31, %v7267_v31  ;;  %v411_v53 = vcombine.high %v6048_v62, %v6048_v62  ;;  %v7293_v54 = vrot.slane %v6048_v62, %v6879_v5  ;;  %v1055_v47 = vsel %vm1052_vm1, %v7232_v61, 4286644096 }
  0xe4   : > { %v435_v2 = vcombine.high %v6049_v18, %v6049_v18  ;;  %v378_v55 = vcombine.high %v7270_v36, %v7270_v36  ;;  %v402_v48 = vcombine.high %v7278_v60, %v7278_v60  ;;  %v7300_v45 = vrot.slane %v6049_v18, %v6879_v5 }
  0xe5   : > { %v459_v0 = vcombine.high %v6050_v56, %v6050_v56  ;;  %v403_v16 = vcombine.high %v7288_v58, %v7288_v58  ;;  %v7305_v40 = vrot.slane %v411_v53, %v6879_v5  ;;  %v7308_v15 = vrot.slane %v6050_v56, %v6879_v5 }
  0xe6   : > { %v426_v34 = vcombine.high %v7293_v54, %v7293_v54  ;;  %v7315_v24 = vrot.slane %v435_v2, %v6879_v5  ;;  %v450_v9 = vcombine.high %v7300_v45, %v7300_v45  ;;  %v1057_v20 = vunpack.i.l.bf16 %v1055_v47 }
  0xe7   : > { %v7320_v26 = vrot.slane %v459_v0, %v6879_v5  ;;  %v1058_v10 = vunpack.i.h.bf16 %v1055_v47  ;;  %v1068_v57 = vsel %vm1052_vm1, %v305_v3, 4286644096  ;;  %v1081_v35 = vsel %vm1052_vm1, %v306_v7, 4286644096 }
  0xe8   : > { %v1070_v61 = vunpack.i.l.bf16 %v1068_v57  ;;  %v1071_v4 = vunpack.i.h.bf16 %v1068_v57  ;;  %v1083_v11 = vunpack.i.l.bf16 %v1081_v35  ;;  %v1084_v1 = vunpack.i.h.bf16 %v1081_v35  ;;  %v7330_v7 = vld.sshfl [vmem:[%s6869_s5 + $0x40] sm:$0x33 pattern:$0x75316420] }
  0xe9   : > { %v474_v38 = vcombine.high %v7308_v15, %v7308_v15  ;;  %v1059_v12 = vmax.f32 %v1057_v20, %v1058_v10  ;;  %v1094_v39 = vsel %vm1052_vm1, %v307_v19, 4286644096  ;;  %v1107_v25 = vsel %vm1052_vm1, %v7241_v43, 4286644096 }
  0xea   : > { %v3823_v21 = vld [vmem:[#allocation2 + $0x18] sm:$0xf]  ;;  %v3824_v44 = vld [vmem:[#allocation2 + $0x20] sm:$0xf]  ;;  %v1072_v8 = vmax.f32 %v1070_v61, %v1071_v4  ;;  %v1085_v37 = vmax.f32 %v1083_v11, %v1084_v1  ;;  %v1096_v29 = vunpack.i.l.bf16 %v1094_v39  ;;  %v451_v53 = vcombine.high %v7315_v24, %v7315_v24 }
  0xeb   : > { %v3866_v33 = vshrl.u32 %v3823_v21, 16  ;;  %v3869_v3 = vshll.u32 %v3823_v21, 16  ;;  %v3880_v17 = vshrl.u32 %v3824_v44, 16  ;;  %v3883_v27 = vshll.u32 %v3824_v44, 16 }
  0xec   : > { %v6184_v51 = vcombine.low %v3823_v21, %v3824_v44  ;;  %v1060_v62 = vrot.slane %v1059_v12, 4  ;;  %v1073_v18 = vrot.slane %v1072_v8, 4  ;;  %v1086_v59 = vrot.slane %v1085_v37, 4 }
  0xed   : > { %v7332_v28 = vrot.slane %v3866_v33, 4  ;;  %v7334_v49 = vrot.slane %v3869_v3, 5  ;;  %v7336_v13 = vrot.slane %v3880_v17, 4  ;;  %v7338_v56 = vrot.slane %v3883_v27, 5 }
  0xee   : > { %4272 = vrot.lane.b32.xlu1 %v6184_v51, %s6649_s18  ;;  %v1061_v19 = vmax.f32 %v1059_v12, %v1060_v62  ;;  %v1074_v2 = vmax.f32 %v1072_v8, %v1073_v18  ;;  %v1087_v0 = vmax.f32 %v1085_v37, %v1086_v59  ;;  %v1097_v47 = vunpack.i.h.bf16 %v1094_v39 }
  0xef   : > { %v1109_v10 = vunpack.i.l.bf16 %v1107_v25  ;;  %v1110_v57 = vunpack.i.h.bf16 %v1107_v25  ;;  %v1120_v39 = vsel %vm1052_vm1, %v7258_v14, 4286644096  ;;  %v1133_v51 = vsel %vm1052_vm1, %v330_v23, 4286644096 }
  0xf0   : > { %v1062_v20 = vrot.slane %v1061_v19, 2  ;;  %v1075_v4 = vrot.slane %v1074_v2, 2  ;;  %v1088_v11 = vrot.slane %v1087_v0, 2  ;;  %v1098_v1 = vmax.f32 %v1096_v29, %v1097_v47 }
  0xf1   : > { %v1111_v44 = vmax.f32 %v1109_v10, %v1110_v57  ;;  %v1122_v8 = vunpack.i.l.bf16 %v1120_v39  ;;  %v1123_v27 = vunpack.i.h.bf16 %v1120_v39  ;;  %v3179_v39 = vld [vmem:[#allocation2 + $0x8] sm:$0x1]  ;;  %vm3786_vm14 = vcmask 1042432  }
  0xf2   : > { %v1063_v12 = vmax.f32 %v1061_v19, %v1062_v20  ;;  %v1076_v33 = vmax.f32 %v1074_v2, %v1075_v4  ;;  %v1089_v3 = vmax.f32 %v1087_v0, %v1088_v11  ;;  %v1099_v25 = vrot.slane %v1098_v1, 4 }
  0xf3   : > { %v1112_v17 = vrot.slane %v1111_v44, 4  ;;  %v1135_v19 = vunpack.i.l.bf16 %v1133_v51  ;;  %v1124_v20 = vmax.f32 %v1122_v8, %v1123_v27  ;;  %v1136_v2 = vunpack.i.h.bf16 %v1133_v51 }
  0xf4   : > { %v1064_v37 = vrot.slane %v1063_v12, 1  ;;  %v1077_v62 = vrot.slane %v1076_v33, 1  ;;  %v1090_v18 = vrot.slane %v1089_v3, 1  ;;  %v1100_v59 = vmax.f32 %v1098_v1, %v1099_v25 }
  0xf5   : > { %v1113_v47 = vmax.f32 %v1111_v44, %v1112_v17  ;;  %v1159_v4 = vsel %vm1052_vm1, %v7263_v46, 4286644096  ;;  %v1125_v11 = vrot.slane %v1124_v20, 4  ;;  %v1137_v1 = vmax.f32 %v1135_v19, %v1136_v2 }
  0xf6   : > { %v7355_v29 = vmax.f32 %v1063_v12, %v1064_v37  ;;  %v7357_v0 = vmax.f32 %v1076_v33, %v1077_v62  ;;  %v7359_v10 = vmax.f32 %v1089_v3, %v1090_v18  ;;  %v1101_v57 = vrot.slane %v1100_v59, 2 }
  0xf7   : > { %v1114_v23 = vrot.slane %v1113_v47, 2  ;;  %v1161_v3 = vunpack.i.l.bf16 %v1159_v4  ;;  %v1126_v8 = vmax.f32 %v1124_v20, %v1125_v11  ;;  %v1138_v37 = vrot.slane %v1137_v1, 4 }
  0xf8   : > { %v1102_v33 = vmax.f32 %v1100_v59, %v1101_v57  ;;  %v1162_v17 = vunpack.i.h.bf16 %v1159_v4  ;;  %v1172_v51 = vsel %vm1052_vm1, %v7267_v31, 4286644096  ;;  %v1185_v62 = vsel %vm1052_vm1, %v354_v30, 4286644096 }
  0xf9   : > { %v1115_v25 = vmax.f32 %v1113_v47, %v1114_v23  ;;  %v3180_v18 = vsel %vm6883_vm2, 0, %v3179_v39  ;;  %v1127_v2 = vrot.slane %v1126_v8, 2  ;;  %v1139_v59 = vmax.f32 %v1137_v1, %v1138_v37 }
  0xfa   : > { %v1103_v27 = vrot.slane %v1102_v33, 1  ;;  %v1163_v57 = vmax.f32 %v1161_v3, %v1162_v17  ;;  %3181 = vst [vmem:[#allocation2 + $0x8] sm:$0x1] %v3180_v18  ;;  %v1174_v20 = vunpack.i.l.bf16 %v1172_v51  ;;  %v1175_v4 = vunpack.i.h.bf16 %v1172_v51 }
  0xfb   : > { %v1116_v19 = vrot.slane %v1115_v25, 1  ;;  %v1187_v23 = vunpack.i.l.bf16 %v1185_v62  ;;  %v1128_v21 = vmax.f32 %v1126_v8, %v1127_v2  ;;  %v1140_v35 = vrot.slane %v1139_v59, 2 }
  0xfc   : > { %v7377_v47 = vmax.f32 %v1102_v33, %v1103_v27  ;;  %v1164_v46 = vrot.slane %v1163_v57, 4  ;;  %v1176_v61 = vmax.f32 %v1174_v20, %v1175_v4  ;;  %v1188_v39 = vunpack.i.h.bf16 %v1185_v62 }
  0xfd   : > { %v7379_v11 = vmax.f32 %v1115_v25, %v1116_v19  ;;  %v1198_v1 = vsel %vm1052_vm1, %v355_v63, 4286644096  ;;  %v1129_v3 = vrot.slane %v1128_v21, 1  ;;  %v1141_v37 = vmax.f32 %v1139_v59, %v1140_v35 }
  0xfe   : > { %v1165_v25 = vmax.f32 %v1163_v57, %v1164_v46  ;;  %v1177_v17 = vrot.slane %v1176_v61, 4  ;;  %v1189_v8 = vmax.f32 %v1187_v23, %v1188_v39  ;;  %v1200_v27 = vunpack.i.l.bf16 %v1198_v1 }
  0xff   : > { %v1201_v51 = vunpack.i.h.bf16 %v1198_v1  ;;  %v7389_v18 = vmax.f32 %v1128_v21, %v1129_v3  ;;  %v1142_v19 = vrot.slane %v1141_v37, 1  ;;  %v1211_v62 = vsel %vm1052_vm1, %v7270_v36, 4286644096 }
 0x100   : > { %v1166_v2 = vrot.slane %v1165_v25, 2  ;;  %v1178_v31 = vmax.f32 %v1176_v61, %v1177_v17  ;;  %v1190_v20 = vrot.slane %v1189_v8, 4  ;;  %v1213_v4 = vunpack.i.l.bf16 %v1211_v62 }
 0x101   : > { %v1202_v63 = vmax.f32 %v1200_v27, %v1201_v51  ;;  %v7395_v35 = vmax.f32 %v1141_v37, %v1142_v19  ;;  %v1214_v57 = vunpack.i.h.bf16 %v1211_v62  ;;  %v1224_v39 = vsel %vm1052_vm1, %v7285_v52, 4286644096 }
 0x102   : > { %v1167_v59 = vmax.f32 %v1165_v25, %v1166_v2  ;;  %v1179_v23 = vrot.slane %v1178_v31, 2  ;;  %v1191_v46 = vmax.f32 %v1189_v8, %v1190_v20  ;;  %v1226_v17 = vunpack.i.l.bf16 %v1224_v39 }
 0x103   : > { %v1203_v21 = vrot.slane %v1202_v63, 4  ;;  %v1215_v3 = vmax.f32 %v1213_v4, %v1214_v57  ;;  %v1227_v33 = vunpack.i.h.bf16 %v1224_v39  ;;  %v1237_v8 = vsel %vm1052_vm1, %v378_v55, 4286644096 }
 0x104   : > { %v1168_v61 = vrot.slane %v1167_v59, 1  ;;  %v1180_v27 = vmax.f32 %v1178_v31, %v1179_v23  ;;  %v1192_v51 = vrot.slane %v1191_v46, 2  ;;  %v1263_v19 = vsel %vm1052_vm1, %v7278_v60, 4286644096 }
 0x105   : > { %v1204_v30 = vmax.f32 %v1202_v63, %v1203_v21  ;;  %v1216_v25 = vrot.slane %v1215_v3, 4  ;;  %v1228_v4 = vmax.f32 %v1226_v17, %v1227_v33  ;;  %v1239_v57 = vunpack.i.l.bf16 %v1237_v8 }
 0x106   : > { %v7401_v37 = vmax.f32 %v1167_v59, %v1168_v61  ;;  %v1181_v2 = vrot.slane %v1180_v27, 1  ;;  %v1193_v62 = vmax.f32 %v1191_v46, %v1192_v51  ;;  %v1240_v59 = vunpack.i.h.bf16 %v1237_v8 }
 0x107   : > { %v1205_v20 = vrot.slane %v1204_v30, 2  ;;  %v1217_v63 = vmax.f32 %v1215_v3, %v1216_v25  ;;  %v1229_v36 = vrot.slane %v1228_v4, 4  ;;  %v1265_v1 = vunpack.i.l.bf16 %v1263_v19 }
 0x108   : > { %v7411_v23 = vmax.f32 %v1180_v27, %v1181_v2  ;;  %v1194_v21 = vrot.slane %v1193_v62, 1  ;;  %v1241_v55 = vmax.f32 %v1239_v57, %v1240_v59  ;;  %v1266_v44 = vunpack.i.h.bf16 %v1263_v19 }
 0x109   : > { %v1206_v39 = vmax.f32 %v1204_v30, %v1205_v20  ;;  %v1218_v61 = vrot.slane %v1217_v63, 2  ;;  %v1230_v17 = vmax.f32 %v1228_v4, %v1229_v36  ;;  %v1276_v27 = vsel %vm1052_vm1, %v7288_v58, 4286644096 }
 0x10a   : > { %v7415_v51 = vmax.f32 %v1193_v62, %v1194_v21  ;;  %v1242_v3 = vrot.slane %v1241_v55, 4  ;;  %v1267_v25 = vmax.f32 %v1265_v1, %v1266_v44  ;;  %v1278_v19 = vunpack.i.l.bf16 %v1276_v27 }
 0x10b   : > { %v1207_v33 = vrot.slane %v1206_v39, 1  ;;  %v1219_v12 = vmax.f32 %v1217_v63, %v1218_v61  ;;  %v1231_v2 = vrot.slane %v1230_v17, 2  ;;  %v1279_v62 = vunpack.i.h.bf16 %v1276_v27 }
 0x10c   : > { %v1243_v57 = vmax.f32 %v1241_v55, %v1242_v3  ;;  %v1268_v59 = vrot.slane %v1267_v25, 4  ;;  %v1289_v44 = vsel %vm1052_vm1, %v402_v48, 4286644096  ;;  %v1302_v1 = vsel %vm1052_vm1, %v403_v16, 4286644096 }
 0x10d   : > { %v7421_v8 = vmax.f32 %v1206_v39, %v1207_v33  ;;  %v1220_v20 = vrot.slane %v1219_v12, 1  ;;  %v1232_v63 = vmax.f32 %v1230_v17, %v1231_v2  ;;  %v1280_v61 = vmax.f32 %v1278_v19, %v1279_v62 }
 0x10e   : > { %v1244_v39 = vrot.slane %v1243_v57, 2  ;;  %v1269_v36 = vmax.f32 %v1267_v25, %v1268_v59  ;;  %v1291_v33 = vunpack.i.l.bf16 %v1289_v44  ;;  %v1292_v3 = vunpack.i.h.bf16 %v1289_v44 }
 0x10f   : > { %v7433_v21 = vmax.f32 %v1219_v12, %v1220_v20  ;;  %v1233_v55 = vrot.slane %v1232_v63, 1  ;;  %v1304_v27 = vunpack.i.l.bf16 %v1302_v1  ;;  %v1281_v48 = vrot.slane %v1280_v61, 4 }
 0x110   : > { %v1245_v60 = vmax.f32 %v1243_v57, %v1244_v39  ;;  %v1270_v2 = vrot.slane %v1269_v36, 2  ;;  %v1293_v58 = vmax.f32 %v1291_v33, %v1292_v3  ;;  %v1305_v30 = vunpack.i.h.bf16 %v1302_v1 }
 0x111   : > { %v7437_v4 = vmax.f32 %v1232_v63, %v1233_v55  ;;  %v1315_v16 = vsel %vm1052_vm1, %v7293_v54, 4286644096  ;;  %v1282_v19 = vmax.f32 %v1280_v61, %v1281_v48  ;;  %v1328_v1 = vsel %vm1052_vm1, %v7305_v40, 4286644096 }
 0x112   : > { %v1246_v12 = vrot.slane %v1245_v60, 1  ;;  %v1271_v25 = vmax.f32 %v1269_v36, %v1270_v2  ;;  %v1317_v20 = vunpack.i.l.bf16 %v1315_v16  ;;  %v1294_v62 = vrot.slane %v1293_v58, 4 }
 0x113   : > { %v1306_v44 = vmax.f32 %v1304_v27, %v1305_v30  ;;  %v1318_v17 = vunpack.i.h.bf16 %v1315_v16  ;;  %v1283_v63 = vrot.slane %v1282_v19, 2  ;;  %v1330_v46 = vunpack.i.l.bf16 %v1328_v1 }
 0x114   : > { %v7443_v57 = vmax.f32 %v1245_v60, %v1246_v12  ;;  %v1272_v39 = vrot.slane %v1271_v25, 1  ;;  %v1295_v55 = vmax.f32 %v1293_v58, %v1294_v62  ;;  %v1331_v48 = vunpack.i.h.bf16 %v1328_v1 }
 0x115   : > { %v1307_v33 = vrot.slane %v1306_v44, 4  ;;  %v1319_v3 = vmax.f32 %v1317_v20, %v1318_v17  ;;  %v1284_v2 = vmax.f32 %v1282_v19, %v1283_v63  ;;  %v1341_v16 = vsel %vm1052_vm1, %v426_v34, 4286644096 }
 0x116   : > { %v7449_v61 = vmax.f32 %v1271_v25, %v1272_v39  ;;  %v1296_v30 = vrot.slane %v1295_v55, 2  ;;  %v1332_v12 = vmax.f32 %v1330_v46, %v1331_v48  ;;  %v1343_v20 = vunpack.i.l.bf16 %v1341_v16 }
 0x117   : > { %v1308_v27 = vmax.f32 %v1306_v44, %v1307_v33  ;;  %v1320_v60 = vrot.slane %v1319_v3, 4  ;;  %v1285_v17 = vrot.slane %v1284_v2, 1  ;;  %v1344_v39 = vunpack.i.h.bf16 %v1341_v16 }
 0x118   : > { %v1297_v62 = vmax.f32 %v1295_v55, %v1296_v30  ;;  %v1333_v63 = vrot.slane %v1332_v12, 4  ;;  %v1367_v44 = vsel %vm1052_vm1, %v7300_v45, 4286644096  ;;  %v1380_v54 = vsel %vm1052_vm1, %v7315_v24, 4286644096 }
 0x119   : > { %v1309_v36 = vrot.slane %v1308_v27, 2  ;;  %v1321_v25 = vmax.f32 %v1319_v3, %v1320_v60  ;;  %v7457_v19 = vmax.f32 %v1284_v2, %v1285_v17  ;;  %v1345_v58 = vmax.f32 %v1343_v20, %v1344_v39 }
 0x11a   : > { %v1298_v34 = vrot.slane %v1297_v62, 1  ;;  %v1334_v55 = vmax.f32 %v1332_v12, %v1333_v63  ;;  %v1369_v48 = vunpack.i.l.bf16 %v1367_v44  ;;  %v1370_v3 = vunpack.i.h.bf16 %v1367_v44 }
 0x11b   : > { %v1310_v1 = vmax.f32 %v1308_v27, %v1309_v36  ;;  %v1322_v33 = vrot.slane %v1321_v25, 2  ;;  %v1346_v16 = vrot.slane %v1345_v58, 4  ;;  %v1382_v31 = vunpack.i.l.bf16 %v1380_v54 }
 0x11c   : > { %v7465_v30 = vmax.f32 %v1297_v62, %v1298_v34  ;;  %v1335_v17 = vrot.slane %v1334_v55, 2  ;;  %v1371_v59 = vmax.f32 %v1369_v48, %v1370_v3  ;;  %v1383_v43 = vunpack.i.h.bf16 %v1380_v54 }
 0x11d   : > { %v1311_v2 = vrot.slane %v1310_v1, 1  ;;  %v1323_v60 = vmax.f32 %v1321_v25, %v1322_v33  ;;  %v1347_v39 = vmax.f32 %v1345_v58, %v1346_v16  ;;  %v1393_v62 = vsel %vm1052_vm1, %v450_v9, 4286644096 }
 0x11e   : > { %v1300_v36 = vpack.i.bf16 %v7465_v30, %v7465_v30  ;;  %v1336_v46 = vmax.f32 %v1334_v55, %v1335_v17  ;;  %v1372_v12 = vrot.slane %v1371_v59, 4  ;;  %v1384_v63 = vmax.f32 %v1382_v31, %v1383_v43 }
 0x11f   : > { %v7469_v27 = vmax.f32 %v1310_v1, %v1311_v2  ;;  %v1324_v20 = vrot.slane %v1323_v60, 1  ;;  %v1348_v54 = vrot.slane %v1347_v39, 2  ;;  %v1395_v34 = vunpack.i.l.bf16 %v1393_v62 }
 0x120   : > { %v1337_v33 = vrot.slane %v1336_v46, 1  ;;  %v1373_v1 = vmax.f32 %v1371_v59, %v1372_v12  ;;  %v1385_v48 = vrot.slane %v1384_v63, 4  ;;  %v1396_v3 = vunpack.i.h.bf16 %v1393_v62 }
 0x121   : > { %v7477_v44 = vmax.f32 %v1323_v60, %v1324_v20  ;;  %v1349_v43 = vmax.f32 %v1347_v39, %v1348_v54  ;;  %v1406_v45 = vsel %vm1052_vm1, %v451_v53, 4286644096  ;;  %v1419_v9 = vsel %vm1052_vm1, %v7308_v15, 4286644096 }
 0x122   : > { %v7487_v31 = vmax.f32 %v1336_v46, %v1337_v33  ;;  %v1374_v55 = vrot.slane %v1373_v1, 2  ;;  %v1386_v2 = vmax.f32 %v1384_v63, %v1385_v48  ;;  %v1397_v60 = vmax.f32 %v1395_v34, %v1396_v3 }
 0x123   : > { %v1350_v59 = vrot.slane %v1349_v43, 1  ;;  %v1408_v16 = vunpack.i.l.bf16 %v1406_v45  ;;  %v1409_v17 = vunpack.i.h.bf16 %v1406_v45  ;;  %v1421_v20 = vunpack.i.l.bf16 %v1419_v9 }
 0x124   : > { %v1375_v12 = vmax.f32 %v1373_v1, %v1374_v55  ;;  %v1387_v62 = vrot.slane %v1386_v2, 2  ;;  %v1398_v24 = vrot.slane %v1397_v60, 4  ;;  %v1422_v58 = vunpack.i.h.bf16 %v1419_v9 }
 0x125   : > { %v7491_v54 = vmax.f32 %v1349_v43, %v1350_v59  ;;  %v1410_v53 = vmax.f32 %v1408_v16, %v1409_v17  ;;  %v1432_v46 = vsel %vm1052_vm1, %v7320_v26, 4286644096  ;;  %v1445_v9 = vsel %vm1052_vm1, %v474_v38, 4286644096 }
 0x126   : > { %v1376_v33 = vrot.slane %v1375_v12, 1  ;;  %v1388_v63 = vmax.f32 %v1386_v2, %v1387_v62  ;;  %v1399_v34 = vmax.f32 %v1397_v60, %v1398_v24  ;;  %v1434_v48 = vunpack.i.l.bf16 %v1432_v46 }
 0x127   : > { %v1411_v45 = vrot.slane %v1410_v53, 4  ;;  %v1423_v25 = vmax.f32 %v1421_v20, %v1422_v58  ;;  %v1435_v39 = vunpack.i.h.bf16 %v1432_v46  ;;  %v1447_v60 = vunpack.i.l.bf16 %v1445_v9 }
 0x128   : > { %v7497_v1 = vmax.f32 %v1375_v12, %v1376_v33  ;;  %v1389_v55 = vrot.slane %v1388_v63, 1  ;;  %v1400_v43 = vrot.slane %v1399_v34, 2  ;;  %v1448_v58 = vunpack.i.h.bf16 %v1445_v9 }
 0x129   : > { %v1412_v59 = vmax.f32 %v1410_v53, %v1411_v45  ;;  %v1424_v16 = vrot.slane %v1423_v25, 4  ;;  %v1436_v2 = vmax.f32 %v1434_v48, %v1435_v39  ;;  %v9691_v33 = vpack.i.bf16 %v7355_v29, %v7355_v29 }
 0x12a   : > { %v1378_v17 = vpack.i.bf16 %v7497_v1, %v7497_v1  ;;  %v1390_v62 = vmax.f32 %v1388_v63, %v1389_v55  ;;  %v1401_v24 = vmax.f32 %v1399_v34, %v1400_v43  ;;  %v1449_v53 = vmax.f32 %v1447_v60, %v1448_v58 }
 0x12b   : > { %v1413_v20 = vrot.slane %v1412_v59, 2  ;;  %v1425_v12 = vmax.f32 %v1423_v25, %v1424_v16  ;;  %v1437_v46 = vrot.slane %v1436_v2, 4  ;;  %v2720_v15 = vsel %vm2718_vm3, %v9691_v33, 4286644096 }
 0x12c   : > { %v1391_v3 = vpack.i.bf16 %v1390_v62, %v1390_v62  ;;  %v1402_v38 = vrot.slane %v1401_v24, 1  ;;  %v9692_v39 = vpack.i.bf16 %v7401_v37, %v7401_v37  ;;  %v1450_v55 = vrot.slane %v1449_v53, 4 }
 0x12d   : > { %v1414_v45 = vmax.f32 %v1412_v59, %v1413_v20  ;;  %v1426_v63 = vrot.slane %v1425_v12, 2  ;;  %v1438_v34 = vmax.f32 %v1436_v2, %v1437_v46  ;;  %v9693_v29 = vpack.i.bf16 %v7357_v0, %v7357_v0  ;;  %v3182_v2 = vld [vmem:[#allocation2 + $0x10] sm:$0x1] }
 0x12e   : > { %v2723_v48 = vsel %vm2718_vm3, %v9692_v39, 4286644096  ;;  %v1403_v25 = vmax.f32 %v1401_v24, %v1402_v38  ;;  %v9694_v9 = vpack.i.bf16 %v7411_v23, %v7411_v23  ;;  %v1451_v20 = vmax.f32 %v1449_v53, %v1450_v55 }
 0x12f   : > { %v7513_v1 = vmax.bf16 %v2723_v48, %v2720_v15  ;;  %v2727_v43 = vsel %vm2718_vm3, %v9693_v29, 4286644096  ;;  %v1415_v37 = vrot.slane %v1414_v45, 1  ;;  %v1427_v60 = vmax.f32 %v1425_v12, %v1426_v63 }
 0x130   : > { %v2730_v16 = vsel %vm2718_vm3, %v9694_v9, 4286644096  ;;  %v1439_v62 = vrot.slane %v1438_v34, 2  ;;  %v1404_v58 = vpack.i.bf16 %v1403_v25, %v1403_v25  ;;  %v9695_v24 = vpack.i.bf16 %v7359_v10, %v7359_v10 }
 0x131   : > { %v7523_v59 = vmax.bf16 %v2730_v16, %v2727_v43  ;;  %v9696_v46 = vpack.i.bf16 %v7415_v51, %v7415_v51  ;;  %v1416_v33 = vmax.f32 %v1414_v45, %v1415_v37  ;;  %v1428_v15 = vrot.slane %v1427_v60, 1 }
 0x132   : > { %v2734_v0 = vsel %vm2718_vm3, %v9695_v24, 4286644096  ;;  %v1440_v38 = vmax.f32 %v1438_v34, %v1439_v62  ;;  %v1452_v39 = vrot.slane %v1451_v20, 2  ;;  %v9697_v48 = vpack.i.bf16 %v7377_v47, %v7377_v47 }
 0x133   : > { %v2737_v23 = vsel %vm2718_vm3, %v9696_v46, 4286644096  ;;  %v9698_v10 = vpack.i.bf16 %v7421_v8, %v7421_v8  ;;  %v3183_v51 = vsel %vm6883_vm2, 0, %v3182_v2  ;;  %v1417_v25 = vpack.i.bf16 %v1416_v33, %v1416_v33 }
 0x134   : > { %v7533_v12 = vmax.bf16 %v2737_v23, %v2734_v0  ;;  %v2741_v53 = vsel %vm2718_vm3, %v9697_v48, 4286644096  ;;  %v1429_v45 = vmax.f32 %v1427_v60, %v1428_v15  ;;  %v1441_v55 = vrot.slane %v1440_v38, 1  ;;  %3184 = vst [vmem:[#allocation2 + $0x10] sm:$0x1] %v3183_v51 }
 0x135   : > { %v2744_v63 = vsel %vm2718_vm3, %v9698_v10, 4286644096  ;;  %v1453_v29 = vmax.f32 %v1451_v20, %v1452_v39  ;;  %v9699_v43 = vpack.i.bf16 %v7379_v11, %v7379_v11  ;;  %v9700_v9 = vpack.i.bf16 %v7433_v21, %v7433_v21 }
 0x136   : > { %v2746_v34 = vmax.bf16 %v2744_v63, %v2741_v53  ;;  %v9701_v16 = vpack.i.bf16 %v7389_v18, %v7389_v18  ;;  %v1430_v60 = vpack.i.bf16 %v1429_v45, %v1429_v45  ;;  %v1442_v62 = vmax.f32 %v1440_v38, %v1441_v55 }
 0x137   : > { %v2748_v47 = vsel %vm2718_vm3, %v9699_v43, 4286644096  ;;  %v2751_v8 = vsel %vm2718_vm3, %v9700_v9, 4286644096  ;;  %v9702_v20 = vpack.i.bf16 %v7437_v4, %v7437_v4  ;;  %v1454_v24 = vrot.slane %v1453_v29, 1 }
 0x138   : > { %v2755_v37 = vsel %vm2718_vm3, %v9701_v16, 4286644096  ;;  %v2753_v2 = vmax.bf16 %v2751_v8, %v2748_v47  ;;  %v9703_v21 = vpack.i.bf16 %v7395_v35, %v7395_v35  ;;  %v9704_v18 = vpack.i.bf16 %v7443_v57, %v7443_v57 }
 0x139   : > { %v2758_v11 = vsel %vm2718_vm3, %v9702_v20, 4286644096  ;;  %v1443_v33 = vpack.i.bf16 %v1442_v62, %v1442_v62  ;;  %v9705_v38 = vpack.i.bf16 %v7449_v61, %v7449_v61  ;;  %v2779_v39 = vsel %vm2718_vm3, %v1378_v17, 4286644096 }
 0x13a   : > { %v2760_v0 = vmax.bf16 %v2758_v11, %v2755_v37  ;;  %v2762_v46 = vsel %vm2718_vm3, %v9703_v21, 4286644096  ;;  %v2765_v23 = vsel %vm2718_vm3, %v9704_v18, 4286644096  ;;  %v1455_v48 = vmax.f32 %v1453_v29, %v1454_v24 }
 0x13b   : > { %v2767_v15 = vmax.bf16 %v2765_v23, %v2762_v46  ;;  %v2776_v4 = vsel %vm2718_vm3, %v9705_v38, 4286644096  ;;  %v9706_v35 = vpack.i.bf16 %v7457_v19, %v7457_v19  ;;  %v2786_v57 = vsel %vm2718_vm3, %v1391_v3, 4286644096 }
 0x13c   : > { %v2781_v53 = vmax.bf16 %v2779_v39, %v2776_v4  ;;  %v2790_v51 = vsel %vm2718_vm3, %v1300_v36, 4286644096  ;;  %v2793_v61 = vsel %vm2718_vm3, %v1404_v58, 4286644096  ;;  %v9707_v17 = vpack.i.bf16 %v7469_v27, %v7469_v27 }
 0x13d   : > { %v2783_v10 = vsel %vm2718_vm3, %v9706_v35, 4286644096  ;;  %v1456_v55 = vpack.i.bf16 %v1455_v48, %v1455_v48  ;;  %v2795_v29 = vmax.bf16 %v2793_v61, %v2790_v51  ;;  %v2800_v19 = vsel %vm2718_vm3, %v1417_v25, 4286644096 }
 0x13e   : > { %v2788_v63 = vmax.bf16 %v2786_v57, %v2783_v10  ;;  %v2797_v45 = vsel %vm2718_vm3, %v9707_v17, 4286644096  ;;  %v9708_v3 = vpack.i.bf16 %v7477_v44, %v7477_v44  ;;  %v2807_v30 = vsel %vm2718_vm3, %v1430_v60, 4286644096 }
 0x13f   : > { %v2802_v47 = vmax.bf16 %v2800_v19, %v2797_v45  ;;  %v9709_v36 = vpack.i.bf16 %v7487_v31, %v7487_v31  ;;  %v2814_v27 = vsel %vm2718_vm3, %v1443_v33, 4286644096  ;;  %v9710_v25 = vpack.i.bf16 %v7491_v54, %v7491_v54  ;;  %v6061_v19 = vld.sshfl [vmem:[%s6869_s5 + $0x48] sm:$0x33 pattern:$0x75316420] }
 0x140   : > { %v2804_v43 = vsel %vm2718_vm3, %v9708_v3, 4286644096  ;;  %v2821_v44 = vsel %vm2718_vm3, %v1456_v55, 4286644096  ;;  %v6075_v60 = vcombine.low %v7513_v1, %v7513_v1  ;;  %v6076_v31 = vcombine.low %v7523_v59, %v7523_v59 }
 0x141   : > { %v2811_v58 = vsel %vm2718_vm3, %v9709_v36, 4286644096  ;;  %v2809_v9 = vmax.bf16 %v2807_v30, %v2804_v43  ;;  %v2818_v16 = vsel %vm2718_vm3, %v9710_v25, 4286644096  ;;  %v6077_v62 = vcombine.low %v7533_v12, %v7533_v12 }
 0x142   : > { %v2816_v8 = vmax.bf16 %v2814_v27, %v2811_v58  ;;  %v2823_v37 = vmax.bf16 %v2821_v44, %v2818_v16  ;;  %v6078_v20 = vcombine.low %v2746_v34, %v2746_v34  ;;  %v6079_v11 = vcombine.low %v2753_v2, %v2753_v2  ;;  %v6062_v27 = vld.sshfl [vmem:[%s6869_s5 + $0x4c] sm:$0x33 pattern:$0x75316420] }
 0x143   : > { %v6080_v24 = vcombine.low %v2760_v0, %v2760_v0  ;;  %v6081_v21 = vcombine.low %v2767_v15, %v2767_v15  ;;  %v6083_v46 = vcombine.low %v2781_v53, %v2781_v53  ;;  %v6084_v54 = vcombine.low %v2788_v63, %v2788_v63 }
 0x144   : > { %v6085_v18 = vcombine.low %v2795_v29, %v2795_v29  ;;  %v6086_v23 = vcombine.low %v2802_v47, %v2802_v47  ;;  %v9711_v33 = vor.u32 %v7334_v49, %v7332_v28  ;;  %v6087_v1 = vcombine.low %v2809_v9, %v2809_v9  ;;  %v6060_v49 = vld.sshfl [vmem:[%s6869_s5 + $0x44] sm:$0x33 pattern:$0x75316420] }
 0x145   : > { %v6088_v4 = vcombine.low %v2816_v8, %v2816_v8  ;;  %v3430_v59 = vunpack.c.l.b16 %v6075_v60  ;;  %v6089_v39 = vcombine.low %v2823_v37, %v2823_v37  ;;  %v3431_v48 = vunpack.c.l.b16 %v6076_v31 }
 0x146   : > { %v7613_v38 = vrot.slane %v9711_v33, 4  ;;  %v3432_v12 = vunpack.c.l.b16 %v6077_v62  ;;  %v3433_v34 = vunpack.c.l.b16 %v6078_v20  ;;  %v3434_v2 = vunpack.c.l.b16 %v6079_v11  ;;  %v3583_v62 = vld [vmem:[#allocation2 + $0x8] sm:$0xf]  ;;  %v3589_v20 = vld [vmem:[#allocation2 + $0x10] sm:$0xf] }
 0x147   : > { %v3435_v0 = vunpack.c.l.b16 %v6080_v24  ;;  %v3438_v15 = vunpack.c.l.b16 %v6083_v46  ;;  %v3439_v53 = vunpack.c.l.b16 %v6084_v54  ;;  %v3436_v35 = vunpack.c.l.b16 %v6081_v21 }
 0x148   : > { %9712 = vst [vmem:[#allocation14_spill] sm:$0xff] %v7613_v38  ;;  %v3440_v10 = vunpack.c.l.b16 %v6085_v18  ;;  %v3441_v57 = vunpack.c.l.b16 %v6086_v23  ;;  %v3442_v28 = vunpack.c.l.b16 %v6087_v1  ;;  %v3443_v63 = vunpack.c.l.b16 %v6088_v4 }
 0x149   : > { %v3495_v51 = vsel %vm3494_vm4, %v3431_v48, %v3430_v59  ;;  %v3506_v61 = vsel %vm3494_vm4, %v3439_v53, %v3438_v15  ;;  %v682_v17 = vrot.slane %v7330_v7, %v6879_v5  ;;  %v3444_v45 = vunpack.c.l.b16 %v6089_v39 }
 0x14a   : > { %v3497_v55 = vsel %vm3496_vm5, %v3432_v12, %v3495_v51  ;;  %v3507_v29 = vsel %vm3496_vm5, %v3440_v10, %v3506_v61  ;;  %v9713_v3 = vcombine.high %v7330_v7, %v7330_v7  ;;  %v9714_v47 = vor.u32 %v7338_v56, %v7336_v13 }
 0x14b   : > { %v3499_v36 = vsel %vm3498_vm6, %v3433_v34, %v3497_v55  ;;  %v3508_v58 = vsel %vm3498_vm6, %v3441_v57, %v3507_v29  ;;  %v699_v9 = vcombine.high %v6060_v49, %v6060_v49  ;;  %v690_v16 = vcombine.high %v682_v17, %v682_v17 }
 0x14c   : > { %v689_v43 = vrot.slane %v9713_v3, %v6879_v5  ;;  %v7630_v30 = vrot.slane %v9714_v47, 4  ;;  %v3501_v8 = vsel %vm3500_vm7, %v3434_v2, %v3499_v36  ;;  %v3509_v25 = vsel %vm3500_vm7, %v3442_v28, %v3508_v58 }
 0x14d   : > { %v706_v44 = vrot.slane %v6060_v49, %v6879_v5  ;;  %v3503_v7 = vsel %vm3502_vm8, %v3435_v0, %v3501_v8  ;;  %v3510_v37 = vsel %vm3502_vm8, %v3443_v63, %v3509_v25  ;;  %v723_v56 = vcombine.high %v6061_v19, %v6061_v19 }
 0x14e   : > { %9715 = vst [vmem:[#allocation15_spill] sm:$0xff] %v7630_v30  ;;  %v691_v13 = vcombine.high %v689_v43, %v689_v43  ;;  %v3505_v60 = vsel %vm3504_vm11, %v3436_v35, %v3503_v7  ;;  %v3511_v31 = vsel %vm3504_vm11, %v3444_v45, %v3510_v37  ;;  %v7643_v11 = vrot.slane %v6061_v19, %v6879_v5 }
 0x14f   : > { %v747_v24 = vcombine.high %v6062_v27, %v6062_v27  ;;  %v3548_v21 = vpack.c.b16 %v3505_v60, %v3505_v60  ;;  %v3550_v46 = vpack.c.b16 %v3511_v31, %v3511_v31  ;;  %v7646_v54 = vrot.slane %v699_v9, %v6879_v5  ;;  %v7676_v31 = vld.sshfl [vmem:[%s6869_s5 + $0x60] sm:$0x33 pattern:$0x75316420] }
 0x150   : > { %v7649_v18 = vrot.slane %v723_v56, %v6879_v5  ;;  %v714_v23 = vcombine.high %v706_v44, %v706_v44  ;;  %v7652_v33 = vrot.slane %v6062_v27, %v6879_v5  ;;  %v1887_v1 = vsel %vm1052_vm1, %v682_v17, 4286644096 }
 0x151   : > { %v1900_v4 = vsel %vm1052_vm1, %v689_v43, 4286644096  ;;  %v3584_v59 = vsel %vm7253_vm12, %v3548_v21, %v3583_v62  ;;  %v3590_v39 = vsel %vm7253_vm12, %v3550_v46, %v3589_v20  ;;  %v738_v48 = vcombine.high %v7643_v11, %v7643_v11 }
 0x152   : > { %v7663_v12 = vrot.slane %v747_v24, %v6879_v5  ;;  %3585 = vst [vmem:[#allocation2 + $0x8] sm:$0xf] %v3584_v59  ;;  %3591 = vst [vmem:[#allocation2 + $0x10] sm:$0xf] %v3590_v39  ;;  %v1889_v34 = vunpack.i.l.bf16 %v1887_v1  ;;  %v1890_v2 = vunpack.i.h.bf16 %v1887_v1  ;;  %v1902_v0 = vunpack.i.l.bf16 %v1900_v4 }
 0x153   : > { %v1903_v15 = vunpack.i.h.bf16 %v1900_v4  ;;  %v739_v53 = vcombine.high %v7649_v18, %v7649_v18  ;;  %v1913_v35 = vsel %vm1052_vm1, %v690_v16, 4286644096  ;;  %v1926_v10 = vsel %vm1052_vm1, %v691_v13, 4286644096 }
 0x154   : > { %v1939_v57 = vsel %vm1052_vm1, %v706_v44, 4286644096  ;;  %v1891_v28 = vmax.f32 %v1889_v34, %v1890_v2  ;;  %v1915_v63 = vunpack.i.l.bf16 %v1913_v35  ;;  %v1916_v51 = vunpack.i.h.bf16 %v1913_v35 }
 0x155   : > { %v1904_v49 = vmax.f32 %v1902_v0, %v1903_v15  ;;  %v1928_v61 = vunpack.i.l.bf16 %v1926_v10  ;;  %v1929_v17 = vunpack.i.h.bf16 %v1926_v10  ;;  %v1941_v45 = vunpack.i.l.bf16 %v1939_v57 }
 0x156   : > { %v1942_v55 = vunpack.i.h.bf16 %v1939_v57  ;;  %v1892_v29 = vrot.slane %v1891_v28, 4  ;;  %v1917_v3 = vmax.f32 %v1915_v63, %v1916_v51  ;;  %v1952_v43 = vsel %vm1052_vm1, %v7646_v54, 4286644096 }
 0x157   : > { %v1905_v19 = vrot.slane %v1904_v49, 4  ;;  %v1930_v47 = vmax.f32 %v1928_v61, %v1929_v17  ;;  %v1954_v58 = vunpack.i.l.bf16 %v1952_v43  ;;  %v1955_v27 = vunpack.i.h.bf16 %v1952_v43 }
 0x158   : > { %v1943_v36 = vmax.f32 %v1941_v45, %v1942_v55  ;;  %v1893_v9 = vmax.f32 %v1891_v28, %v1892_v29  ;;  %v1918_v25 = vrot.slane %v1917_v3, 4  ;;  %v1965_v16 = vsel %vm1052_vm1, %v714_v23, 4286644096 }
 0x159   : > { %v1906_v8 = vmax.f32 %v1904_v49, %v1905_v19  ;;  %v3821_v44 = vld [vmem:[#allocation2 + $0x8] sm:$0xf]  ;;  %v3822_v7 = vld [vmem:[#allocation2 + $0x10] sm:$0xf]  ;;  %v762_v37 = vcombine.high %v7652_v33, %v7652_v33  ;;  %v1931_v13 = vrot.slane %v1930_v47, 4  ;;  %v1956_v60 = vmax.f32 %v1954_v58, %v1955_v27 }
 0x15a   : > { %v1944_v56 = vrot.slane %v1943_v36, 4  ;;  %v3852_v62 = vshrl.u32 %v3822_v7, 16  ;;  %v3855_v20 = vshll.u32 %v3822_v7, 16  ;;  %v6183_v24 = vcombine.low %v3821_v44, %v3822_v7 }
 0x15b   : > { %v3838_v21 = vshrl.u32 %v3821_v44, 16  ;;  %v3841_v46 = vshll.u32 %v3821_v44, 16  ;;  %v1894_v1 = vrot.slane %v1893_v9, 2  ;;  %v1907_v4 = vrot.slane %v1906_v8, 2 }
 0x15c   : > { %v1919_v59 = vmax.f32 %v1917_v3, %v1918_v25  ;;  %v3854_v39 = vrot.slane %v3852_v62, 4  ;;  %v3857_v23 = vrot.slane %v3855_v20, 5  ;;  %4270 = vrot.lane.b32.xlu0 %v6183_v24, %s6649_s18  ;;  %v1932_v2 = vmax.f32 %v1930_v47, %v1931_v13 }
 0x15d   : > { %v7679_v34 = vrot.slane %v3838_v21, 4  ;;  %v7681_v0 = vrot.slane %v3841_v46, 5  ;;  %v1895_v15 = vmax.f32 %v1893_v9, %v1894_v1  ;;  %v1908_v35 = vmax.f32 %v1906_v8, %v1907_v4 }
 0x15e   : > { %v1920_v10 = vrot.slane %v1919_v59, 2  ;;  %v1933_v57 = vrot.slane %v1932_v2, 2  ;;  %v1945_v28 = vmax.f32 %v1943_v36, %v1944_v56  ;;  %v1957_v49 = vrot.slane %v1956_v60, 4 }
 0x15f   : > { %v867_v63 = vcombine.high %v7676_v31, %v7676_v31  ;;  %v3858_v51 = vor.u32 %v3857_v23, %v3854_v39  ;;  %v1896_v61 = vrot.slane %v1895_v15, 1  ;;  %v1909_v17 = vrot.slane %v1908_v35, 1 }
 0x160   : > { %v1921_v45 = vmax.f32 %v1919_v59, %v1920_v10  ;;  %v1934_v55 = vmax.f32 %v1932_v2, %v1933_v57  ;;  %v1946_v29 = vrot.slane %v1945_v28, 2  ;;  %v1958_v19 = vmax.f32 %v1956_v60, %v1957_v49 }
 0x161   : > { %v1967_v3 = vunpack.i.l.bf16 %v1965_v16  ;;  %v3844_v43 = vor.u32 %v7681_v0, %v7679_v34  ;;  %v7687_v47 = vmax.f32 %v1895_v15, %v1896_v61  ;;  %v7689_v58 = vmax.f32 %v1908_v35, %v1909_v17 }
 0x162   : > { %v1922_v36 = vrot.slane %v1921_v45, 1  ;;  %v1935_v27 = vrot.slane %v1934_v55, 1  ;;  %v1947_v9 = vmax.f32 %v1945_v28, %v1946_v29  ;;  %v1959_v8 = vrot.slane %v1958_v19, 2 }
 0x163   : > { %v1968_v25 = vunpack.i.h.bf16 %v1965_v16  ;;  %v7691_v44 = vrot.slane %v3858_v51, 4  ;;  %v1898_v7 = vpack.i.bf16 %v7687_v47, %v7687_v47  ;;  %v1991_v56 = vsel %vm1052_vm1, %v7643_v11, 4286644096 }
 0x164   : > { %v7695_v13 = vmax.f32 %v1921_v45, %v1922_v36  ;;  %v7699_v60 = vmax.f32 %v1934_v55, %v1935_v27  ;;  %v1948_v62 = vrot.slane %v1947_v9, 1  ;;  %v1960_v20 = vmax.f32 %v1958_v19, %v1959_v8 }
 0x165   : > { %9716 = vst [vmem:[#allocation16_spill] sm:$0xff] %v7691_v44  ;;  %v1969_v24 = vmax.f32 %v1967_v3, %v1968_v25  ;;  %v1911_v21 = vpack.i.bf16 %v7689_v58, %v7689_v58  ;;  %v1993_v46 = vunpack.i.l.bf16 %v1991_v56  ;;  %v1994_v16 = vunpack.i.h.bf16 %v1991_v56 }
 0x166   : > { %v2004_v1 = vsel %vm1052_vm1, %v7649_v18, 4286644096  ;;  %v1924_v4 = vpack.i.bf16 %v7695_v13, %v7695_v13  ;;  %v7707_v59 = vmax.f32 %v1947_v9, %v1948_v62  ;;  %v1961_v39 = vrot.slane %v1960_v20, 1 }
 0x167   : > { %v1970_v23 = vrot.slane %v1969_v24, 4  ;;  %v1995_v2 = vmax.f32 %v1993_v46, %v1994_v16  ;;  %v2006_v15 = vunpack.i.l.bf16 %v2004_v1  ;;  %v2007_v35 = vunpack.i.h.bf16 %v2004_v1 }
 0x168   : > { %v2017_v10 = vsel %vm1052_vm1, %v738_v48, 4286644096  ;;  %v1937_v57 = vpack.i.bf16 %v7699_v60, %v7699_v60  ;;  %v1950_v28 = vpack.i.bf16 %v7707_v59, %v7707_v59  ;;  %v2030_v55 = vsel %vm1052_vm1, %v739_v53, 4286644096 }
 0x169   : > { %v1971_v49 = vmax.f32 %v1969_v24, %v1970_v23  ;;  %v2019_v51 = vunpack.i.l.bf16 %v2017_v10  ;;  %v1996_v61 = vrot.slane %v1995_v2, 4  ;;  %v2008_v17 = vmax.f32 %v2006_v15, %v2007_v35 }
 0x16a   : > { %v2020_v45 = vunpack.i.h.bf16 %v2017_v10  ;;  %v7721_v29 = vmax.f32 %v1960_v20, %v1961_v39  ;;  %v2032_v48 = vunpack.i.l.bf16 %v2030_v55  ;;  %v2033_v19 = vunpack.i.h.bf16 %v2030_v55 }
 0x16b   : > { %v1972_v11 = vrot.slane %v1971_v49, 2  ;;  %v1997_v3 = vmax.f32 %v1995_v2, %v1996_v61  ;;  %v2009_v36 = vrot.slane %v2008_v17, 4  ;;  %v2043_v9 = vsel %vm1052_vm1, %v7652_v33, 4286644096 }
 0x16c   : > { %v2021_v27 = vmax.f32 %v2019_v51, %v2020_v45  ;;  %v2034_v25 = vmax.f32 %v2032_v48, %v2033_v19  ;;  %v2045_v56 = vunpack.i.l.bf16 %v2043_v9  ;;  %v2046_v62 = vunpack.i.h.bf16 %v2043_v9 }
 0x16d   : > { %v1973_v8 = vmax.f32 %v1971_v49, %v1972_v11  ;;  %v1998_v24 = vrot.slane %v1997_v3, 2  ;;  %v2010_v46 = vmax.f32 %v2008_v17, %v2009_v36  ;;  %v2056_v53 = vsel %vm1052_vm1, %v7663_v12, 4286644096 }
 0x16e   : > { %v2022_v18 = vrot.slane %v2021_v27, 4  ;;  %v2035_v16 = vrot.slane %v2034_v25, 4  ;;  %v2047_v1 = vmax.f32 %v2045_v56, %v2046_v62  ;;  %v2058_v39 = vunpack.i.l.bf16 %v2056_v53 }
 0x16f   : > { %v1974_v20 = vrot.slane %v1973_v8, 1  ;;  %v1999_v23 = vmax.f32 %v1997_v3, %v1998_v24  ;;  %v2011_v2 = vrot.slane %v2010_v46, 2  ;;  %v2059_v35 = vunpack.i.h.bf16 %v2056_v53 }
 0x170   : > { %v2023_v15 = vmax.f32 %v2021_v27, %v2022_v18  ;;  %v1963_v10 = vpack.i.bf16 %v7721_v29, %v7721_v29  ;;  %v2036_v49 = vmax.f32 %v2034_v25, %v2035_v16  ;;  %v2048_v51 = vrot.slane %v2047_v1, 4 }
 0x171   : > { %v2069_v61 = vsel %vm1052_vm1, %v762_v37, 4286644096  ;;  %v2000_v17 = vrot.slane %v1999_v23, 1  ;;  %v2012_v45 = vmax.f32 %v2010_v46, %v2011_v2  ;;  %v2060_v11 = vmax.f32 %v2058_v39, %v2059_v35 }
 0x172   : > { %v2024_v55 = vrot.slane %v2023_v15, 2  ;;  %v7733_v48 = vmax.f32 %v1973_v8, %v1974_v20  ;;  %v2037_v19 = vrot.slane %v2036_v49, 2  ;;  %v2049_v3 = vmax.f32 %v2047_v1, %v2048_v51  ;;  %v3191_v51 = vld [vmem:[#allocation2 + $0x28] sm:$0x1] }
 0x173   : > { %v2071_v36 = vunpack.i.l.bf16 %v2069_v61  ;;  %v2001_v27 = vmax.f32 %v1999_v23, %v2000_v17  ;;  %v2013_v9 = vrot.slane %v2012_v45, 1  ;;  %v2061_v29 = vrot.slane %v2060_v11, 4 }
 0x174   : > { %v2025_v56 = vmax.f32 %v2023_v15, %v2024_v55  ;;  %v2038_v25 = vmax.f32 %v2036_v49, %v2037_v19  ;;  %v2050_v62 = vrot.slane %v2049_v3, 2  ;;  %v2072_v24 = vunpack.i.h.bf16 %v2069_v61 }
 0x175   : > { %v2944_v33 = vsel %vm2718_vm3, %v1898_v7, 4286644096  ;;  %v2002_v37 = vpack.i.bf16 %v2001_v27, %v2001_v27  ;;  %v2014_v46 = vmax.f32 %v2012_v45, %v2013_v9  ;;  %v2062_v8 = vmax.f32 %v2060_v11, %v2061_v29 }
 0x176   : > { %v2026_v18 = vrot.slane %v2025_v56, 1  ;;  %v2039_v53 = vrot.slane %v2038_v25, 1  ;;  %v2051_v20 = vmax.f32 %v2049_v3, %v2050_v62  ;;  %v2073_v16 = vmax.f32 %v2071_v36, %v2072_v24 }
 0x177   : > { %v2951_v1 = vsel %vm2718_vm3, %v1911_v21, 4286644096  ;;  %v2015_v39 = vpack.i.bf16 %v2014_v46, %v2014_v46  ;;  %v2063_v2 = vrot.slane %v2062_v8, 2  ;;  %v2947_v15 = vsel %vm2718_vm3, %v2002_v37, 4286644096 }
 0x178   : > { %v2027_v23 = vmax.f32 %v2025_v56, %v2026_v18  ;;  %v2040_v47 = vmax.f32 %v2038_v25, %v2039_v53  ;;  %v2052_v35 = vrot.slane %v2051_v20, 1  ;;  %v2074_v7 = vrot.slane %v2073_v16, 4 }
 0x179   : > { %v2949_v49 = vmax.bf16 %v2947_v15, %v2944_v33  ;;  %v2064_v17 = vmax.f32 %v2062_v8, %v2063_v2  ;;  %v2954_v45 = vsel %vm2718_vm3, %v2015_v39, 4286644096  ;;  %v2958_v58 = vsel %vm2718_vm3, %v1924_v4, 4286644096 }
 0x17a   : > { %v2028_v61 = vpack.i.bf16 %v2027_v23, %v2027_v23  ;;  %v2041_v21 = vpack.i.bf16 %v2040_v47, %v2040_v47  ;;  %v2053_v55 = vmax.f32 %v2051_v20, %v2052_v35  ;;  %v2075_v11 = vmax.f32 %v2073_v16, %v2074_v7  ;;  %v7765_v16 = vld [vmem:[#allocation2 + $0x20] sm:$0xf] }
 0x17b   : > { %v2956_v19 = vmax.bf16 %v2954_v45, %v2951_v1  ;;  %v2065_v3 = vrot.slane %v2064_v17, 1  ;;  %v2965_v27 = vsel %vm2718_vm3, %v1937_v57, 4286644096  ;;  %v3192_v9 = vsel %vm6883_vm2, 0, %v3191_v51 }
 0x17c   : > { %v2961_v36 = vsel %vm2718_vm3, %v2028_v61, 4286644096  ;;  %v2054_v56 = vpack.i.bf16 %v2053_v55, %v2053_v55  ;;  %v2076_v29 = vrot.slane %v2075_v11, 2  ;;  %v2968_v4 = vsel %vm2718_vm3, %v2041_v21, 4286644096 }
 0x17d   : > { %v2963_v13 = vmax.bf16 %v2961_v36, %v2958_v58  ;;  %3193 = vst [vmem:[#allocation2 + $0x28] sm:$0x1] %v3192_v9  ;;  %v1976_v25 = vpack.i.bf16 %v7733_v48, %v7733_v48  ;;  %v2066_v62 = vmax.f32 %v2064_v17, %v2065_v3  ;;  %v2970_v24 = vmax.bf16 %v2968_v4, %v2965_v27  ;;  %v6068_v58 = vld.sshfl [vmem:[%s6869_s5 + $0x64] sm:$0x33 pattern:$0x75316420] }
 0x17e   : > { %v2972_v60 = vsel %vm2718_vm3, %v1950_v28, 4286644096  ;;  %v2077_v57 = vmax.f32 %v2075_v11, %v2076_v29  ;;  %v2975_v33 = vsel %vm2718_vm3, %v2054_v56, 4286644096  ;;  %v2979_v37 = vsel %vm2718_vm3, %v1963_v10, 4286644096 }
 0x17f   : > { %v6107_v46 = vcombine.low %v2949_v49, %v2949_v49  ;;  %v2067_v18 = vpack.i.bf16 %v2066_v62, %v2066_v62  ;;  %v2977_v8 = vmax.bf16 %v2975_v33, %v2972_v60  ;;  %v6108_v53 = vcombine.low %v2956_v19, %v2956_v19  ;;  %v4006_v49 = vld [vmem:[#allocation2 + $0x10] sm:$0xf]  ;;  %v4007_v19 = vld [vmem:[#allocation2 + $0x18] sm:$0xf] }
 0x180   : > { %v6109_v20 = vcombine.low %v2963_v13, %v2963_v13  ;;  %v2078_v48 = vrot.slane %v2077_v57, 1  ;;  %v6110_v1 = vcombine.low %v2970_v24, %v2970_v24  ;;  %v4051_v59 = vshrl.u32 %v7765_v16, 16  ;;  %v6069_v36 = vld.sshfl [vmem:[%s6869_s5 + $0x68] sm:$0x33 pattern:$0x75316420] }
 0x181   : > { %v3462_v39 = vunpack.c.l.b16 %v6107_v46  ;;  %v2982_v28 = vsel %vm2718_vm3, %v2067_v18, 4286644096  ;;  %v6111_v23 = vcombine.low %v2977_v8, %v2977_v8  ;;  %v3463_v2 = vunpack.c.l.b16 %v6108_v53  ;;  %v6071_v53 = vld.sshfl [vmem:[%s6869_s5 + $0x70] sm:$0x33 pattern:$0x75316420] }
 0x182   : > { %v3464_v15 = vunpack.c.l.b16 %v6109_v20  ;;  %v2079_v10 = vmax.f32 %v2077_v57, %v2078_v48  ;;  %v2984_v47 = vmax.bf16 %v2982_v28, %v2979_v37  ;;  %v2986_v35 = vsel %vm2718_vm3, %v1976_v25, 4286644096 }
 0x183   : > { %v3465_v7 = vunpack.c.l.b16 %v6110_v1  ;;  %v3466_v51 = vunpack.c.l.b16 %v6111_v23  ;;  %v3524_v61 = vsel %vm3494_vm4, %v3463_v2, %v3462_v39  ;;  %v4054_v17 = vshll.u32 %v7765_v16, 16 }
 0x184   : > { %v4023_v45 = vshrl.u32 %v4006_v49, 16  ;;  %v2080_v21 = vpack.i.bf16 %v2079_v10, %v2079_v10  ;;  %v6112_v55 = vcombine.low %v2984_v47, %v2984_v47  ;;  %v3525_v11 = vsel %vm3496_vm5, %v3464_v15, %v3524_v61  ;;  %v6073_v10 = vld.sshfl [vmem:[%s6869_s5 + $0x78] sm:$0x33 pattern:$0x75316420] }
 0x185   : > { %v4026_v3 = vshll.u32 %v4006_v49, 16  ;;  %v7778_v27 = vrot.slane %v3844_v43, 4  ;;  %v3526_v9 = vsel %vm3498_vm6, %v3465_v7, %v3525_v11  ;;  %v7781_v56 = vrot.slane %v4051_v59, 4  ;;  %v3607_v61 = vld [vmem:[#allocation2 + $0x28] sm:$0xf] }
 0x186   : > { %v4037_v29 = vshrl.u32 %v4007_v19, 16  ;;  %v2989_v13 = vsel %vm2718_vm3, %v2080_v21, 4286644096  ;;  %v3467_v4 = vunpack.c.l.b16 %v6112_v55  ;;  %v7784_v25 = vrot.slane %v4054_v17, 5 }
 0x187   : > { %9717 = vst [vmem:[#allocation17_spill] sm:$0xff] %v7778_v27  ;;  %9718 = vst [vmem:[#allocation18_spill] sm:$0xff] %v7781_v56  ;;  %v7786_v62 = vrot.slane %v4023_v45, 4  ;;  %v2991_v24 = vmax.bf16 %v2989_v13, %v2986_v35  ;;  %v3527_v60 = vsel %vm3500_vm7, %v3466_v51, %v3526_v9  ;;  %v4040_v57 = vshll.u32 %v4007_v19, 16 }
 0x188   : > { %9719 = vst [vmem:[#allocation19_spill] sm:$0xff] %v7784_v25  ;;  %v6195_v34 = vcombine.low %v4006_v49, %v4007_v19  ;;  %v7789_v0 = vrot.slane %v4026_v3, 5  ;;  %v6070_v43 = vld.sshfl [vmem:[%s6869_s5 + $0x6c] sm:$0x33 pattern:$0x75316420]  ;;  %v874_v33 = vrot.slane %v7676_v31, %v6879_v5  ;;  %v881_v37 = vrot.slane %v867_v63, %v6879_v5 }
 0x189   : > { %9720 = vst [vmem:[#allocation20_spill] sm:$0xff] %v7786_v62  ;;  %v891_v46 = vcombine.high %v6068_v58, %v6068_v58  ;;  %v6113_v18 = vcombine.low %v2991_v24, %v2991_v24  ;;  %v7798_v8 = vrot.slane %v4037_v29, 4  ;;  %v7803_v20 = vrot.slane %v6068_v58, %v6879_v5  ;;  %v6072_v31 = vld.sshfl [vmem:[%s6869_s5 + $0x74] sm:$0x33 pattern:$0x75316420] }
 0x18a   : > { %9721 = vst [vmem:[#allocation21_spill] sm:$0xff] %v7789_v0  ;;  %4338 = vrot.lane.b32.xlu0 %v6195_v34, %s6650_s20  ;;  %v915_v48 = vcombine.high %v6069_v36, %v6069_v36  ;;  %v3528_v1 = vsel %vm3502_vm8, %v3467_v4, %v3527_v60  ;;  %v7806_v39 = vrot.slane %v4040_v57, 5  ;;  %v882_v63 = vcombine.high %v874_v33, %v874_v33  ;;  %v6074_v17 = vld.sshfl [vmem:[%s6869_s5 + $0x7c] sm:$0x33 pattern:$0x75316420] }
 0x18b   : > { %9722 = vst [vmem:[#allocation22_spill] sm:$0xff] %v7798_v8  ;;  %v7810_v59 = vrot.slane %v6069_v36, %v6879_v5  ;;  %v3468_v28 = vunpack.c.l.b16 %v6113_v18  ;;  %v883_v23 = vcombine.high %v881_v37, %v881_v37  ;;  %v939_v15 = vcombine.high %v6070_v43, %v6070_v43 }
 0x18c   : > { %9723 = vst [vmem:[#allocation23_spill] sm:$0xff] %v7806_v39  ;;  %v7813_v2 = vrot.slane %v915_v48, %v6879_v5  ;;  %v7817_v47 = vrot.slane %v891_v46, %v6879_v5  ;;  %v7820_v35 = vrot.slane %v6070_v43, %v6879_v5  ;;  %v963_v7 = vcombine.high %v6071_v53, %v6071_v53 }
 0x18d   : > { %v7823_v49 = vrot.slane %v6071_v53, %v6879_v5  ;;  %v3529_v51 = vsel %vm3504_vm11, %v3468_v28, %v3528_v1  ;;  %v906_v45 = vcombine.high %v7803_v20, %v7803_v20  ;;  %v987_v21 = vcombine.high %v6072_v31, %v6072_v31 }
 0x18e   : > { %v3556_v55 = vpack.c.b16 %v3529_v51, %v3529_v51  ;;  %v7834_v19 = vrot.slane %v939_v15, %v6879_v5  ;;  %v7837_v3 = vrot.slane %v963_v7, %v6879_v5  ;;  %v7842_v9 = vrot.slane %v6072_v31, %v6879_v5 }
 0x18f   : > { %v1011_v29 = vcombine.high %v6073_v10, %v6073_v10  ;;  %v7845_v13 = vrot.slane %v6073_v10, %v6879_v5  ;;  %v7852_v60 = vrot.slane %v987_v21, %v6879_v5  ;;  %v1035_v57 = vcombine.high %v6074_v17, %v6074_v17 }
 0x190   : > { %v3608_v4 = vsel %vm7253_vm12, %v3556_v55, %v3607_v61  ;;  %v7859_v46 = vrot.slane %v6074_v17, %v6879_v5  ;;  %v2303_v18 = vsel %vm1052_vm1, %v874_v33, 4286644096  ;;  %v2316_v15 = vsel %vm1052_vm1, %v881_v37, 4286644096 }
 0x191   : > { %3609 = vst [vmem:[#allocation2 + $0x28] sm:$0xf] %v3608_v4  ;;  %v7863_v53 = vrot.slane %v1011_v29, %v6879_v5  ;;  %v2305_v1 = vunpack.i.l.bf16 %v2303_v18  ;;  %v2306_v31 = vunpack.i.h.bf16 %v2303_v18  ;;  %v7868_v28 = vrot.slane %v1035_v57, %v6879_v5 }
 0x192   : > { %v2329_v10 = vsel %vm1052_vm1, %v882_v63, 4286644096  ;;  %v2342_v7 = vsel %vm1052_vm1, %v883_v23, 4286644096  ;;  %v2318_v61 = vunpack.i.l.bf16 %v2316_v15  ;;  %v2319_v33 = vunpack.i.h.bf16 %v2316_v15 }
 0x193   : > { %9724 = vst [vmem:[#allocation24_spill] sm:$0xff] %v7868_v28  ;;  %v2307_v51 = vmax.f32 %v2305_v1, %v2306_v31  ;;  %v2331_v17 = vunpack.i.l.bf16 %v2329_v10  ;;  %v2332_v21 = vunpack.i.h.bf16 %v2329_v10  ;;  %v2344_v55 = vunpack.i.l.bf16 %v2342_v7 }
 0x194   : > { %v2345_v29 = vunpack.i.h.bf16 %v2342_v7  ;;  %v2355_v4 = vsel %vm1052_vm1, %v7803_v20, 4286644096  ;;  %v2320_v48 = vmax.f32 %v2318_v61, %v2319_v33  ;;  %v2368_v23 = vsel %vm1052_vm1, %v7817_v47, 4286644096 }
 0x195   : > { %v2308_v18 = vrot.slane %v2307_v51, 4  ;;  %v2357_v57 = vunpack.i.l.bf16 %v2355_v4  ;;  %v2358_v43 = vunpack.i.h.bf16 %v2355_v4  ;;  %v2333_v63 = vmax.f32 %v2331_v17, %v2332_v21 }
 0x196   : > { %v2346_v34 = vmax.f32 %v2344_v55, %v2345_v29  ;;  %v2321_v10 = vrot.slane %v2320_v48, 4  ;;  %v2370_v33 = vunpack.i.l.bf16 %v2368_v23  ;;  %v2381_v4 = vsel %vm1052_vm1, %v906_v45, 4286644096 }
 0x197   : > { %v2309_v15 = vmax.f32 %v2307_v51, %v2308_v18  ;;  %v2359_v20 = vmax.f32 %v2357_v57, %v2358_v43  ;;  %v2334_v61 = vrot.slane %v2333_v63, 4  ;;  %v2371_v18 = vunpack.i.h.bf16 %v2368_v23 }
 0x198   : > { %v7879_v1 = vld [vmem:[#allocation2 + $0x28] sm:$0xf]  ;;  %v2322_v21 = vmax.f32 %v2320_v48, %v2321_v10  ;;  %v2347_v55 = vrot.slane %v2346_v34, 4  ;;  %v2383_v58 = vunpack.i.l.bf16 %v2381_v4  ;;  %v2384_v45 = vunpack.i.h.bf16 %v2381_v4 }
 0x199   : > { %v6196_v7 = vcombine.low %v7765_v16, %v7879_v1  ;;  %v2310_v17 = vrot.slane %v2309_v15, 2  ;;  %v2360_v29 = vrot.slane %v2359_v20, 4  ;;  %v2335_v51 = vmax.f32 %v2333_v63, %v2334_v61 }
 0x19a   : > { %v2323_v57 = vrot.slane %v2322_v21, 2  ;;  %v2348_v31 = vmax.f32 %v2346_v34, %v2347_v55  ;;  %v2372_v11 = vmax.f32 %v2370_v33, %v2371_v18  ;;  %v2385_v8 = vmax.f32 %v2383_v58, %v2384_v45 }
 0x19b   : > { %4340 = vrot.lane.b32.xlu1 %v6196_v7, %s6650_s20  ;;  %v2311_v43 = vmax.f32 %v2309_v15, %v2310_v17  ;;  %v2361_v16 = vmax.f32 %v2359_v20, %v2360_v29  ;;  %v2336_v36 = vrot.slane %v2335_v51, 2  ;;  %v2407_v7 = vsel %vm1052_vm1, %v7810_v59, 4286644096 }
 0x19c   : > { %v2324_v48 = vmax.f32 %v2322_v21, %v2323_v57  ;;  %v2349_v10 = vrot.slane %v2348_v31, 2  ;;  %v2373_v37 = vrot.slane %v2372_v11, 4  ;;  %v2386_v33 = vrot.slane %v2385_v8, 4 }
 0x19d   : > { %v2312_v44 = vrot.slane %v2311_v43, 1  ;;  %v2362_v27 = vrot.slane %v2361_v16, 2  ;;  %v2337_v39 = vmax.f32 %v2335_v51, %v2336_v36  ;;  %v2409_v17 = vunpack.i.l.bf16 %v2407_v7 }
 0x19e   : > { %v2325_v23 = vrot.slane %v2324_v48, 1  ;;  %v2350_v15 = vmax.f32 %v2348_v31, %v2349_v10  ;;  %v2374_v61 = vmax.f32 %v2372_v11, %v2373_v37  ;;  %v2387_v51 = vmax.f32 %v2385_v8, %v2386_v33 }
 0x19f   : > { %v7891_v63 = vmax.f32 %v2311_v43, %v2312_v44  ;;  %v2363_v34 = vmax.f32 %v2361_v16, %v2362_v27  ;;  %v2338_v20 = vrot.slane %v2337_v39, 1  ;;  %v2410_v44 = vunpack.i.h.bf16 %v2407_v7 }
 0x1a0   : > { %v7895_v21 = vmax.f32 %v2324_v48, %v2325_v23  ;;  %v2351_v36 = vrot.slane %v2350_v15, 1  ;;  %v2375_v29 = vrot.slane %v2374_v61, 2  ;;  %v2420_v37 = vsel %vm1052_vm1, %v7813_v2, 4286644096 }
 0x1a1   : > { %v2364_v55 = vrot.slane %v2363_v34, 1  ;;  %v7897_v58 = vmax.f32 %v2337_v39, %v2338_v20  ;;  %v2388_v57 = vrot.slane %v2387_v51, 2  ;;  %v2411_v39 = vmax.f32 %v2409_v17, %v2410_v44 }
 0x1a2   : > { %v7901_v27 = vmax.f32 %v2350_v15, %v2351_v36  ;;  %v2376_v43 = vmax.f32 %v2374_v61, %v2375_v29  ;;  %v2422_v45 = vunpack.i.l.bf16 %v2420_v37  ;;  %v2423_v48 = vunpack.i.h.bf16 %v2420_v37 }
 0x1a3   : > { %v7903_v11 = vmax.f32 %v2363_v34, %v2364_v55  ;;  %v2389_v7 = vmax.f32 %v2387_v51, %v2388_v57  ;;  %v2412_v23 = vrot.slane %v2411_v39, 4  ;;  %v9725_v15 = vcombine.high %v7810_v59, %v7810_v59 }
 0x1a4   : > { %v2377_v10 = vrot.slane %v2376_v43, 1  ;;  %v2424_v20 = vmax.f32 %v2422_v45, %v2423_v48  ;;  %v9726_v17 = vcombine.high %v7813_v2, %v7813_v2  ;;  %v2459_v59 = vsel %vm1052_vm1, %v7820_v35, 4286644096 }
 0x1a5   : > { %v2433_v34 = vsel %vm1052_vm1, %v9725_v15, 4286644096  ;;  %v2390_v29 = vrot.slane %v2389_v7, 1  ;;  %v2413_v44 = vmax.f32 %v2411_v39, %v2412_v23  ;;  %v2461_v2 = vunpack.i.l.bf16 %v2459_v59 }
 0x1a6   : > { %v2435_v61 = vunpack.i.l.bf16 %v2433_v34  ;;  %v2436_v33 = vunpack.i.h.bf16 %v2433_v34  ;;  %v2446_v36 = vsel %vm1052_vm1, %v9726_v17, 4286644096  ;;  %v7921_v55 = vmax.f32 %v2376_v43, %v2377_v10 }
 0x1a7   : > { %v2448_v37 = vunpack.i.l.bf16 %v2446_v36  ;;  %v2425_v51 = vrot.slane %v2424_v20, 4  ;;  %v2449_v24 = vunpack.i.h.bf16 %v2446_v36  ;;  %v7927_v48 = vmax.f32 %v2389_v7, %v2390_v29 }
 0x1a8   : > { %v2437_v57 = vmax.f32 %v2435_v61, %v2436_v33  ;;  %v2414_v15 = vrot.slane %v2413_v44, 2  ;;  %v2462_v10 = vunpack.i.h.bf16 %v2459_v59  ;;  %v2472_v61 = vsel %vm1052_vm1, %v7834_v19, 4286644096 }
 0x1a9   : > { %v2426_v34 = vmax.f32 %v2424_v20, %v2425_v51  ;;  %v2450_v43 = vmax.f32 %v2448_v37, %v2449_v24  ;;  %v9727_v33 = vcombine.high %v7820_v35, %v7820_v35  ;;  %v2474_v51 = vunpack.i.l.bf16 %v2472_v61 }
 0x1aa   : > { %v2438_v17 = vrot.slane %v2437_v57, 4  ;;  %v2415_v23 = vmax.f32 %v2413_v44, %v2414_v15  ;;  %v2463_v16 = vmax.f32 %v2461_v2, %v2462_v10  ;;  %v2475_v24 = vunpack.i.h.bf16 %v2472_v61 }
 0x1ab   : > { %v2485_v36 = vsel %vm1052_vm1, %v9727_v33, 4286644096  ;;  %v2427_v7 = vrot.slane %v2426_v34, 2  ;;  %v2451_v45 = vrot.slane %v2450_v43, 4  ;;  %v2511_v35 = vsel %vm1052_vm1, %v7823_v49, 4286644096 }
 0x1ac   : > { %v2439_v29 = vmax.f32 %v2437_v57, %v2438_v17  ;;  %v2416_v20 = vrot.slane %v2415_v23, 1  ;;  %v2487_v37 = vunpack.i.l.bf16 %v2485_v36  ;;  %v2464_v44 = vrot.slane %v2463_v16, 4 }
 0x1ad   : > { %v2428_v59 = vmax.f32 %v2426_v34, %v2427_v7  ;;  %v2452_v39 = vmax.f32 %v2450_v43, %v2451_v45  ;;  %v2476_v18 = vmax.f32 %v2474_v51, %v2475_v24  ;;  %v2488_v31 = vunpack.i.h.bf16 %v2485_v36 }
 0x1ae   : > { %v2440_v8 = vrot.slane %v2439_v29, 2  ;;  %v7937_v15 = vmax.f32 %v2415_v23, %v2416_v20  ;;  %v2465_v17 = vmax.f32 %v2463_v16, %v2464_v44  ;;  %v2513_v34 = vunpack.i.l.bf16 %v2511_v35 }
 0x1af   : > { %v2429_v33 = vrot.slane %v2428_v59, 1  ;;  %v2453_v57 = vrot.slane %v2452_v39, 2  ;;  %v2477_v10 = vrot.slane %v2476_v18, 4  ;;  %v2489_v61 = vmax.f32 %v2487_v37, %v2488_v31 }
 0x1b0   : > { %v2441_v4 = vmax.f32 %v2439_v29, %v2440_v8  ;;  %v2466_v23 = vrot.slane %v2465_v17, 2  ;;  %v2514_v51 = vunpack.i.h.bf16 %v2511_v35  ;;  %v2524_v24 = vsel %vm1052_vm1, %v7837_v3, 4286644096 }
 0x1b1   : > { %v7943_v7 = vmax.f32 %v2428_v59, %v2429_v33  ;;  %v2454_v43 = vmax.f32 %v2452_v39, %v2453_v57  ;;  %v2478_v20 = vmax.f32 %v2476_v18, %v2477_v10  ;;  %v2490_v36 = vrot.slane %v2489_v61, 4 }
 0x1b2   : > { %v2442_v45 = vrot.slane %v2441_v4, 1  ;;  %v2467_v44 = vmax.f32 %v2465_v17, %v2466_v23  ;;  %v2515_v59 = vmax.f32 %v2513_v34, %v2514_v51  ;;  %v2526_v33 = vunpack.i.l.bf16 %v2524_v24 }
 0x1b3   : > { %v2455_v29 = vrot.slane %v2454_v43, 1  ;;  %v2479_v31 = vrot.slane %v2478_v20, 2  ;;  %v2491_v37 = vmax.f32 %v2489_v61, %v2490_v36  ;;  %v2527_v57 = vunpack.i.h.bf16 %v2524_v24 }
 0x1b4   : > { %v7949_v16 = vmax.f32 %v2441_v4, %v2442_v45  ;;  %v2468_v35 = vrot.slane %v2467_v44, 1  ;;  %v2516_v30 = vrot.slane %v2515_v59, 4  ;;  %v9728_v4 = vcombine.high %v7823_v49, %v7823_v49 }
 0x1b5   : > { %v7953_v18 = vmax.f32 %v2454_v43, %v2455_v29  ;;  %v2480_v10 = vmax.f32 %v2478_v20, %v2479_v31  ;;  %v2492_v2 = vrot.slane %v2491_v37, 2  ;;  %v2528_v34 = vmax.f32 %v2526_v33, %v2527_v57 }
 0x1b6   : > { %v2537_v45 = vsel %vm1052_vm1, %v9728_v4, 4286644096  ;;  %v7961_v61 = vmax.f32 %v2467_v44, %v2468_v35  ;;  %v2517_v51 = vmax.f32 %v2515_v59, %v2516_v30  ;;  %v9729_v49 = vcombine.high %v7837_v3, %v7837_v3 }
 0x1b7   : > { %v2539_v23 = vunpack.i.l.bf16 %v2537_v45  ;;  %v2481_v36 = vrot.slane %v2480_v10, 1  ;;  %v2493_v43 = vmax.f32 %v2491_v37, %v2492_v2  ;;  %v2540_v29 = vunpack.i.h.bf16 %v2537_v45 }
 0x1b8   : > { %v2529_v24 = vrot.slane %v2528_v34, 4  ;;  %v2550_v31 = vsel %vm1052_vm1, %v9729_v49, 4286644096  ;;  %v2563_v4 = vsel %vm1052_vm1, %v7842_v9, 4286644096  ;;  %v2518_v35 = vrot.slane %v2517_v51, 2 }
 0x1b9   : > { %v7971_v44 = vmax.f32 %v2480_v10, %v2481_v36  ;;  %v2494_v33 = vrot.slane %v2493_v43, 1  ;;  %v2541_v57 = vmax.f32 %v2539_v23, %v2540_v29  ;;  %v2552_v30 = vunpack.i.l.bf16 %v2550_v31 }
 0x1ba   : > { %v2530_v2 = vmax.f32 %v2528_v34, %v2529_v24  ;;  %v2553_v37 = vunpack.i.h.bf16 %v2550_v31  ;;  %v2565_v59 = vunpack.i.l.bf16 %v2563_v4  ;;  %v2519_v3 = vmax.f32 %v2517_v51, %v2518_v35 }
 0x1bb   : > { %v7975_v20 = vmax.f32 %v2493_v43, %v2494_v33  ;;  %v2542_v17 = vrot.slane %v2541_v57, 4  ;;  %v2566_v8 = vunpack.i.h.bf16 %v2563_v4  ;;  %v2576_v10 = vsel %vm1052_vm1, %v7852_v60, 4286644096 }
 0x1bc   : > { %v2531_v49 = vrot.slane %v2530_v2, 2  ;;  %v2554_v39 = vmax.f32 %v2552_v30, %v2553_v37  ;;  %v2520_v34 = vrot.slane %v2519_v3, 1  ;;  %v2578_v29 = vunpack.i.l.bf16 %v2576_v10 }
 0x1bd   : > { %v2543_v36 = vmax.f32 %v2541_v57, %v2542_v17  ;;  %v2567_v38 = vmax.f32 %v2565_v59, %v2566_v8  ;;  %v2579_v45 = vunpack.i.h.bf16 %v2576_v10  ;;  %v9730_v33 = vcombine.high %v7842_v9, %v7842_v9 }
 0x1be   : > { %v2532_v24 = vmax.f32 %v2530_v2, %v2531_v49  ;;  %v2555_v31 = vrot.slane %v2554_v39, 4  ;;  %v7981_v43 = vmax.f32 %v2519_v3, %v2520_v34  ;;  %v2615_v35 = vsel %vm1052_vm1, %v7845_v13, 4286644096 }
 0x1bf   : > { %v2544_v51 = vrot.slane %v2543_v36, 2  ;;  %v2589_v4 = vsel %vm1052_vm1, %v9730_v33, 4286644096  ;;  %v2568_v23 = vrot.slane %v2567_v38, 4  ;;  %v2580_v17 = vmax.f32 %v2578_v29, %v2579_v45 }
 0x1c0   : > { %v2533_v30 = vrot.slane %v2532_v24, 1  ;;  %v2556_v37 = vmax.f32 %v2554_v39, %v2555_v31  ;;  %v2591_v2 = vunpack.i.l.bf16 %v2589_v4  ;;  %v2592_v59 = vunpack.i.h.bf16 %v2589_v4 }
 0x1c1   : > { %v2545_v8 = vmax.f32 %v2543_v36, %v2544_v51  ;;  %v2569_v10 = vmax.f32 %v2567_v38, %v2568_v23  ;;  %v2581_v9 = vrot.slane %v2580_v17, 4  ;;  %v2617_v0 = vunpack.i.l.bf16 %v2615_v35 }
 0x1c2   : > { %v7991_v3 = vmax.f32 %v2532_v24, %v2533_v30  ;;  %v2557_v49 = vrot.slane %v2556_v37, 2  ;;  %v2593_v33 = vmax.f32 %v2591_v2, %v2592_v59  ;;  %v2618_v62 = vunpack.i.h.bf16 %v2615_v35 }
 0x1c3   : > { %v2546_v34 = vrot.slane %v2545_v8, 1  ;;  %v2570_v45 = vrot.slane %v2569_v10, 2  ;;  %v2582_v29 = vmax.f32 %v2580_v17, %v2581_v9  ;;  %v2628_v24 = vsel %vm1052_vm1, %v7863_v53, 4286644096 }
 0x1c4   : > { %v2558_v31 = vmax.f32 %v2556_v37, %v2557_v49  ;;  %v2594_v36 = vrot.slane %v2593_v33, 4  ;;  %v2619_v51 = vmax.f32 %v2617_v0, %v2618_v62  ;;  %v2630_v30 = vunpack.i.l.bf16 %v2628_v24 }
 0x1c5   : > { %v7995_v25 = vmax.f32 %v2545_v8, %v2546_v34  ;;  %v2571_v38 = vmax.f32 %v2569_v10, %v2570_v45  ;;  %v2583_v23 = vrot.slane %v2582_v29, 2  ;;  %v2631_v39 = vunpack.i.h.bf16 %v2628_v24 }
 0x1c6   : > { %v2559_v4 = vrot.slane %v2558_v31, 1  ;;  %v2595_v2 = vmax.f32 %v2593_v33, %v2594_v36  ;;  %v2620_v59 = vrot.slane %v2619_v51, 4  ;;  %v9731_v62 = vcombine.high %v7845_v13, %v7845_v13 }
 0x1c7   : > { %v2572_v17 = vrot.slane %v2571_v38, 1  ;;  %v2584_v8 = vmax.f32 %v2582_v29, %v2583_v23  ;;  %v2632_v10 = vmax.f32 %v2630_v30, %v2631_v39  ;;  %v9732_v29 = vcombine.high %v7863_v53, %v7863_v53 }
 0x1c8   : > { %v8001_v37 = vmax.f32 %v2558_v31, %v2559_v4  ;;  %v2641_v0 = vsel %vm1052_vm1, %v9731_v62, 4286644096  ;;  %v2596_v49 = vrot.slane %v2595_v2, 2  ;;  %v2621_v9 = vmax.f32 %v2619_v51, %v2620_v59 }
 0x1c9   : > { %v2643_v34 = vunpack.i.l.bf16 %v2641_v0  ;;  %v8009_v35 = vmax.f32 %v2571_v38, %v2572_v17  ;;  %v2585_v33 = vrot.slane %v2584_v8, 1  ;;  %v2644_v36 = vunpack.i.h.bf16 %v2641_v0 }
 0x1ca   : > { %v2597_v31 = vmax.f32 %v2595_v2, %v2596_v49  ;;  %v2622_v24 = vrot.slane %v2621_v9, 2  ;;  %v2633_v4 = vrot.slane %v2632_v10, 4  ;;  %v2654_v13 = vsel %vm1052_vm1, %v9732_v29, 4286644096 }
 0x1cb   : > { %v8017_v39 = vmax.f32 %v2584_v8, %v2585_v33  ;;  %v2645_v23 = vmax.f32 %v2643_v34, %v2644_v36  ;;  %v2656_v30 = vunpack.i.l.bf16 %v2654_v13  ;;  %v2657_v62 = vunpack.i.h.bf16 %v2654_v13 }
 0x1cc   : > { %v2598_v59 = vrot.slane %v2597_v31, 1  ;;  %v2623_v38 = vmax.f32 %v2621_v9, %v2622_v24  ;;  %v2634_v17 = vmax.f32 %v2632_v10, %v2633_v4  ;;  %v2667_v53 = vsel %vm1052_vm1, %v7859_v46, 4286644096 }
 0x1cd   : > { %v2646_v0 = vrot.slane %v2645_v23, 4  ;;  %v2680_v49 = vsel %vm1052_vm1, %v7868_v28, 4286644096  ;;  %v2658_v34 = vmax.f32 %v2656_v30, %v2657_v62  ;;  %v2669_v51 = vunpack.i.l.bf16 %v2667_v53 }
 0x1ce   : > { %v8025_v29 = vmax.f32 %v2597_v31, %v2598_v59  ;;  %v2624_v8 = vrot.slane %v2623_v38, 1  ;;  %v2635_v33 = vrot.slane %v2634_v17, 2  ;;  %v2670_v9 = vunpack.i.h.bf16 %v2667_v53 }
 0x1cf   : > { %v2647_v36 = vmax.f32 %v2645_v23, %v2646_v0  ;;  %v2682_v10 = vunpack.i.l.bf16 %v2680_v49  ;;  %v2659_v2 = vrot.slane %v2658_v34, 4  ;;  %v2683_v56 = vunpack.i.h.bf16 %v2680_v49 }
 0x1d0   : > { %v8029_v4 = vmax.f32 %v2623_v38, %v2624_v8  ;;  %v2636_v13 = vmax.f32 %v2634_v17, %v2635_v33  ;;  %v2671_v57 = vmax.f32 %v2669_v51, %v2670_v9  ;;  %v9733_v31 = vcombine.high %v7859_v46, %v7859_v46 }
 0x1d1   : > { %v2648_v45 = vrot.slane %v2647_v36, 2  ;;  %v2660_v62 = vmax.f32 %v2658_v34, %v2659_v2  ;;  %v2684_v38 = vmax.f32 %v2682_v10, %v2683_v56  ;;  %v9734_v51 = vpack.i.bf16 %v7891_v63, %v7891_v63 }
 0x1d2   : > { %v2693_v59 = vsel %vm1052_vm1, %v9733_v31, 4286644096  ;;  %v2626_v23 = vpack.i.bf16 %v8029_v4, %v8029_v4  ;;  %v2637_v30 = vrot.slane %v2636_v13, 1  ;;  %v2672_v24 = vrot.slane %v2671_v57, 4 }
 0x1d3   : > { %v2695_v0 = vunpack.i.l.bf16 %v2693_v59  ;;  %v2649_v53 = vmax.f32 %v2647_v36, %v2648_v45  ;;  %v2696_v8 = vunpack.i.h.bf16 %v2693_v59  ;;  %v2661_v33 = vrot.slane %v2660_v62, 2  ;;  %v3197_v45 = vld [vmem:[#allocation2 + $0x38] sm:$0x1] }
 0x1d4   : > { %v2638_v17 = vmax.f32 %v2636_v13, %v2637_v30  ;;  %v3056_v49 = vsel %vm2718_vm3, %v9734_v51, 4286644096  ;;  %v9735_v46 = vpack.i.bf16 %v7937_v15, %v7937_v15  ;;  %v2673_v31 = vmax.f32 %v2671_v57, %v2672_v24 }
 0x1d5   : > { %v2650_v4 = vrot.slane %v2649_v53, 1  ;;  %v2685_v2 = vrot.slane %v2684_v38, 4  ;;  %v2697_v34 = vmax.f32 %v2695_v0, %v2696_v8  ;;  %v2662_v56 = vmax.f32 %v2660_v62, %v2661_v33 }
 0x1d6   : > { %v3059_v9 = vsel %vm2718_vm3, %v9735_v46, 4286644096  ;;  %v2639_v36 = vpack.i.bf16 %v2638_v17, %v2638_v17  ;;  %v9736_v13 = vpack.i.bf16 %v7895_v21, %v7895_v21  ;;  %v2674_v30 = vrot.slane %v2673_v31, 2 }
 0x1d7   : > { %v8045_v10 = vmax.bf16 %v3059_v9, %v3056_v49  ;;  %v2651_v59 = vmax.f32 %v2649_v53, %v2650_v4  ;;  %v2686_v51 = vmax.f32 %v2684_v38, %v2685_v2  ;;  %v2698_v15 = vrot.slane %v2697_v34, 4 }
 0x1d8   : > { %v3063_v63 = vsel %vm2718_vm3, %v9736_v13, 4286644096  ;;  %v2663_v28 = vrot.slane %v2662_v56, 1  ;;  %v9737_v57 = vpack.i.bf16 %v7943_v7, %v7943_v7  ;;  %v9738_v62 = vpack.i.bf16 %v7897_v58, %v7897_v58 }
 0x1d9   : > { %v3198_v21 = vsel %vm6883_vm2, 0, %v3197_v45  ;;  %v2652_v8 = vpack.i.bf16 %v2651_v59, %v2651_v59  ;;  %v2675_v17 = vmax.f32 %v2673_v31, %v2674_v30  ;;  %v2687_v53 = vrot.slane %v2686_v51, 2 }
 0x1da   : > { %v3066_v24 = vsel %vm2718_vm3, %v9737_v57, 4286644096  ;;  %v3070_v0 = vsel %vm2718_vm3, %v9738_v62, 4286644096  ;;  %v2699_v33 = vmax.f32 %v2697_v34, %v2698_v15  ;;  %3199 = vst [vmem:[#allocation2 + $0x38] sm:$0x1] %v3198_v21  ;;  %v2664_v38 = vmax.f32 %v2662_v56, %v2663_v28 }
 0x1db   : > { %v8061_v49 = vmax.bf16 %v3066_v24, %v3063_v63  ;;  %v9739_v7 = vpack.i.bf16 %v7949_v16, %v7949_v16  ;;  %v9740_v58 = vpack.i.bf16 %v7901_v27, %v7901_v27  ;;  %v2676_v4 = vrot.slane %v2675_v17, 1 }
 0x1dc   : > { %v2688_v2 = vmax.f32 %v2686_v51, %v2687_v53  ;;  %v2700_v45 = vrot.slane %v2699_v33, 2  ;;  %v2665_v13 = vpack.i.bf16 %v2664_v38, %v2664_v38  ;;  %v9741_v28 = vpack.i.bf16 %v7953_v18, %v7953_v18 }
 0x1dd   : > { %v3073_v46 = vsel %vm2718_vm3, %v9739_v7, 4286644096  ;;  %v3077_v9 = vsel %vm2718_vm3, %v9740_v58, 4286644096  ;;  %v9742_v16 = vpack.i.bf16 %v7903_v11, %v7903_v11  ;;  %v9743_v27 = vpack.i.bf16 %v7961_v61, %v7961_v61 }
 0x1de   : > { %v3075_v31 = vmax.bf16 %v3073_v46, %v3070_v0  ;;  %v3080_v34 = vsel %vm2718_vm3, %v9741_v28, 4286644096  ;;  %v2677_v59 = vmax.f32 %v2675_v17, %v2676_v4  ;;  %v2689_v30 = vrot.slane %v2688_v2, 1 }
 0x1df   : > { %v3084_v56 = vsel %vm2718_vm3, %v9742_v16, 4286644096  ;;  %v3087_v63 = vsel %vm2718_vm3, %v9743_v27, 4286644096  ;;  %v2701_v51 = vmax.f32 %v2699_v33, %v2700_v45  ;;  %v3082_v15 = vmax.bf16 %v3080_v34, %v3077_v9 }
 0x1e0   : > { %v3089_v57 = vmax.bf16 %v3087_v63, %v3084_v56  ;;  %v9744_v18 = vpack.i.bf16 %v7921_v55, %v7921_v55  ;;  %v9745_v11 = vpack.i.bf16 %v7971_v44, %v7971_v44  ;;  %v9746_v61 = vpack.i.bf16 %v7927_v48, %v7927_v48  ;;  %v3200_v63 = vld [vmem:[#allocation2 + $0x40] sm:$0x1] }
 0x1e1   : > { %v2678_v21 = vpack.i.bf16 %v2677_v59, %v2677_v59  ;;  %v2690_v17 = vmax.f32 %v2688_v2, %v2689_v30  ;;  %v2702_v53 = vrot.slane %v2701_v51, 1  ;;  %v9747_v38 = vpack.i.bf16 %v7975_v20, %v7975_v20 }
 0x1e2   : > { %v3091_v24 = vsel %vm2718_vm3, %v9744_v18, 4286644096  ;;  %v3094_v62 = vsel %vm2718_vm3, %v9745_v11, 4286644096  ;;  %v3098_v0 = vsel %vm2718_vm3, %v9746_v61, 4286644096  ;;  %v9748_v7 = vpack.i.bf16 %v7981_v43, %v7981_v43 }
 0x1e3   : > { %v3096_v33 = vmax.bf16 %v3094_v62, %v3091_v24  ;;  %v3101_v55 = vsel %vm2718_vm3, %v9747_v38, 4286644096  ;;  %v3115_v46 = vsel %vm2718_vm3, %v2626_v23, 4286644096  ;;  %v6123_v48 = vcombine.low %v8045_v10, %v8045_v10 }
 0x1e4   : > { %v3112_v44 = vsel %vm2718_vm3, %v9748_v7, 4286644096  ;;  %v2691_v58 = vpack.i.bf16 %v2690_v17, %v2690_v17  ;;  %v2703_v9 = vmax.f32 %v2701_v51, %v2702_v53  ;;  %v3103_v4 = vmax.bf16 %v3101_v55, %v3098_v0 }
 0x1e5   : > { %v3117_v2 = vmax.bf16 %v3115_v46, %v3112_v44  ;;  %v9749_v45 = vpack.i.bf16 %v7991_v3, %v7991_v3  ;;  %v3122_v28 = vsel %vm2718_vm3, %v2639_v36, 4286644096  ;;  %v9750_v43 = vpack.i.bf16 %v7995_v25, %v7995_v25 }
 0x1e6   : > { %v6124_v23 = vcombine.low %v8061_v49, %v8061_v49  ;;  %v2704_v10 = vpack.i.bf16 %v2703_v9, %v2703_v9  ;;  %v3129_v56 = vsel %vm2718_vm3, %v2652_v8, 4286644096  ;;  %v9751_v27 = vpack.i.bf16 %v8001_v37, %v8001_v37 }
 0x1e7   : > { %v3119_v20 = vsel %vm2718_vm3, %v9749_v45, 4286644096  ;;  %v3126_v34 = vsel %vm2718_vm3, %v9750_v43, 4286644096  ;;  %v3136_v36 = vsel %vm2718_vm3, %v2665_v13, 4286644096  ;;  %v9752_v25 = vpack.i.bf16 %v8009_v35, %v8009_v35 }
 0x1e8   : > { %v3124_v16 = vmax.bf16 %v3122_v28, %v3119_v20  ;;  %v3133_v3 = vsel %vm2718_vm3, %v9751_v27, 4286644096  ;;  %v3131_v59 = vmax.bf16 %v3129_v56, %v3126_v34  ;;  %v3143_v49 = vsel %vm2718_vm3, %v2678_v21, 4286644096 }
 0x1e9   : > { %v3140_v30 = vsel %vm2718_vm3, %v9752_v25, 4286644096  ;;  %v3138_v51 = vmax.bf16 %v3136_v36, %v3133_v3  ;;  %v9753_v8 = vpack.i.bf16 %v8017_v39, %v8017_v39  ;;  %v3150_v24 = vsel %vm2718_vm3, %v2691_v58, 4286644096 }
 0x1ea   : > { %v3145_v18 = vmax.bf16 %v3143_v49, %v3140_v30  ;;  %v9754_v13 = vpack.i.bf16 %v8025_v29, %v8025_v29  ;;  %v3157_v35 = vsel %vm2718_vm3, %v2704_v10, 4286644096  ;;  %v3201_v61 = vsel %vm6883_vm2, 0, %v3200_v63 }
 0x1eb   : > { %v3147_v37 = vsel %vm2718_vm3, %v9753_v8, 4286644096  ;;  %3202 = vst [vmem:[#allocation2 + $0x40] sm:$0x1] %v3201_v61  ;;  %v6125_v21 = vcombine.low %v3075_v31, %v3075_v31  ;;  %v6126_v17 = vcombine.low %v3082_v15, %v3082_v15  ;;  %v6127_v39 = vcombine.low %v3089_v57, %v3089_v57 }
 0x1ec   : > { %v3152_v11 = vmax.bf16 %v3150_v24, %v3147_v37  ;;  %v3154_v62 = vsel %vm2718_vm3, %v9754_v13, 4286644096  ;;  %v6128_v53 = vcombine.low %v3096_v33, %v3096_v33  ;;  %v6129_v38 = vcombine.low %v3103_v4, %v3103_v4  ;;  %v6063_v34 = vld.sshfl [vmem:[%s6869_s5 + $0x50] sm:$0x33 pattern:$0x75316420] }
 0x1ed   : > { %v3159_v0 = vmax.bf16 %v3157_v35, %v3154_v62  ;;  %v6131_v55 = vcombine.low %v3117_v2, %v3117_v2  ;;  %v6132_v7 = vcombine.low %v3124_v16, %v3124_v16  ;;  %v6133_v44 = vcombine.low %v3131_v59, %v3131_v59  ;;  %v6065_v37 = vld.sshfl [vmem:[%s6869_s5 + $0x58] sm:$0x33 pattern:$0x75316420] }
 0x1ee   : > { %v6134_v46 = vcombine.low %v3138_v51, %v3138_v51  ;;  %v6135_v29 = vcombine.low %v3145_v18, %v3145_v18  ;;  %v6136_v58 = vcombine.low %v3152_v11, %v3152_v11  ;;  %v9755_v9 = vshrl.u32 %v7879_v1, 16  ;;  %v6066_v13 = vld.sshfl [vmem:[%s6869_s5 + $0x5c] sm:$0x33 pattern:$0x75316420] }
 0x1ef   : > { %v3478_v20 = vunpack.c.l.b16 %v6123_v48  ;;  %v3479_v28 = vunpack.c.l.b16 %v6124_v23  ;;  %v3480_v43 = vunpack.c.l.b16 %v6125_v21  ;;  %v6137_v31 = vcombine.low %v3159_v0, %v3159_v0  ;;  %v6064_v48 = vld.sshfl [vmem:[%s6869_s5 + $0x54] sm:$0x33 pattern:$0x75316420] }
 0x1f0   : > { %v8142_v45 = vrot.slane %v9755_v9, 4  ;;  %v3481_v15 = vunpack.c.l.b16 %v6126_v17  ;;  %v3482_v57 = vunpack.c.l.b16 %v6127_v39  ;;  %v3483_v33 = vunpack.c.l.b16 %v6128_v53  ;;  %v3619_v53 = vld [vmem:[#allocation2 + $0x38] sm:$0xf] }
 0x1f1   : > { %v3486_v4 = vunpack.c.l.b16 %v6131_v55  ;;  %v3487_v2 = vunpack.c.l.b16 %v6132_v7  ;;  %v3488_v10 = vunpack.c.l.b16 %v6133_v44  ;;  %v3489_v16 = vunpack.c.l.b16 %v6134_v46 }
 0x1f2   : > { %v3484_v56 = vunpack.c.l.b16 %v6129_v38  ;;  %v3490_v27 = vunpack.c.l.b16 %v6135_v29  ;;  %v3491_v3 = vunpack.c.l.b16 %v6136_v58  ;;  %v3536_v63 = vsel %vm3494_vm4, %v3479_v28, %v3478_v20  ;;  %v3625_v46 = vld [vmem:[#allocation2 + $0x40] sm:$0xf] }
 0x1f3   : > { %v3537_v23 = vsel %vm3496_vm5, %v3480_v43, %v3536_v63  ;;  %v3542_v59 = vsel %vm3494_vm4, %v3487_v2, %v3486_v4  ;;  %v771_v36 = vcombine.high %v6063_v34, %v6063_v34  ;;  %v778_v25 = vrot.slane %v6063_v34, %v6879_v5 }
 0x1f4   : > { %v9756_v30 = vshll.u32 %v7879_v1, 16  ;;  %v3492_v51 = vunpack.c.l.b16 %v6137_v31  ;;  %v3538_v18 = vsel %vm3498_vm6, %v3481_v15, %v3537_v23  ;;  %v3543_v8 = vsel %vm3496_vm5, %v3488_v10, %v3542_v59 }
 0x1f5   : > { %v3539_v24 = vsel %vm3500_vm7, %v3482_v57, %v3538_v18  ;;  %v3544_v11 = vsel %vm3498_vm6, %v3489_v16, %v3543_v8  ;;  %v785_v62 = vrot.slane %v771_v36, %v6879_v5  ;;  %v795_v35 = vcombine.high %v6064_v48, %v6064_v48 }
 0x1f6   : > { %v8152_v49 = vrot.slane %v9756_v30, 5  ;;  %v3540_v61 = vsel %vm3502_vm8, %v3483_v33, %v3539_v24  ;;  %v3545_v1 = vsel %vm3500_vm7, %v3490_v27, %v3544_v11  ;;  %v786_v0 = vcombine.high %v778_v25, %v778_v25 }
 0x1f7   : > { %v802_v21 = vrot.slane %v6064_v48, %v6879_v5  ;;  %v3541_v17 = vsel %vm3504_vm11, %v3484_v56, %v3540_v61  ;;  %v3546_v39 = vsel %vm3502_vm8, %v3491_v3, %v3545_v1  ;;  %v787_v38 = vcombine.high %v785_v62, %v785_v62 }
 0x1f8   : > { %v819_v55 = vcombine.high %v6065_v37, %v6065_v37  ;;  %v3547_v7 = vsel %vm3504_vm11, %v3492_v51, %v3546_v39  ;;  %v3560_v44 = vpack.c.b16 %v3541_v17, %v3541_v17  ;;  %v8168_v29 = vrot.slane %v6065_v37, %v6879_v5 }
 0x1f9   : > { %v843_v58 = vcombine.high %v6066_v13, %v6066_v13  ;;  %v3562_v9 = vpack.c.b16 %v3547_v7, %v3547_v7  ;;  %v8171_v20 = vrot.slane %v795_v35, %v6879_v5  ;;  %v2095_v43 = vsel %vm1052_vm1, %v778_v25, 4286644096 }
 0x1fa   : > { %v8174_v28 = vrot.slane %v819_v55, %v6879_v5  ;;  %v3620_v31 = vsel %vm7253_vm12, %v3560_v44, %v3619_v53  ;;  %v810_v15 = vcombine.high %v802_v21, %v802_v21  ;;  %v8180_v57 = vrot.slane %v6066_v13, %v6879_v5 }
 0x1fb   : > { %v2097_v33 = vunpack.i.l.bf16 %v2095_v43  ;;  %3621 = vst [vmem:[#allocation2 + $0x38] sm:$0xf] %v3620_v31  ;;  %v3626_v34 = vsel %vm7253_vm12, %v3562_v9, %v3625_v46  ;;  %v834_v4 = vcombine.high %v8168_v29, %v8168_v29  ;;  %v8187_v2 = vrot.slane %v843_v58, %v6879_v5 }
 0x1fc   : > { %v2098_v10 = vunpack.i.h.bf16 %v2095_v43  ;;  %3627 = vst [vmem:[#allocation2 + $0x40] sm:$0xf] %v3626_v34  ;;  %v835_v16 = vcombine.high %v8174_v28, %v8174_v28  ;;  %v2108_v56 = vsel %vm1052_vm1, %v785_v62, 4286644096  ;;  %v2121_v27 = vsel %vm1052_vm1, %v786_v0, 4286644096 }
 0x1fd   : > { %v2134_v3 = vsel %vm1052_vm1, %v787_v38, 4286644096  ;;  %v2110_v48 = vunpack.i.l.bf16 %v2108_v56  ;;  %v2111_v23 = vunpack.i.h.bf16 %v2108_v56  ;;  %v2123_v59 = vunpack.i.l.bf16 %v2121_v27 }
 0x1fe   : > { %v2099_v63 = vmax.f32 %v2097_v33, %v2098_v10  ;;  %v2124_v36 = vunpack.i.h.bf16 %v2121_v27  ;;  %v2136_v25 = vunpack.i.l.bf16 %v2134_v3  ;;  %v2137_v30 = vunpack.i.h.bf16 %v2134_v3 }
 0x1ff   : > { %v2147_v5 = vsel %vm1052_vm1, %v802_v21, 4286644096  ;;  %v2112_v18 = vmax.f32 %v2110_v48, %v2111_v23  ;;  %v858_v24 = vcombine.high %v8180_v57, %v8180_v57  ;;  %v2160_v62 = vsel %vm1052_vm1, %v8171_v20, 4286644096 }
 0x200   : > { %v2100_v51 = vrot.slane %v2099_v63, 4  ;;  %v2149_v8 = vunpack.i.l.bf16 %v2147_v5  ;;  %v2150_v37 = vunpack.i.h.bf16 %v2147_v5  ;;  %v2125_v11 = vmax.f32 %v2123_v59, %v2124_v36 }
 0x201   : > { %v2138_v13 = vmax.f32 %v2136_v25, %v2137_v30  ;;  %v2113_v61 = vrot.slane %v2112_v18, 4  ;;  %v2173_v0 = vsel %vm1052_vm1, %v810_v15, 4286644096  ;;  %v2162_v53 = vunpack.i.l.bf16 %v2160_v62 }
 0x202   : > { %v2101_v35 = vmax.f32 %v2099_v63, %v2100_v51  ;;  %v2151_v1 = vmax.f32 %v2149_v8, %v2150_v37  ;;  %v3827_v17 = vld [vmem:[#allocation2 + $0x38] sm:$0xf]  ;;  %v2126_v39 = vrot.slane %v2125_v11, 4  ;;  %v2163_v38 = vunpack.i.h.bf16 %v2160_v62 }
 0x203   : > { %v2139_v21 = vrot.slane %v2138_v13, 4  ;;  %v8200_v55 = vld [vmem:[#allocation2 + $0x40] sm:$0xf]  ;;  %v3922_v7 = vshrl.u32 %v3827_v17, 16  ;;  %v3925_v44 = vshll.u32 %v3827_v17, 16  ;;  %v2114_v58 = vmax.f32 %v2112_v18, %v2113_v61 }
 0x204   : > { %v2102_v46 = vrot.slane %v2101_v35, 2  ;;  %v6186_v9 = vcombine.low %v3827_v17, %v8200_v55  ;;  %v2127_v43 = vmax.f32 %v2125_v11, %v2126_v39  ;;  %v2175_v31 = vunpack.i.l.bf16 %v2173_v0 }
 0x205   : > { %v3936_v15 = vshrl.u32 %v8200_v55, 16  ;;  %v2115_v56 = vrot.slane %v2114_v58, 2  ;;  %v8207_v27 = vrot.slane %v3922_v7, 4  ;;  %v8209_v3 = vrot.slane %v3925_v44, 5 }
 0x206   : > { %v2103_v10 = vmax.f32 %v2101_v35, %v2102_v46  ;;  %4276 = vrot.lane.b32.xlu1 %v6186_v9, %s6649_s18  ;;  %v2128_v63 = vrot.slane %v2127_v43, 2  ;;  %v2140_v48 = vmax.f32 %v2138_v13, %v2139_v21  ;;  %v2152_v36 = vrot.slane %v2151_v1, 4 }
 0x207   : > { %v2116_v59 = vmax.f32 %v2114_v58, %v2115_v56  ;;  %v2164_v25 = vmax.f32 %v2162_v53, %v2163_v38  ;;  %v2176_v51 = vunpack.i.h.bf16 %v2173_v0  ;;  %v2199_v18 = vsel %vm1052_vm1, %v8168_v29, 4286644096 }
 0x208   : > { %v2104_v23 = vrot.slane %v2103_v10, 1  ;;  %v2129_v30 = vmax.f32 %v2127_v43, %v2128_v63  ;;  %v2141_v5 = vrot.slane %v2140_v48, 2  ;;  %v2153_v11 = vmax.f32 %v2151_v1, %v2152_v36 }
 0x209   : > { %v2117_v37 = vrot.slane %v2116_v59, 1  ;;  %v2165_v62 = vrot.slane %v2164_v25, 4  ;;  %v2177_v17 = vmax.f32 %v2175_v31, %v2176_v51  ;;  %v2201_v39 = vunpack.i.l.bf16 %v2199_v18 }
 0x20a   : > { %v8214_v8 = vmax.f32 %v2103_v10, %v2104_v23  ;;  %v2130_v35 = vrot.slane %v2129_v30, 1  ;;  %v2142_v61 = vmax.f32 %v2140_v48, %v2141_v5  ;;  %v8216_v13 = vrot.slane %v3936_v15, 4 }
 0x20b   : > { %v8218_v21 = vmax.f32 %v2116_v59, %v2117_v37  ;;  %v2154_v53 = vrot.slane %v2153_v11, 2  ;;  %v2166_v38 = vmax.f32 %v2164_v25, %v2165_v62  ;;  %v2178_v44 = vrot.slane %v2177_v17, 4 }
 0x20c   : > { %v8220_v7 = vmax.f32 %v2129_v30, %v2130_v35  ;;  %v2143_v0 = vrot.slane %v2142_v61, 1  ;;  %v2202_v46 = vunpack.i.h.bf16 %v2199_v18  ;;  %v2106_v58 = vpack.i.bf16 %v8214_v8, %v8214_v8 }
 0x20d   : > { %v2155_v1 = vmax.f32 %v2153_v11, %v2154_v53  ;;  %v2167_v9 = vrot.slane %v2166_v38, 2  ;;  %v2212_v43 = vsel %vm1052_vm1, %v8174_v28, 4286644096  ;;  %v2119_v31 = vpack.i.bf16 %v8218_v21, %v8218_v21 }
 0x20e   : > { %v8228_v15 = vmax.f32 %v2142_v61, %v2143_v0  ;;  %v2179_v10 = vmax.f32 %v2177_v17, %v2178_v44  ;;  %v2203_v56 = vmax.f32 %v2201_v39, %v2202_v46  ;;  %v2214_v23 = vunpack.i.l.bf16 %v2212_v43 }
 0x20f   : > { %v2156_v63 = vrot.slane %v2155_v1, 1  ;;  %v2168_v48 = vmax.f32 %v2166_v38, %v2167_v9  ;;  %v2215_v59 = vunpack.i.h.bf16 %v2212_v43  ;;  %v2132_v36 = vpack.i.bf16 %v8220_v7, %v8220_v7 }
 0x210   : > { %v2180_v25 = vrot.slane %v2179_v10, 2  ;;  %v2204_v30 = vrot.slane %v2203_v56, 4  ;;  %v2225_v5 = vsel %vm1052_vm1, %v834_v4, 4286644096  ;;  %v2238_v17 = vsel %vm1052_vm1, %v835_v16, 4286644096 }
 0x211   : > { %v8236_v51 = vmax.f32 %v2155_v1, %v2156_v63  ;;  %v2169_v18 = vrot.slane %v2168_v48, 1  ;;  %v2216_v37 = vmax.f32 %v2214_v23, %v2215_v59  ;;  %v2227_v11 = vunpack.i.l.bf16 %v2225_v5 }
 0x212   : > { %v2181_v62 = vmax.f32 %v2179_v10, %v2180_v25  ;;  %v2205_v35 = vmax.f32 %v2203_v56, %v2204_v30  ;;  %v2228_v61 = vunpack.i.h.bf16 %v2225_v5  ;;  %v2145_v39 = vpack.i.bf16 %v8228_v15, %v8228_v15 }
 0x213   : > { %v8244_v53 = vmax.f32 %v2168_v48, %v2169_v18  ;;  %v2217_v29 = vrot.slane %v2216_v37, 4  ;;  %v2240_v4 = vunpack.i.l.bf16 %v2238_v17  ;;  %v2241_v46 = vunpack.i.h.bf16 %v2238_v17 }
 0x214   : > { %v2182_v38 = vrot.slane %v2181_v62, 1  ;;  %v2206_v0 = vrot.slane %v2205_v35, 2  ;;  %v2229_v44 = vmax.f32 %v2227_v11, %v2228_v61  ;;  %v2158_v1 = vpack.i.bf16 %v8236_v51, %v8236_v51 }
 0x215   : > { %v2218_v9 = vmax.f32 %v2216_v37, %v2217_v29  ;;  %v2251_v28 = vsel %vm1052_vm1, %v8180_v57, 4286644096  ;;  %v2264_v16 = vsel %vm1052_vm1, %v8187_v2, 4286644096  ;;  %v2171_v43 = vpack.i.bf16 %v8244_v53, %v8244_v53 }
 0x216   : > { %v2207_v10 = vmax.f32 %v2205_v35, %v2206_v0  ;;  %v2230_v56 = vrot.slane %v2229_v44, 4  ;;  %v2242_v63 = vmax.f32 %v2240_v4, %v2241_v46  ;;  %v2253_v23 = vunpack.i.l.bf16 %v2251_v28 }
 0x217   : > { %v2219_v48 = vrot.slane %v2218_v9, 2  ;;  %v2254_v59 = vunpack.i.h.bf16 %v2251_v28  ;;  %v2266_v25 = vunpack.i.l.bf16 %v2264_v16  ;;  %v8254_v30 = vmax.f32 %v2181_v62, %v2182_v38 }
 0x218   : > { %v2208_v5 = vrot.slane %v2207_v10, 1  ;;  %v2231_v18 = vmax.f32 %v2229_v44, %v2230_v56  ;;  %v2243_v37 = vrot.slane %v2242_v63, 4  ;;  %v2267_v17 = vunpack.i.h.bf16 %v2264_v16 }
 0x219   : > { %v2220_v11 = vmax.f32 %v2218_v9, %v2219_v48  ;;  %v2255_v61 = vmax.f32 %v2253_v23, %v2254_v59  ;;  %v2277_v53 = vsel %vm1052_vm1, %v858_v24, 4286644096  ;;  %v3000_v9 = vsel %vm2718_vm3, %v2106_v58, 4286644096 }
 0x21a   : > { %v2209_v35 = vmax.f32 %v2207_v10, %v2208_v5  ;;  %v2232_v29 = vrot.slane %v2231_v18, 2  ;;  %v2244_v4 = vmax.f32 %v2242_v63, %v2243_v37  ;;  %v2279_v0 = vunpack.i.l.bf16 %v2277_v53 }
 0x21b   : > { %v2221_v46 = vrot.slane %v2220_v11, 1  ;;  %v2256_v28 = vrot.slane %v2255_v61, 4  ;;  %v2268_v33 = vmax.f32 %v2266_v25, %v2267_v17  ;;  %v2280_v62 = vunpack.i.h.bf16 %v2277_v53 }
 0x21c   : > { %v2210_v38 = vpack.i.bf16 %v2209_v35, %v2209_v35  ;;  %v2233_v34 = vmax.f32 %v2231_v18, %v2232_v29  ;;  %v2245_v44 = vrot.slane %v2244_v4, 2  ;;  %v3007_v23 = vsel %vm2718_vm3, %v2119_v31, 4286644096 }
 0x21d   : > { %v2222_v16 = vmax.f32 %v2220_v11, %v2221_v46  ;;  %v2257_v57 = vmax.f32 %v2255_v61, %v2256_v28  ;;  %v2269_v56 = vrot.slane %v2268_v33, 4  ;;  %v2281_v24 = vmax.f32 %v2279_v0, %v2280_v62 }
 0x21e   : > { %v2234_v10 = vrot.slane %v2233_v34, 1  ;;  %v2246_v48 = vmax.f32 %v2244_v4, %v2245_v44  ;;  %v3003_v63 = vsel %vm2718_vm3, %v2210_v38, 4286644096  ;;  %v2184_v8 = vpack.i.bf16 %v8254_v30, %v8254_v30  ;;  %v3194_v30 = vld [vmem:[#allocation2 + $0x30] sm:$0x1] }
 0x21f   : > { %v2223_v59 = vpack.i.bf16 %v2222_v16, %v2222_v16  ;;  %v2258_v25 = vrot.slane %v2257_v57, 2  ;;  %v2270_v5 = vmax.f32 %v2268_v33, %v2269_v56  ;;  %v2282_v18 = vrot.slane %v2281_v24, 4 }
 0x220   : > { %v2235_v58 = vmax.f32 %v2233_v34, %v2234_v10  ;;  %v2247_v37 = vrot.slane %v2246_v48, 1  ;;  %v3005_v11 = vmax.bf16 %v3003_v63, %v3000_v9  ;;  %v3014_v33 = vsel %vm2718_vm3, %v2132_v36, 4286644096 }
 0x221   : > { %v2259_v61 = vmax.f32 %v2257_v57, %v2258_v25  ;;  %v2271_v17 = vrot.slane %v2270_v5, 2  ;;  %v2283_v53 = vmax.f32 %v2281_v24, %v2282_v18  ;;  %v3010_v35 = vsel %vm2718_vm3, %v2223_v59, 4286644096 }
 0x222   : > { %v2236_v29 = vpack.i.bf16 %v2235_v58, %v2235_v58  ;;  %v2248_v4 = vmax.f32 %v2246_v48, %v2247_v37  ;;  %v3012_v21 = vmax.bf16 %v3010_v35, %v3007_v23  ;;  %v3021_v34 = vsel %vm2718_vm3, %v2145_v39, 4286644096  ;;  %v8291_v58 = vld [vmem:[#allocation2 + $0x28] sm:$0xf] }
 0x223   : > { %v2260_v31 = vrot.slane %v2259_v61, 1  ;;  %v2272_v0 = vmax.f32 %v2270_v5, %v2271_v17  ;;  %v2284_v46 = vrot.slane %v2283_v53, 2  ;;  %v3028_v38 = vsel %vm2718_vm3, %v2158_v1, 4286644096 }
 0x224   : > { %v2249_v28 = vpack.i.bf16 %v2248_v4, %v2248_v4  ;;  %v3017_v62 = vsel %vm2718_vm3, %v2236_v29, 4286644096  ;;  %v3035_v7 = vsel %vm2718_vm3, %v2171_v43, 4286644096  ;;  %v3195_v15 = vsel %vm6883_vm2, 0, %v3194_v30 }
 0x225   : > { %v2261_v36 = vmax.f32 %v2259_v61, %v2260_v31  ;;  %v2273_v44 = vrot.slane %v2272_v0, 1  ;;  %v2285_v9 = vmax.f32 %v2283_v53, %v2284_v46  ;;  %v3019_v16 = vmax.bf16 %v3017_v62, %v3014_v33  ;;  %3196 = vst [vmem:[#allocation2 + $0x30] sm:$0x1] %v3195_v15  ;;  %v8298_v31 = vld [vmem:[#allocation2 + $0x40] sm:$0xf] }
 0x226   : > { %v3024_v57 = vsel %vm2718_vm3, %v2249_v28, 4286644096  ;;  %v6115_v39 = vcombine.low %v3005_v11, %v3005_v11  ;;  %v6116_v56 = vcombine.low %v3012_v21, %v3012_v21  ;;  %v3042_v51 = vsel %vm2718_vm3, %v2184_v8, 4286644096 }
 0x227   : > { %v2262_v24 = vpack.i.bf16 %v2261_v36, %v2261_v36  ;;  %v2274_v10 = vmax.f32 %v2272_v0, %v2273_v44  ;;  %v2286_v48 = vrot.slane %v2285_v9, 1  ;;  %v3026_v63 = vmax.bf16 %v3024_v57, %v3021_v34  ;;  %v8322_v57 = vld [vmem:[#allocation2 + $0x38] sm:$0xf] }
 0x228   : > { %v6117_v1 = vcombine.low %v3019_v16, %v3019_v16  ;;  %v3470_v43 = vunpack.c.l.b16 %v6115_v39  ;;  %v3471_v23 = vunpack.c.l.b16 %v6116_v56  ;;  %v3894_v17 = vshrl.u32 %v8291_v58, 16 }
 0x229   : > { %v2275_v59 = vpack.i.bf16 %v2274_v10, %v2274_v10  ;;  %v2287_v25 = vmax.f32 %v2285_v9, %v2286_v48  ;;  %v3031_v5 = vsel %vm2718_vm3, %v2262_v24, 4286644096  ;;  %v6118_v18 = vcombine.low %v3026_v63, %v3026_v63 }
 0x22a   : > { %v3033_v37 = vmax.bf16 %v3031_v5, %v3028_v38  ;;  %v3472_v11 = vunpack.c.l.b16 %v6117_v1  ;;  %v3530_v61 = vsel %vm3494_vm4, %v3471_v23, %v3470_v43  ;;  %v3897_v29 = vshll.u32 %v8291_v58, 16 }
 0x22b   : > { %v2288_v53 = vpack.i.bf16 %v2287_v25, %v2287_v25  ;;  %v3038_v35 = vsel %vm2718_vm3, %v2275_v59, 4286644096  ;;  %v3473_v8 = vunpack.c.l.b16 %v6118_v18  ;;  %v9757_v0 = vshll.u32 %v8200_v55, 16 }
 0x22c   : > { %v3040_v4 = vmax.bf16 %v3038_v35, %v3035_v7  ;;  %v6119_v21 = vcombine.low %v3033_v37, %v3033_v37  ;;  %v3531_v33 = vsel %vm3496_vm5, %v3472_v11, %v3530_v61  ;;  %v9656_v28 = vmov 0   ;;  %v3613_v5 = vld [vmem:[#allocation2 + $0x30] sm:$0xf] }
 0x22d   : > { %v8302_v46 = vrot.slane %v9757_v0, 5  ;;  %v3045_v34 = vsel %vm2718_vm3, %v2288_v53, 4286644096  ;;  %v3532_v30 = vsel %vm3498_vm6, %v3473_v8, %v3531_v33  ;;  %3171 = vst.msk [vmem:[#allocation2 + $0x48] sm:$0xf] %vm3167_vm9, %v9656_v28  ;;  %v4107_v62 = vshrl.u32 %v8298_v31, 16 }
 0x22e   : > { %3168 = vst.msk [vmem:[#allocation2] sm:$0xf] %vm3167_vm9, %v9656_v28  ;;  %v3047_v55 = vmax.bf16 %v3045_v34, %v3042_v51  ;;  %v6120_v38 = vcombine.low %v3040_v4, %v3040_v4  ;;  %v3474_v7 = vunpack.c.l.b16 %v6119_v21  ;;  %v4110_v36 = vshll.u32 %v8298_v31, 16  ;;  %v3214_v33 = vld [vmem:[#allocation2 + $0x14] sm:$0x1] }
 0x22f   : > { %3169 = vst.msk [vmem:[#allocation2 + $0x4] sm:$0x1] %vm1052_vm1, %v9656_v28  ;;  %3172 = vst.msk [vmem:[#allocation2 + $0x4c] sm:$0x1] %vm1052_vm1, %v9656_v28  ;;  %v8316_v44 = vrot.slane %v3894_v17, 4  ;;  %v8318_v9 = vrot.slane %v3897_v29, 5  ;;  %v379_v15 = vcombine.high %v7285_v52, %v7285_v52  ;;  %v427_v51 = vcombine.high %v7305_v40, %v7305_v40 }
 0x230   : > { %v8320_v16 = vrot.slane %v4107_v62, 4  ;;  %v6121_v39 = vcombine.low %v3047_v55, %v3047_v55  ;;  %v3475_v56 = vunpack.c.l.b16 %v6120_v38  ;;  %v3533_v24 = vsel %vm3500_vm7, %v3474_v7, %v3532_v30  ;;  %v3211_v17 = vld [vmem:[#allocation2 + $0xc] sm:$0x1] }
 0x231   : > { %v4093_v10 = vshrl.u32 %v8322_v57, 16  ;;  %v8328_v48 = vrot.slane %v4110_v36, 5  ;;  %v4096_v63 = vshll.u32 %v8322_v57, 16  ;;  %v475_v1 = vcombine.high %v7320_v26, %v7320_v26 }
 0x232   : > { %9758 = vst [vmem:[#allocation25_spill] sm:$0xff] %v8320_v16  ;;  %v3476_v43 = vunpack.c.l.b16 %v6121_v39  ;;  %v3534_v23 = vsel %vm3502_vm8, %v3475_v56, %v3533_v24  ;;  %v9760_v52 = vcombine.high %v7258_v14, %v7258_v14  ;;  %v1250_v25 = vsel %vm1052_vm1, %v379_v15, 4286644096  ;;  %v9790_v16 = vld [vmem:[#allocation15_spill] sm:$0xff] }
 0x233   : > { %9759 = vst [vmem:[#allocation26_spill] sm:$0xff] %v8328_v48  ;;  %v1252_v11 = vunpack.i.l.bf16 %v1250_v25  ;;  %v1253_v61 = vunpack.i.h.bf16 %v1250_v25  ;;  %v1354_v14 = vsel %vm1052_vm1, %v427_v51, 4286644096  ;;  %v1458_v35 = vsel %vm1052_vm1, %v475_v1, 4286644096 }
 0x234   : > { %v1146_v59 = vsel %vm1052_vm1, %v9760_v52, 4286644096  ;;  %v3535_v26 = vsel %vm3504_vm11, %v3476_v43, %v3534_v23  ;;  %v3203_v53 = vld [vmem:[#allocation2 + $0x48] sm:$0x1]  ;;  %v1356_v0 = vunpack.i.l.bf16 %v1354_v14  ;;  %v1357_v34 = vunpack.i.h.bf16 %v1354_v14  ;;  %v8360_v1 = vld [vmem:[#allocation2 + $0x8] sm:$0xe] }
 0x235   : > { %v1148_v18 = vunpack.i.l.bf16 %v1146_v59  ;;  %v1149_v37 = vunpack.i.h.bf16 %v1146_v59  ;;  %v3558_v8 = vpack.c.b16 %v3535_v26, %v3535_v26  ;;  %v3204_v29 = vsel %vm6883_vm2, 0, %v3203_v53  ;;  %v3176_v15 = vld [vmem:[#allocation2] sm:$0x1]  ;;  %v8364_v59 = vld [vmem:[#allocation2 + $0x10] sm:$0xe] }
 0x236   : > { %v1254_v21 = vmax.f32 %v1252_v11, %v1253_v61  ;;  %3205 = vst [vmem:[#allocation2 + $0x48] sm:$0x1] %v3204_v29  ;;  %v1460_v30 = vunpack.i.l.bf16 %v1458_v35  ;;  %v1461_v62 = vunpack.i.h.bf16 %v1458_v35  ;;  %v3212_v36 = vsel %vm8343_vm13, 0, %v3211_v17  ;;  %v3208_v43 = vld [vmem:[#allocation2 + $0x4] sm:$0x1] }
 0x237   : > { %v1150_v4 = vmax.f32 %v1148_v18, %v1149_v37  ;;  %v3614_v55 = vsel %vm7253_vm12, %v3558_v8, %v3613_v5  ;;  %v8356_v39 = vrot.slane %v4093_v10, 4  ;;  %v1358_v56 = vmax.f32 %v1356_v0, %v1357_v34  ;;  %3213 = vst [vmem:[#allocation2 + $0xc] sm:$0x1] %v3212_v36  ;;  %v8366_v25 = vld [vmem:[#allocation2] sm:$0xe] }
 0x238   : > { %v1255_v7 = vrot.slane %v1254_v21, 4  ;;  %3615 = vst [vmem:[#allocation2 + $0x30] sm:$0xf] %v3614_v55  ;;  %v1462_v24 = vmax.f32 %v1460_v30, %v1461_v62  ;;  %v3215_v51 = vsel %vm8343_vm13, 0, %v3214_v33  ;;  %v8362_v41 = vrot.slane %v4096_v63, 5 }
 0x239   : > { %v1151_v38 = vrot.slane %v1150_v4, 4  ;;  %9763 = vst [vmem:[#allocation27_spill] sm:$0xff] %v8356_v39  ;;  %3216 = vst [vmem:[#allocation2 + $0x14] sm:$0x1] %v3215_v51  ;;  %v523_v10 = vcombine.high %v6903_v22, %v6903_v22  ;;  %v1359_v5 = vrot.slane %v1358_v56, 4  ;;  %vm3787_vm15 = vcmask 1046532  }
 0x23a   : > { %9764 = vst [vmem:[#allocation28_spill] sm:$0xff] %v8362_v41  ;;  %v1256_v52 = vmax.f32 %v1254_v21, %v1255_v7  ;;  %v1463_v18 = vrot.slane %v1462_v24, 4  ;;  %v3177_v37 = vsel %vm6883_vm2, 0, %v3176_v15  ;;  %v3217_v11 = vld [vmem:[#allocation2 + $0x1c] sm:$0x1]  ;;  %v6155_v17 = vrot.slane %v8360_v1, 9  ;;  %vm8414_vm4 = vmor %vm3786_vm14, %vm3787_vm15 }
 0x23b   : > { %v1152_v23 = vmax.f32 %v1150_v4, %v1151_v38  ;;  %3178 = vst [vmem:[#allocation2] sm:$0x1] %v3177_v37  ;;  %v3209_v26 = vsel %vm8343_vm13, 0, %v3208_v43  ;;  %v8375_v53 = vld [vmem:[#allocation2 + $0x8] sm:$0xe]  ;;  %v1360_v14 = vmax.f32 %v1358_v56, %v1359_v5  ;;  %v6147_v8 = vrot.slane %v8366_v25, 9 }
 0x23c   : > { %v1257_v61 = vrot.slane %v1256_v52, 2  ;;  %v1464_v22 = vmax.f32 %v1462_v24, %v1463_v18  ;;  %3210 = vst [vmem:[#allocation2 + $0x4] sm:$0x1] %v3209_v26  ;;  %v1562_v33 = vsel %vm1052_vm1, %v523_v10, 4286644096  ;;  %v3218_v0 = vsel %vm8343_vm13, 0, %v3217_v11 }
 0x23d   : > { %v1153_v63 = vrot.slane %v1152_v23, 2  ;;  %v8379_v29 = vld [vmem:[#allocation2 + $0x48] sm:$0xf]  ;;  %v1361_v62 = vrot.slane %v1360_v14, 2  ;;  %v6148_v55 = vrot.slane %v8375_v53, 9  ;;  %v571_v56 = vcombine.high %v6918_v32, %v6918_v32 }
 0x23e   : > { %v1258_v21 = vmax.f32 %v1256_v52, %v1257_v61  ;;  %v4121_v34 = vshrl.u32 %v8379_v29, 16  ;;  %v6198_v30 = vcombine.low %v8298_v31, %v8379_v29  ;;  %3219 = vst [vmem:[#allocation2 + $0x1c] sm:$0x1] %v3218_v0  ;;  %v1564_v24 = vunpack.i.l.bf16 %v1562_v33  ;;  %v8498_v53 = vld [vmem:[#allocation2 + $0x20] sm:$0xe] }
 0x23f   : > { %v1154_v4 = vmax.f32 %v1152_v23, %v1153_v63  ;;  %v3826_v38 = vld [vmem:[#allocation2 + $0x30] sm:$0xf]  ;;  %v1565_v52 = vunpack.i.h.bf16 %v1562_v33  ;;  %v1362_v26 = vmax.f32 %v1360_v14, %v1361_v62  ;;  %v1465_v33 = vrot.slane %v1464_v22, 2 }
 0x240   : > { %v4010_v7 = vld [vmem:[#allocation2 + $0x30] sm:$0xf]  ;;  %v1259_v15 = vrot.slane %v1258_v21, 1  ;;  %v3908_v51 = vshrl.u32 %v3826_v38, 16  ;;  %v3911_v43 = vshll.u32 %v3826_v38, 16  ;;  %v6185_v23 = vcombine.low %v8291_v58, %v3826_v38  ;;  %4344 = vrot.lane.b32.xlu1 %v6198_v30, %s6650_s20 }
 0x241   : > { %v1155_v36 = vrot.slane %v1154_v4, 1  ;;  %v8392_v31 = vrot.slane %v4121_v34, 4  ;;  %v4079_v10 = vshrl.u32 %v4010_v7, 16  ;;  %v4082_v5 = vshll.u32 %v4010_v7, 16  ;;  %v8399_v63 = vld [vmem:[#allocation2 + $0x10] sm:$0xe] }
 0x242   : > { %v8395_v18 = vrot.slane %v3908_v51, 4  ;;  %4274 = vrot.lane.b32.xlu0 %v6185_v23, %s6649_s18  ;;  %v6197_v32 = vcombine.low %v4010_v7, %v8322_v57  ;;  %v1260_v11 = vmax.f32 %v1258_v21, %v1259_v15  ;;  %v8401_v58 = vrot.slane %v3911_v43, 5  ;;  %v8408_v23 = vld [vmem:[#allocation2 + $0x18] sm:$0xe]  ;;  %v8419_v62 = vld [vmem:[#allocation2 + $0x10] sm:$0xe] }
 0x243   : > { %9765 = vst [vmem:[#allocation29_spill] sm:$0xff] %v8392_v31  ;;  %v1156_v37 = vmax.f32 %v1154_v4, %v1155_v36  ;;  %v8403_v61 = vrot.slane %v4079_v10, 4  ;;  %v8405_v0 = vld [vmem:[#allocation2 + $0x4] sm:$0x1]  ;;  %v1566_v51 = vmax.f32 %v1564_v24, %v1565_v52  ;;  %v8410_v57 = vrot.slane %v4082_v5, 5 }
 0x244   : > { %v1261_v30 = vpack.i.bf16 %v1260_v11, %v1260_v11  ;;  %v3791_v38 = vrot.slane %v8405_v0, 5  ;;  %v1363_v4 = vrot.slane %v1362_v26, 1  ;;  %v1466_v21 = vmax.f32 %v1464_v22, %v1465_v33 }
 0x245   : > { %9766 = vst [vmem:[#allocation30_spill] sm:$0xff] %v8403_v61  ;;  %v1157_v34 = vpack.i.bf16 %v1156_v37, %v1156_v37  ;;  %9767 = vst [vmem:[#allocation31_spill] sm:$0xff] %v8410_v57  ;;  %v1666_v14 = vsel %vm1052_vm1, %v571_v56, 4286644096  ;;  %v1567_v24 = vrot.slane %v1566_v51, 4  ;;  %vm4398_vm7 = vcmask 64512  }
 0x246   : > { %4342 = vrot.lane.b32.xlu0 %v6197_v32, %s6650_s20  ;;  %v2772_v15 = vsel %vm2718_vm3, %v1261_v30, 4286644096  ;;  %v1364_v22 = vmax.f32 %v1362_v26, %v1363_v4  ;;  %v1467_v52 = vrot.slane %v1466_v21, 1  ;;  %v1668_v5 = vunpack.i.l.bf16 %v1666_v14  ;;  %v3586_v37 = vld [vmem:[#allocation2 + $0xc] sm:$0x1] }
 0x247   : > { %v2769_v36 = vsel %vm2718_vm3, %v1157_v34, 4286644096  ;;  %v8427_v11 = vsel %vm8414_vm4, %v6147_v8, %v3791_v38  ;;  %v1568_v56 = vmax.f32 %v1566_v51, %v1567_v24  ;;  %v1669_v33 = vunpack.i.h.bf16 %v1666_v14  ;;  %v8447_v32 = vld [vmem:[#allocation2 + $0x18] sm:$0xe]  ;;  %v3598_v1 = vld [vmem:[#allocation2 + $0x1c] sm:$0x1] }
 0x248   : > { %v2774_v10 = vmax.bf16 %v2772_v15, %v2769_v36  ;;  %v1365_v28 = vpack.i.bf16 %v1364_v22, %v1364_v22  ;;  %v1468_v34 = vmax.f32 %v1466_v21, %v1467_v52  ;;  %v619_v26 = vcombine.high %v6937_v42, %v6937_v42 }
 0x249   : > { %v1569_v35 = vrot.slane %v1568_v56, 2  ;;  %v1670_v43 = vmax.f32 %v1668_v5, %v1669_v33  ;;  %v667_v4 = vcombine.high %v6955_v50, %v6955_v50  ;;  %v715_v51 = vcombine.high %v7646_v54, %v7646_v54 }
 0x24a   : > { %v6297_v25 = vcombine.low %v2774_v10, %v2774_v10  ;;  %v1469_v36 = vpack.i.bf16 %v1468_v34, %v1468_v34  ;;  %v2825_v8 = vsel %vm2718_vm3, %v1365_v28, 4286644096  ;;  %v763_v15 = vcombine.high %v7663_v12, %v7663_v12 }
 0x24b   : > { %v1570_v21 = vmax.f32 %v1568_v56, %v1569_v35  ;;  %v1671_v14 = vrot.slane %v1670_v43, 4  ;;  %v1770_v42 = vsel %vm1052_vm1, %v619_v26, 4286644096  ;;  %v1874_v28 = vsel %vm1052_vm1, %v667_v4, 4286644096 }
 0x24c   : > { %v3587_v38 = vsel %vm6883_vm2, %v6297_v25, %v3586_v37  ;;  %v2828_v24 = vsel %vm2718_vm3, %v1469_v36, 4286644096  ;;  %v1772_v50 = vunpack.i.l.bf16 %v1770_v42  ;;  %v1773_v22 = vunpack.i.h.bf16 %v1770_v42  ;;  %v3592_v37 = vld [vmem:[#allocation2 + $0x14] sm:$0x1]  ;;  %v3220_v36 = vld [vmem:[#allocation2 + $0x24] sm:$0x1] }
 0x24d   : > { %3588 = vst [vmem:[#allocation2 + $0xc] sm:$0x1] %v3587_v38  ;;  %v2830_v52 = vmax.bf16 %v2828_v24, %v2825_v8  ;;  %v1571_v10 = vrot.slane %v1570_v21, 1  ;;  %v1672_v25 = vmax.f32 %v1670_v43, %v1671_v14  ;;  %v1876_v5 = vunpack.i.l.bf16 %v1874_v28 }
 0x24e   : > { %v1774_v54 = vmax.f32 %v1772_v50, %v1773_v22  ;;  %v1877_v33 = vunpack.i.h.bf16 %v1874_v28  ;;  %v1978_v35 = vsel %vm1052_vm1, %v715_v51, 4286644096  ;;  %v2082_v56 = vsel %vm1052_vm1, %v763_v15, 4286644096  ;;  %v3223_v51 = vld [vmem:[#allocation2 + $0x2c] sm:$0x1] }
 0x24f   : > { %v6298_v12 = vcombine.low %v2830_v52, %v2830_v52  ;;  %v1572_v34 = vmax.f32 %v1570_v21, %v1571_v10  ;;  %v1673_v26 = vrot.slane %v1672_v25, 2  ;;  %v1980_v38 = vunpack.i.l.bf16 %v1978_v35 }
 0x250   : > { %v1775_v42 = vrot.slane %v1774_v54, 4  ;;  %v1878_v4 = vmax.f32 %v1876_v5, %v1877_v33  ;;  %v1981_v8 = vunpack.i.h.bf16 %v1978_v35  ;;  %v2084_v24 = vunpack.i.l.bf16 %v2082_v56 }
 0x251   : > { %v3593_v43 = vsel %vm6883_vm2, %v6298_v12, %v3592_v37  ;;  %v1573_v14 = vpack.i.bf16 %v1572_v34, %v1572_v34  ;;  %v1674_v50 = vmax.f32 %v1672_v25, %v1673_v26  ;;  %v2085_v22 = vunpack.i.h.bf16 %v2082_v56 }
 0x252   : > { %3594 = vst [vmem:[#allocation2 + $0x14] sm:$0x1] %v3593_v43  ;;  %v1776_v28 = vmax.f32 %v1774_v54, %v1775_v42  ;;  %v1879_v52 = vrot.slane %v1878_v4, 4  ;;  %v1982_v10 = vmax.f32 %v1980_v38, %v1981_v8  ;;  %v3221_v5 = vsel %vm8343_vm13, 0, %v3220_v36  ;;  %v8460_v43 = vld [vmem:[#allocation2 + $0x20] sm:$0xe] }
 0x253   : > { %v1675_v37 = vrot.slane %v1674_v50, 1  ;;  %3222 = vst [vmem:[#allocation2 + $0x24] sm:$0x1] %v3221_v5  ;;  %v2086_v26 = vmax.f32 %v2084_v24, %v2085_v22  ;;  %v8462_v54 = vld [vmem:[#allocation2 + $0x28] sm:$0xe]  ;;  %v3224_v8 = vsel %vm8343_vm13, 0, %v3223_v51 }
 0x254   : > { %v8451_v15 = vld [vmem:[#allocation2 + $0xc] sm:$0x1]  ;;  %v1777_v56 = vrot.slane %v1776_v28, 2  ;;  %v1880_v12 = vmax.f32 %v1878_v4, %v1879_v52  ;;  %v1983_v34 = vrot.slane %v1982_v10, 4  ;;  %v2881_v42 = vsel %vm2718_vm3, %v1573_v14, 4286644096 }
 0x255   : > { %v8453_v21 = vld [vmem:[#allocation2 + $0xc] sm:$0x1]  ;;  %v3975_v33 = vrot.slane %v8451_v15, 5  ;;  %v1676_v36 = vmax.f32 %v1674_v50, %v1675_v37  ;;  %v8471_v5 = vld [vmem:[#allocation2 + $0x18] sm:$0xe]  ;;  %v2087_v30 = vrot.slane %v2086_v26, 4 }
 0x256   : > { %v3795_v35 = vrot.slane %v8453_v21, 5  ;;  %v1778_v24 = vmax.f32 %v1776_v28, %v1777_v56  ;;  %v1881_v22 = vrot.slane %v1880_v12, 2  ;;  %v1984_v52 = vmax.f32 %v1982_v10, %v1983_v34  ;;  %3225 = vst [vmem:[#allocation2 + $0x2c] sm:$0x1] %v3224_v8 }
 0x257   : > { %v1677_v25 = vpack.i.bf16 %v1676_v36, %v1676_v36  ;;  %v2088_v56 = vmax.f32 %v2086_v26, %v2087_v30  ;;  %v811_v34 = vcombine.high %v8171_v20, %v8171_v20  ;;  %vm3648_vm5 = vsmask.f32 7440 }
 0x258   : > { %v3796_v38 = vsel %vm8414_vm4, %v6148_v55, %v3795_v35  ;;  %v1779_v14 = vrot.slane %v1778_v24, 1  ;;  %v1882_v50 = vmax.f32 %v1880_v12, %v1881_v22  ;;  %v1985_v51 = vrot.slane %v1984_v52, 2 }
 0x259   : > { %v6179_v4 = vcombine.low %v8427_v11, %v3796_v38  ;;  %v8478_v37 = vld [vmem:[#allocation2 + $0x14] sm:$0x1]  ;;  %v3976_v11 = vsel %vm8414_vm4, %v6155_v17, %v3975_v33  ;;  %v2884_v28 = vsel %vm2718_vm3, %v1677_v25, 4286644096  ;;  %v2089_v25 = vrot.slane %v2088_v56, 2 }
 0x25a   : > { %v8485_v10 = vld [vmem:[#allocation2 + $0x14] sm:$0x1]  ;;  %v3979_v12 = vrot.slane %v8478_v37, 5  ;;  %v2886_v38 = vmax.bf16 %v2884_v28, %v2881_v42  ;;  %v1883_v17 = vrot.slane %v1882_v50, 1  ;;  %v1986_v33 = vmax.f32 %v1984_v52, %v1985_v51  ;;  %v8500_v42 = vld [vmem:[#allocation2 + $0x20] sm:$0xe] }
 0x25b   : > { %4242 = vrot.lane.b32.xlu1 %v6179_v4, %s6652_s7  ;;  %v4160_v36 = vrot.slane %v8485_v10, 5  ;;  %v8491_v8 = vld [vmem:[#allocation2 + $0x14] sm:$0x1]  ;;  %v1780_v4 = vmax.f32 %v1778_v24, %v1779_v14  ;;  %v9770_v55 = vrot.slane %v8364_v59, 9  ;;  %v859_v24 = vcombine.high %v8187_v2, %v8187_v2 }
 0x25c   : > { %v3799_v22 = vrot.slane %v8491_v8, 5  ;;  %v6299_v20 = vcombine.low %v2886_v38, %v2886_v38  ;;  %v9771_v28 = vrot.slane %v8399_v63, 9  ;;  %v1884_v59 = vmax.f32 %v1882_v50, %v1883_v17 }
 0x25d   : > { %v3980_v30 = vsel %vm8414_vm4, %v9770_v55, %v3979_v12  ;;  %v1781_v26 = vpack.i.bf16 %v1780_v4, %v1780_v4  ;;  %v1987_v51 = vrot.slane %v1986_v33, 1  ;;  %v9772_v12 = vrot.slane %v8419_v62, 9 }
 0x25e   : > { %v6191_v14 = vcombine.low %v3976_v11, %v3980_v30  ;;  %v8508_v52 = vsel %vm8414_vm4, %v9771_v28, %v4160_v36  ;;  %v3599_v55 = vsel %vm6883_vm2, %v6299_v20, %v3598_v1  ;;  %v2090_v4 = vmax.f32 %v2088_v56, %v2089_v25 }
 0x25f   : > { %v8516_v38 = vsel %vm8414_vm4, %v9772_v12, %v3799_v22  ;;  %v2937_v2 = vsel %vm2718_vm3, %v1781_v26, 4286644096  ;;  %3600 = vst [vmem:[#allocation2 + $0x1c] sm:$0x1] %v3599_v55  ;;  %v1885_v63 = vpack.i.bf16 %v1884_v59, %v1884_v59  ;;  %v1988_v11 = vmax.f32 %v1986_v33, %v1987_v51  ;;  %v3226_v59 = vld [vmem:[#allocation2 + $0x34] sm:$0x1] }
 0x260   : > { %4310 = vrot.lane.b32.xlu0 %v6191_v14, %s6653_s8  ;;  %v2091_v1 = vrot.slane %v2090_v4, 1  ;;  %v907_v62 = vcombine.high %v7817_v47, %v7817_v47  ;;  %v955_v22 = vcombine.high %v7834_v19, %v7834_v19  ;;  %v2186_v56 = vsel %vm1052_vm1, %v811_v34, 4286644096  ;;  %v3604_v47 = vld [vmem:[#allocation2 + $0x24] sm:$0x1] }
 0x261   : > { %v1989_v17 = vpack.i.bf16 %v1988_v11, %v1988_v11  ;;  %v2940_v25 = vsel %vm2718_vm3, %v1885_v63, 4286644096  ;;  %v2188_v30 = vunpack.i.l.bf16 %v2186_v56  ;;  %v2189_v20 = vunpack.i.h.bf16 %v2186_v56  ;;  %v8531_v63 = vld [vmem:[#allocation2 + $0x28] sm:$0xe] }
 0x262   : > { %v2092_v26 = vmax.f32 %v2090_v4, %v2091_v1  ;;  %v2942_v33 = vmax.bf16 %v2940_v25, %v2937_v2  ;;  %v2290_v14 = vsel %vm1052_vm1, %v859_v24, 4286644096  ;;  %v2394_v28 = vsel %vm1052_vm1, %v907_v62, 4286644096 }
 0x263   : > { %v2993_v51 = vsel %vm2718_vm3, %v1989_v17, 4286644096  ;;  %v2190_v55 = vmax.f32 %v2188_v30, %v2189_v20  ;;  %v2292_v12 = vunpack.i.l.bf16 %v2290_v14  ;;  %v2293_v19 = vunpack.i.h.bf16 %v2290_v14 }
 0x264   : > { %v2093_v36 = vpack.i.bf16 %v2092_v26, %v2092_v26  ;;  %v6300_v34 = vcombine.low %v2942_v33, %v2942_v33  ;;  %v2396_v11 = vunpack.i.l.bf16 %v2394_v28  ;;  %v2397_v50 = vunpack.i.h.bf16 %v2394_v28 }
 0x265   : > { %v2191_v56 = vrot.slane %v2190_v55, 4  ;;  %v2294_v4 = vmax.f32 %v2292_v12, %v2293_v19  ;;  %v2498_v2 = vsel %vm1052_vm1, %v955_v22, 4286644096  ;;  %v3227_v24 = vsel %vm8343_vm13, 0, %v3226_v59  ;;  %v3229_v59 = vld [vmem:[#allocation2 + $0x3c] sm:$0x1] }
 0x266   : > { %v8536_v1 = vld [vmem:[#allocation2 + $0x1c] sm:$0x1]  ;;  %v2996_v17 = vsel %vm2718_vm3, %v2093_v36, 4286644096  ;;  %v3605_v25 = vsel %vm6883_vm2, %v6300_v34, %v3604_v47  ;;  %v2398_v30 = vmax.f32 %v2396_v11, %v2397_v50  ;;  %v2500_v20 = vunpack.i.l.bf16 %v2498_v2  ;;  %3228 = vst [vmem:[#allocation2 + $0x34] sm:$0x1] %v3227_v24 }
 0x267   : > { %v8538_v62 = vld [vmem:[#allocation2 + $0x1c] sm:$0x1]  ;;  %v4164_v26 = vrot.slane %v8536_v1, 5  ;;  %v2998_v22 = vmax.bf16 %v2996_v17, %v2993_v51  ;;  %3606 = vst [vmem:[#allocation2 + $0x24] sm:$0x1] %v3605_v25  ;;  %v2192_v28 = vmax.f32 %v2190_v55, %v2191_v56  ;;  %v2295_v36 = vrot.slane %v2294_v4, 4 }
 0x268   : > { %v3803_v33 = vrot.slane %v8538_v62, 5  ;;  %v8545_v14 = vld [vmem:[#allocation2 + $0x1c] sm:$0x1]  ;;  %v3610_v12 = vld [vmem:[#allocation2 + $0x2c] sm:$0x1]  ;;  %v2399_v35 = vrot.slane %v2398_v30, 4  ;;  %v2501_v31 = vunpack.i.h.bf16 %v2498_v2 }
 0x269   : > { %v9773_v50 = vrot.slane %v8408_v23, 9  ;;  %v9774_v34 = vrot.slane %v8447_v32, 9  ;;  %v6301_v11 = vcombine.low %v2998_v22, %v2998_v22  ;;  %v2193_v24 = vrot.slane %v2192_v28, 2  ;;  %v8556_v55 = vld [vmem:[#allocation2 + $0x30] sm:$0xe] }
 0x26a   : > { %v8558_v56 = vld [vmem:[#allocation2 + $0x38] sm:$0xe]  ;;  %v3983_v23 = vrot.slane %v8545_v14, 5  ;;  %v2296_v25 = vmax.f32 %v2294_v4, %v2295_v36  ;;  %v8563_v19 = vld [vmem:[#allocation2 + $0x28] sm:$0xe]  ;;  %v2502_v22 = vmax.f32 %v2500_v20, %v2501_v31  ;;  %v1003_v4 = vcombine.high %v7852_v60, %v7852_v60 }
 0x26b   : > { %v4165_v47 = vsel %vm8414_vm4, %v9773_v50, %v4164_v26  ;;  %v3804_v51 = vsel %vm8414_vm4, %v9774_v34, %v3803_v33  ;;  %v3611_v32 = vsel %vm6883_vm2, %v6301_v11, %v3610_v12  ;;  %v2194_v26 = vmax.f32 %v2192_v28, %v2193_v24 }
 0x26c   : > { %v6203_v17 = vcombine.low %v8508_v52, %v4165_v47  ;;  %v6180_v2 = vcombine.low %v8516_v38, %v3804_v51  ;;  %v2400_v33 = vmax.f32 %v2398_v30, %v2399_v35  ;;  %3612 = vst [vmem:[#allocation2 + $0x2c] sm:$0x1] %v3611_v32  ;;  %v2297_v52 = vrot.slane %v2296_v25, 2  ;;  %v8573_v35 = vld [vmem:[#allocation2 + $0x30] sm:$0xe] }
 0x26d   : > { %v3230_v38 = vsel %vm8343_vm13, 0, %v3229_v59  ;;  %v2195_v50 = vrot.slane %v2194_v26, 1  ;;  %v2503_v12 = vrot.slane %v2502_v22, 4  ;;  %v9775_v28 = vrot.slane %v8471_v5, 9  ;;  %v3616_v61 = vld [vmem:[#allocation2 + $0x34] sm:$0x1] }
 0x26e   : > { %4378 = vrot.lane.b32.xlu0 %v6203_v17, %s6654_s24  ;;  %4244 = vrot.lane.b32.xlu1 %v6180_v2, %s6652_s7  ;;  %v2401_v47 = vrot.slane %v2400_v33, 2  ;;  %3231 = vst [vmem:[#allocation2 + $0x3c] sm:$0x1] %v3230_v38  ;;  %v8576_v30 = vld [vmem:[#allocation2 + $0x24] sm:$0x1]  ;;  %v2298_v51 = vmax.f32 %v2296_v25, %v2297_v52  ;;  %v9776_v5 = vrot.slane %v8498_v53, 9 }
 0x26f   : > { %v8578_v20 = vld [vmem:[#allocation2 + $0x24] sm:$0x1]  ;;  %v3984_v59 = vsel %vm8414_vm4, %v9775_v28, %v3983_v23  ;;  %v4168_v11 = vrot.slane %v8576_v30, 5  ;;  %v2196_v2 = vmax.f32 %v2194_v26, %v2195_v50  ;;  %v2504_v36 = vmax.f32 %v2502_v22, %v2503_v12  ;;  %v9777_v52 = vld [vmem:[#allocation24_spill] sm:$0xff]  ;;  %v9785_v25 = vld [vmem:[#allocation21_spill] sm:$0xff] }
 0x270   : > { %v8584_v34 = vld [vmem:[#allocation2 + $0x24] sm:$0x1]  ;;  %v3987_v24 = vrot.slane %v8578_v20, 5  ;;  %v2299_v32 = vrot.slane %v2298_v51, 1  ;;  %v2402_v38 = vmax.f32 %v2400_v33, %v2401_v47  ;;  %v1051_v31 = vcombine.high %v9777_v52, %v9777_v52 }
 0x271   : > { %v3807_v17 = vrot.slane %v8584_v34, 5  ;;  %v2197_v28 = vpack.i.bf16 %v2196_v2, %v2196_v2  ;;  %v2505_v50 = vrot.slane %v2504_v36, 2  ;;  %v9778_v22 = vrot.slane %v8460_v43, 9  ;;  %v8631_v2 = vld [vmem:[#allocation2 + $0x38] sm:$0xe] }
 0x272   : > { %v3988_v23 = vsel %vm8414_vm4, %v9776_v5, %v3987_v24  ;;  %v2300_v39 = vmax.f32 %v2298_v51, %v2299_v32  ;;  %v2403_v26 = vrot.slane %v2402_v38, 1  ;;  %v9779_v47 = vrot.slane %v8500_v42, 9  ;;  %v9781_v51 = vld [vmem:[#allocation19_spill] sm:$0xff] }
 0x273   : > { %v6192_v41 = vcombine.low %v3984_v59, %v3988_v23  ;;  %v8598_v33 = vld [vmem:[#allocation2 + $0x2c] sm:$0x1]  ;;  %v4169_v60 = vsel %vm8414_vm4, %v9778_v22, %v4168_v11  ;;  %v3049_v24 = vsel %vm2718_vm3, %v2197_v28, 4286644096  ;;  %v9780_v59 = vld [vmem:[#allocation18_spill] sm:$0xff]  ;;  %v2506_v23 = vmax.f32 %v2504_v36, %v2505_v50 }
 0x274   : > { %v8604_v53 = vld [vmem:[#allocation2 + $0x2c] sm:$0x1]  ;;  %v3808_v12 = vsel %vm8414_vm4, %v9779_v47, %v3807_v17  ;;  %v4172_v32 = vrot.slane %v8598_v33, 5  ;;  %v2301_v5 = vpack.i.bf16 %v2300_v39, %v2300_v39  ;;  %v2404_v11 = vmax.f32 %v2402_v38, %v2403_v26 }
 0x275   : > { %4312 = vrot.lane.b32.xlu1 %v6192_v41, %s6653_s8  ;;  %v3811_v43 = vrot.slane %v8604_v53, 5  ;;  %v8616_v52 = vld [vmem:[#allocation2 + $0x2c] sm:$0x1]  ;;  %v2602_v42 = vsel %vm1052_vm1, %v1003_v4, 4286644096  ;;  %v9782_v22 = vrot.slane %v8462_v54, 9 }
 0x276   : > { %v2706_v17 = vsel %vm1052_vm1, %v1051_v31, 4286644096  ;;  %v9783_v41 = vrot.slane %v8531_v63, 9  ;;  %v2405_v36 = vpack.i.bf16 %v2404_v11, %v2404_v11  ;;  %v3052_v38 = vsel %vm2718_vm3, %v2301_v5, 4286644096  ;;  %v9784_v28 = vld [vmem:[#allocation20_spill] sm:$0xff] }
 0x277   : > { %v4173_v47 = vsel %vm8414_vm4, %v9782_v22, %v4172_v32  ;;  %v2507_v4 = vrot.slane %v2506_v23, 1  ;;  %v3054_v50 = vmax.bf16 %v3052_v38, %v3049_v24  ;;  %v3232_v31 = vld [vmem:[#allocation2 + $0x44] sm:$0x1]  ;;  %v3991_v32 = vrot.slane %v8616_v52, 5  ;;  %v9789_v38 = vld [vmem:[#allocation14_spill] sm:$0xff] }
 0x278   : > { %v3812_v39 = vsel %vm8414_vm4, %v9783_v41, %v3811_v43  ;;  %v6204_v26 = vcombine.low %v4169_v60, %v4173_v47  ;;  %v2604_v63 = vunpack.i.l.bf16 %v2602_v42  ;;  %v2605_v22 = vunpack.i.h.bf16 %v2602_v42 }
 0x279   : > { %v6181_v57 = vcombine.low %v3808_v12, %v3812_v39  ;;  %v2508_v43 = vmax.f32 %v2506_v23, %v2507_v4  ;;  %v6302_v11 = vcombine.low %v3054_v50, %v3054_v50  ;;  %v2708_v5 = vunpack.i.l.bf16 %v2706_v17  ;;  %v8641_v12 = vld [vmem:[#allocation2] sm:$0xf] }
 0x27a   : > { %4380 = vrot.lane.b32.xlu0 %v6204_v26, %s6654_s24  ;;  %v2709_v60 = vunpack.i.h.bf16 %v2706_v17  ;;  %v3105_v24 = vsel %vm2718_vm3, %v2405_v36, 4286644096  ;;  %v2606_v47 = vmax.f32 %v2604_v63, %v2605_v22  ;;  %v3233_v41 = vsel %vm8343_vm13, 0, %v3232_v31  ;;  %9786 = vst [vmem:[#allocation24_spill] sm:$0xff] %v8641_v12 }
 0x27b   : > { %v2509_v39 = vpack.i.bf16 %v2508_v43, %v2508_v43  ;;  %v3617_v42 = vsel %vm6883_vm2, %v6302_v11, %v3616_v61  ;;  %3234 = vst [vmem:[#allocation2 + $0x44] sm:$0x1] %v3233_v41  ;;  %vm3647_vm1 = vsmask.f32 3328  ;;  %v3875_v17 = vshll.u32 %v8545_v14, 16 }
 0x27c   : > { %v2710_v54 = vmax.f32 %v2708_v5, %v2709_v60  ;;  %3618 = vst [vmem:[#allocation2 + $0x34] sm:$0x1] %v3617_v42  ;;  %v2607_v23 = vrot.slane %v2606_v47, 4  ;;  %v3889_v36 = vshll.u32 %v8578_v20, 16  ;;  %vm8649_vm6 = vmor %vm3647_vm1, %vm3648_vm5  ;;  %v3651_v61 = vshrl.u32 %v8641_v12, 16 }
 0x27d   : > { %v3108_v26 = vsel %vm2718_vm3, %v2509_v39, 4286644096  ;;  %v3654_v31 = vshll.u32 %v8641_v12, 16  ;;  %v3877_v43 = vrot.slane %v3875_v17, 5  ;;  %v8655_v14 = vld [vmem:[#allocation2 + $0x8] sm:$0xf] }
 0x27e   : > { %4246 = vrot.lane.b32.xlu0 %v6181_v57, %s6652_s7  ;;  %v2711_v4 = vrot.slane %v2710_v54, 4  ;;  %v3110_v63 = vmax.bf16 %v3108_v26, %v3105_v24  ;;  %v2608_v22 = vmax.f32 %v2606_v47, %v2607_v23  ;;  %v3891_v11 = vrot.slane %v3889_v36, 5  ;;  %v3622_v20 = vld [vmem:[#allocation2 + $0x3c] sm:$0x1]  ;;  %v8664_v23 = vld [vmem:[#allocation2 + $0x40] sm:$0xe] }
 0x27f   : > { %v3653_v57 = vrot.slane %v3651_v61, 4  ;;  %v3656_v60 = vrot.slane %v3654_v31, 5  ;;  %v3660_v41 = vshll.u32 %v8405_v0, 16  ;;  %v3878_v48 = vsel %vm8649_vm6, %v9789_v38, %v3877_v43 }
 0x280   : > { %v2712_v5 = vmax.f32 %v2710_v54, %v2711_v4  ;;  %v6303_v39 = vcombine.low %v3110_v63, %v3110_v63  ;;  %v2609_v42 = vrot.slane %v2608_v22, 2  ;;  %v3892_v24 = vsel %vm8649_vm6, %v9790_v16, %v3891_v11 }
 0x281   : > { %v8666_v17 = vcombine.low %v3878_v48, %v3892_v24  ;;  %v3657_v54 = vor.u32 %v3656_v60, %v3653_v57  ;;  %v3662_v36 = vrot.slane %v3660_v41, 5  ;;  %v3665_v4 = vshrl.u32 %v8655_v14, 16  ;;  %v8686_v24 = vld [vmem:[#allocation2 + $0x10] sm:$0xf] }
 0x282   : > { %v2713_v47 = vrot.slane %v2712_v5, 2  ;;  %v3623_v0 = vsel %vm6883_vm2, %v6303_v39, %v3622_v20  ;;  %v2610_v26 = vmax.f32 %v2608_v22, %v2609_v42  ;;  %v3668_v61 = vshll.u32 %v8655_v14, 16 }
 0x283   : > { %3624 = vst [vmem:[#allocation2 + $0x3c] sm:$0x1] %v3623_v0  ;;  %v8672_v38 = vld [vmem:[#allocation2 + $0x34] sm:$0x1]  ;;  %v9791_v16 = vrot.slane %v8563_v19, 9  ;;  %v3658_v43 = vrot.slane %v3657_v54, 4  ;;  %v9793_v54 = vor.u32 %v9781_v51, %v9780_v59 }
 0x284   : > { %v8674_v31 = vld [vmem:[#allocation2 + $0x34] sm:$0x1]  ;;  %v2714_v63 = vmax.f32 %v2712_v5, %v2713_v47  ;;  %v3674_v11 = vshll.u32 %v8453_v21, 16  ;;  %v2611_v20 = vrot.slane %v2610_v26, 1  ;;  %v3667_v60 = vrot.slane %v3665_v4, 4 }
 0x285   : > { %v3992_v48 = vsel %vm8414_vm4, %v9791_v16, %v3991_v32  ;;  %v3995_v22 = vrot.slane %v8674_v31, 5  ;;  %v3815_v41 = vrot.slane %v8672_v38, 5  ;;  %v3663_v42 = vsel %vm8649_vm6, %v3658_v43, %v3662_v36 }
 0x286   : > { %v2715_v39 = vrot.slane %v2714_v63, 1  ;;  %v3670_v19 = vrot.slane %v3668_v61, 5  ;;  %v9792_v32 = vrot.slane %v8573_v35, 9  ;;  %v2612_v5 = vmax.f32 %v2610_v26, %v2611_v20  ;;  %v9797_v20 = vld [vmem:[#allocation23_spill] sm:$0xff] }
 0x287   : > { %v3676_v47 = vrot.slane %v3674_v11, 5  ;;  %v4058_v0 = vrot.slane %v9793_v54, 4  ;;  %v4060_v12 = vshll.u32 %v8576_v30, 16  ;;  %v9794_v61 = vor.u32 %v8152_v49, %v8142_v45  ;;  %v8724_v54 = vld [vmem:[#allocation2 + $0x18] sm:$0xf] }
 0x288   : > { %v3996_v21 = vsel %vm8414_vm4, %v9792_v32, %v3995_v22  ;;  %v2716_v16 = vmax.f32 %v2714_v63, %v2715_v39  ;;  %v3671_v57 = vor.u32 %v3670_v19, %v3667_v60  ;;  %v2613_v36 = vpack.i.bf16 %v2612_v5, %v2612_v5 }
 0x289   : > { %v6193_v4 = vcombine.low %v3992_v48, %v3996_v21  ;;  %v4072_v43 = vrot.slane %v9794_v61, 4  ;;  %v4074_v35 = vshll.u32 %v8598_v33, 16  ;;  %v3679_v22 = vshrl.u32 %v8686_v24, 16  ;;  %v9796_v33 = vld [vmem:[#allocation22_spill] sm:$0xff]  ;;  %v3628_v61 = vld [vmem:[#allocation2 + $0x44] sm:$0x1] }
 0x28a   : > { %v2717_v26 = vpack.i.bf16 %v2716_v16, %v2716_v16  ;;  %v3672_v11 = vrot.slane %v3671_v57, 4  ;;  %v4062_v59 = vrot.slane %v4060_v12, 5  ;;  %v3682_v51 = vshll.u32 %v8686_v24, 16  ;;  %v8703_v48 = vld [vmem:[#allocation2 + $0x3c] sm:$0x1] }
 0x28b   : > { %4314 = vrot.lane.b32.xlu0 %v6193_v4, %s6653_s8  ;;  %v9795_v30 = vrot.slane %v8556_v55, 9  ;;  %v3161_v45 = vsel %vm2718_vm3, %v2613_v36, 4286644096  ;;  %v8710_v49 = vld [vmem:[#allocation2 + $0x3c] sm:$0x1]  ;;  %v4043_v60 = vor.u32 %v9797_v20, %v9796_v33  ;;  %v3928_v57 = vor.u32 %v8209_v3, %v8207_v27 }
 0x28c   : > { %v3819_v12 = vrot.slane %v8703_v48, 5  ;;  %v3164_v39 = vsel %vm2718_vm3, %v2717_v26, 4286644096  ;;  %v3677_v55 = vsel %vm8649_vm6, %v3672_v11, %v3676_v47  ;;  %v4063_v21 = vsel %vm8649_vm6, %v4058_v0, %v4062_v59  ;;  %v8726_v4 = vld [vmem:[#allocation2 + $0x20] sm:$0xf] }
 0x28d   : > { %v3816_v63 = vsel %vm8414_vm4, %v9795_v30, %v3815_v41  ;;  %v3942_v41 = vor.u32 %v8302_v46, %v8216_v13  ;;  %v3166_v19 = vmax.bf16 %v3164_v39, %v3161_v45  ;;  %v6175_v32 = vcombine.low %v3663_v42, %v3677_v55  ;;  %v8741_v39 = vld [vmem:[#allocation2 + $0x28] sm:$0xf] }
 0x28e   : > { %v4076_v5 = vrot.slane %v4074_v35, 5  ;;  %v9798_v16 = vrot.slane %v8558_v56, 9  ;;  %v3999_v47 = vrot.slane %v8710_v49, 5  ;;  %v3681_v26 = vrot.slane %v3679_v22, 4 }
 0x28f   : > { %v3684_v11 = vrot.slane %v3682_v51, 5  ;;  %v6304_v42 = vcombine.low %v3166_v19, %v3166_v19  ;;  %4222 = vrot.lane.b32.xlu0 %v6175_v32, %s6655_s27  ;;  %v3688_v35 = vshll.u32 %v8491_v8, 16  ;;  %v3693_v45 = vshrl.u32 %v8724_v54, 16 }
 0x290   : > { %v3820_v36 = vsel %vm8414_vm4, %v9798_v16, %v3819_v12  ;;  %v4077_v0 = vsel %vm8649_vm6, %v4072_v43, %v4076_v5  ;;  %v3696_v12 = vshll.u32 %v8724_v54, 16  ;;  %v3707_v43 = vshrl.u32 %v8726_v4, 16 }
 0x291   : > { %v6182_v30 = vcombine.low %v3816_v63, %v3820_v36  ;;  %v8737_v59 = vcombine.low %v4063_v21, %v4077_v0  ;;  %v3685_v56 = vor.u32 %v3684_v11, %v3681_v26  ;;  %v3629_v22 = vsel %vm6883_vm2, %v6304_v42, %v3628_v61  ;;  %v8754_v11 = vld [vmem:[#allocation2 + $0x30] sm:$0xf] }
 0x292   : > { %v3690_v51 = vrot.slane %v3688_v35, 5  ;;  %v3702_v63 = vshll.u32 %v8538_v62, 16  ;;  %3630 = vst [vmem:[#allocation2 + $0x44] sm:$0x1] %v3629_v22  ;;  %v3695_v55 = vrot.slane %v3693_v45, 4  ;;  %v3698_v19 = vrot.slane %v3696_v12, 5 }
 0x293   : > { %4248 = vrot.lane.b32.xlu1 %v6182_v30, %s6652_s7  ;;  %v3686_v8 = vrot.slane %v3685_v56, 4  ;;  %v3710_v32 = vshll.u32 %v8726_v4, 16  ;;  %v3709_v5 = vrot.slane %v3707_v43, 4  ;;  %v3716_v16 = vshll.u32 %v8584_v34, 16  ;;  %v6457_v56 = vld [vmem:[#allocation7] sm:$0xff]  }
 0x294   : > { %v3704_v21 = vrot.slane %v3702_v63, 5  ;;  %v3721_v36 = vshrl.u32 %v8741_v39, 16  ;;  %v3699_v61 = vor.u32 %v3698_v19, %v3695_v55  ;;  %v3724_v62 = vshll.u32 %v8741_v39, 16  ;;  %6330 = vmatprep.subr.bf16.mxu0 %v6457_v56 }
 0x295   : > { %v3691_v6 = vsel %vm8649_vm6, %v3686_v8, %v3690_v51  ;;  %v3712_v26 = vrot.slane %v3710_v32, 5  ;;  %v8756_v30 = vrot.slane %v3716_v16, 5  ;;  %v3730_v0 = vshll.u32 %v8604_v53, 16  ;;  %v8769_v32 = vld [vmem:[#allocation2 + $0x38] sm:$0xf]  ;;  %6331 = vmatpush3.bf16.msra.mxu0 %v6457_v56  ;;  %v9799_v16 = vld [vmem:[#allocation17_spill] sm:$0xff] }
 0x296   : > { %v3723_v42 = vrot.slane %v3721_v36, 4  ;;  %v3847_v35 = vshll.u32 %v8451_v15, 16  ;;  %v3700_v34 = vrot.slane %v3699_v61, 4  ;;  %v3726_v12 = vrot.slane %v3724_v62, 5 }
 0x297   : > { %v3713_v45 = vor.u32 %v3712_v26, %v3709_v5  ;;  %v3861_v22 = vshll.u32 %v8478_v37, 16  ;;  %v8761_v51 = vrot.slane %v3730_v0, 5  ;;  %v3735_v43 = vshrl.u32 %v8754_v11, 16 }
 0x298   : > { %v3849_v63 = vrot.slane %v3847_v35, 5  ;;  %v3738_v8 = vshll.u32 %v8754_v11, 16  ;;  %v3705_v55 = vsel %vm8649_vm6, %v3700_v34, %v3704_v21  ;;  %v3727_v15 = vor.u32 %v3726_v12, %v3723_v42  ;;  %v9801_v42 = vld [vmem:[#allocation16_spill] sm:$0xff] }
 0x299   : > { %v8767_v53 = vrot.slane %v3713_v45, 4  ;;  %v3863_v19 = vrot.slane %v3861_v22, 5  ;;  %v3836_v5 = vld [vmem:[#allocation2 + $0x44] sm:$0x1]  ;;  %v6176_v37 = vcombine.low %v3691_v6, %v3705_v55  ;;  %v3737_v61 = vrot.slane %v3735_v43, 4  ;;  %v6459_v34 = vld [vmem:[#allocation7 + $0x8] sm:$0xff]  }
 0x29a   : > { %v3850_v36 = vsel %vm8649_vm6, %v9799_v16, %v3849_v63  ;;  %v3740_v26 = vrot.slane %v3738_v8, 5  ;;  %v9800_v62 = vrot.slane %v8631_v2, 9  ;;  %v4003_v0 = vrot.slane %v3836_v5, 5  ;;  %6332 = vmatprep.subr.bf16.mxu0 %v6459_v34  ;;  %v8833_v46 = vld [vmem:[#allocation2 + $0x44] sm:$0x1] }
 0x29b   : > { %v8778_v35 = vrot.slane %v3727_v15, 4  ;;  %v3864_v56 = vsel %vm8649_vm6, %v9801_v42, %v3863_v19  ;;  %4224 = vrot.lane.b32.xlu0 %v6176_v37, %s6655_s27  ;;  %v3744_v12 = vshll.u32 %v8672_v38, 16  ;;  %v3749_v22 = vshrl.u32 %v8769_v32, 16  ;;  %6333 = vmatpush3.bf16.msra.mxu0 %v6459_v34 }
 0x29c   : > { %v4000_v21 = vsel %vm8414_vm4, %v9800_v62, %v3999_v47  ;;  %v6187_v6 = vcombine.low %v3850_v36, %v3864_v56  ;;  %v3741_v45 = vor.u32 %v3740_v26, %v3737_v61  ;;  %v9802_v2 = vrot.slane %v8664_v23, 9 }
 0x29d   : > { %v3752_v63 = vshll.u32 %v8769_v32, 16  ;;  %v3758_v43 = vshll.u32 %v8703_v48, 16  ;;  %v3900_v8 = vor.u32 %v8318_v9, %v8316_v44  ;;  %v3719_v38 = vsel %vm8649_vm6, %v8767_v53, %v8756_v30 }
 0x29e   : > { %v4004_v47 = vsel %vm8414_vm4, %v9802_v2, %v4003_v0  ;;  %v3733_v23 = vsel %vm8649_vm6, %v8778_v35, %v8761_v51  ;;  %v3914_v15 = vor.u32 %v8401_v58, %v8395_v18  ;;  %v8804_v48 = vrot.slane %v3741_v45, 4  ;;  %v9806_v45 = vld [vmem:[#allocation26_spill] sm:$0xff] }
 0x29f   : > { %v6194_v55 = vcombine.low %v4000_v21, %v4004_v47  ;;  %v8806_v19 = vrot.slane %v3744_v12, 5  ;;  %v3751_v44 = vrot.slane %v3749_v22, 4  ;;  %v3754_v9 = vrot.slane %v3752_v63, 5  ;;  %4290 = vrot.lane.b32.xlu0 %v6187_v6, %s6656_s28  ;;  %v4018_v21 = vld [vmem:[#allocation2 + $0x34] sm:$0x1]  ;;  %v9807_v47 = vld [vmem:[#allocation30_spill] sm:$0xff] }
 0x2a0   : > { %v9803_v30 = vor.u32 %v9785_v25, %v9784_v28  ;;  %v4032_v51 = vshll.u32 %v8485_v10, 16  ;;  %v4044_v18 = vrot.slane %v4043_v60, 4  ;;  %v4046_v58 = vshll.u32 %v8536_v1, 16  ;;  %v3235_v60 = vld [vmem:[#allocation2 + $0x4c] sm:$0x1]  ;;  %v9805_v6 = vld [vmem:[#allocation25_spill] sm:$0xff] }
 0x2a1   : > { %4316 = vrot.lane.b32.xlu1 %v6194_v55, %s6653_s8  ;;  %v3755_v37 = vor.u32 %v3754_v9, %v3751_v44  ;;  %v3760_v16 = vrot.slane %v3758_v43, 5  ;;  %v3929_v36 = vrot.slane %v3928_v57, 4  ;;  %v3931_v61 = vshll.u32 %v8710_v49, 16  ;;  %v4019_v22 = vld [vmem:[#allocation2 + $0x3c] sm:$0x1]  ;;  %v9808_v63 = vld [vmem:[#allocation31_spill] sm:$0xff] }
 0x2a2   : > { %v4030_v53 = vrot.slane %v9803_v30, 4  ;;  %v4034_v26 = vrot.slane %v4032_v51, 5  ;;  %v4048_v62 = vrot.slane %v4046_v58, 5  ;;  %v3943_v10 = vrot.slane %v3942_v41, 4  ;;  %v9809_v9 = vld [vmem:[#allocation27_spill] sm:$0xff]  ;;  %v9810_v30 = vld [vmem:[#allocation28_spill] sm:$0xff] }
 0x2a3   : > { %v3945_v25 = vshll.u32 %v3836_v5, 16  ;;  %v3933_v28 = vrot.slane %v3931_v61, 5  ;;  %v3901_v33 = vrot.slane %v3900_v8, 4  ;;  %v3903_v20 = vshll.u32 %v8616_v52, 16  ;;  %s6571_s8 = scalar_lea.vmem %s9589_s4, 1024 }
 0x2a4   : > { %v3915_v1 = vrot.slane %v3914_v15, 4  ;;  %v4035_v27 = vsel %vm8649_vm6, %v4030_v53, %v4034_v26  ;;  %v4049_v3 = vsel %vm8649_vm6, %v4044_v18, %v4048_v62  ;;  %v3917_v13 = vshll.u32 %v8674_v31, 16  ;;  %p6572_p11 = scmp.ne.s32.totalorder %s9589_s4, %s6571_s8 }
 0x2a5   : > { %4292 = vrot.lane.b32.xlu1 %v8666_v17, %s6656_s28  ;;  %v3947_v49 = vrot.slane %v3945_v25, 5  ;;  %v3756_v57 = vrot.slane %v3755_v37, 4  ;;  %v6199_v41 = vcombine.low %v4035_v27, %v4049_v3  ;;  %v3934_v52 = vsel %vm8649_vm6, %v3929_v36, %v3933_v28  ;;  %v4139_v37 = vld [vmem:[#allocation2 + $0x38] sm:$0xe]  ;;  %v4141_v27 = vld [vmem:[#allocation2 + $0x48] sm:$0xe] }
 0x2a6   : > { %v3905_v5 = vrot.slane %v3903_v20, 5  ;;  %v9804_v17 = vshll.u32 %v8379_v29, 16  ;;  %v3919_v42 = vrot.slane %v3917_v13, 5  ;;  %v3236_v56 = vsel %vm8343_vm13, 0, %v3235_v60  ;;  %v9812_v3 = vld [vmem:[#allocation24_spill] sm:$0xff]  ;;  %p6573_p2 = pnand %p6572_p11, %p9862_p0 }
 0x2a7   : > { %v3948_v35 = vsel %vm8649_vm6, %v3943_v10, %v3947_v49  ;;  %4358 = vrot.lane.b32.xlu0 %v6199_v41, %s6657_s22  ;;  %3237 = vst [vmem:[#allocation2 + $0x4c] sm:$0x1] %v3236_v56  ;;  %v4113_v12 = vor.u32 %v9806_v45, %v9805_v6  ;;  %v4116_v29 = vshll.u32 %v8833_v46, 16  ;;  %v6177_v2 = vcombine.low %v3719_v38, %v3733_v23  ;;  %v4138_v38 = vld [vmem:[#allocation2 + $0x30] sm:$0xe] }
 0x2a8   : > { %v4126_v0 = vrot.slane %v9804_v17, 5  ;;  %v6190_v31 = vcombine.low %v3934_v52, %v3948_v35  ;;  %v3906_v34 = vsel %vm8649_vm6, %v3901_v33, %v3905_v5  ;;  %v3920_v40 = vsel %vm8649_vm6, %v3915_v1, %v3919_v42  ;;  %v9811_v23 = vld [vmem:[#allocation29_spill] sm:$0xff]  ;;  %v4140_v10 = vld [vmem:[#allocation2 + $0x40] sm:$0xe]  ;;  %p6574_p3 = pneg %p6573_p2 }
 0x2a9   : > { %4360 = vrot.lane.b32.xlu1 %v8737_v59, %s6657_s22  ;;  %v4085_v43 = vor.u32 %v9808_v63, %v9807_v47  ;;  %v4088_v8 = vshll.u32 %v4018_v21, 16  ;;  %v3747_v55 = vsel %vm8649_vm6, %v8804_v48, %v8806_v19  ;;  %v3761_v15 = vsel %vm8649_vm6, %v3756_v57, %v3760_v16  ;;  %v4273_v63 = vpop.permute.xlu1 %4272 }
 0x2aa   : > { %v6189_v44 = vcombine.low %v3906_v34, %v3920_v40  ;;  %v4099_v59 = vor.u32 %v9810_v30, %v9809_v9  ;;  %v4127_v53 = vor.u32 %v4126_v0, %v9811_v23  ;;  %v4102_v58 = vshll.u32 %v4019_v22, 16 }
 0x2ab   : > { %v4086_v51 = vrot.slane %v4085_v43, 4  ;;  %v4090_v18 = vrot.slane %v4088_v8, 5  ;;  %v4114_v36 = vrot.slane %v4113_v12, 4  ;;  %v4118_v61 = vrot.slane %v4116_v29, 5 }
 0x2ac   : > { %4294 = vrot.lane.b32.xlu0 %v6189_v44, %s6656_s28  ;;  %v4100_v26 = vrot.slane %v4099_v59, 4  ;;  %v6178_v48 = vcombine.low %v3747_v55, %v3761_v15  ;;  %v4104_v16 = vrot.slane %v4102_v58, 5  ;;  %v6167_v62 = vrot.slane %v4138_v38, 9 }
 0x2ad   : > { %4226 = vrot.lane.b32.xlu1 %v6177_v2, %s6655_s27  ;;  %v4091_v19 = vsel %vm8649_vm6, %v4086_v51, %v4090_v18  ;;  %v4176_v25 = vrot.slane %v4018_v21, 5  ;;  %v6168_v28 = vrot.slane %v4139_v37, 9  ;;  %v4180_v33 = vrot.slane %v4019_v22, 5  ;;  %v6461_v21 = vld [vmem:[#allocation7 + $0x10] ss:$0 sps:$4 sm:$0x33]   ;;  %v4271_v2 = vpop.permute.xlu0 %4270  ;;  %v4341_v43 = vpop.permute.xlu1 %4340 }
 0x2ae   : > { %v4021_v20 = vld [vmem:[#allocation2 + $0x4c] sm:$0x1]  ;;  %v4128_v1 = vrot.slane %v4127_v53, 4  ;;  %v4105_v60 = vsel %vm8649_vm6, %v4100_v26, %v4104_v16  ;;  %v6171_v49 = vcombine.low %v9812_v3, %v8655_v14  ;;  %v6172_v13 = vcombine.low %v8686_v24, %v8724_v54 }
 0x2af   : > { %v4119_v57 = vsel %vm8649_vm6, %v4114_v36, %v4118_v61  ;;  %v4130_v41 = vshll.u32 %v4021_v20, 16  ;;  %v6201_v52 = vcombine.low %v4091_v19, %v4105_v60  ;;  %v4177_v5 = vsel %vm8414_vm4, %v6167_v62, %v4176_v25 }
 0x2b0   : > { %v6169_v17 = vrot.slane %v4140_v10, 9  ;;  %v4184_v0 = vrot.slane %v8833_v46, 5  ;;  %v4181_v14 = vsel %vm8414_vm4, %v6168_v28, %v4180_v33  ;;  %v6173_v24 = vcombine.low %v8726_v4, %v8741_v39 }
 0x2b1   : > { %4228 = vrot.lane.b32.xlu1 %v6178_v48, %s6655_s27  ;;  %v4132_v54 = vrot.slane %v4130_v41, 5  ;;  %4362 = vrot.lane.b32.xlu0 %v6201_v52, %s6657_s22  ;;  %v6170_v35 = vrot.slane %v4141_v27, 9  ;;  %v4188_v42 = vrot.slane %v4021_v20, 5  ;;  %v6205_v56 = vcombine.low %v4177_v5, %v4181_v14  ;;  %v4339_v40 = vpop.permute.xlu0 %4338  ;;  %v4277_v55 = vpop.permute.xlu1 %4276 }
 0x2b2   : > { %vm4490_vm2 = vcmask 1041408   ;;  %v6174_v34 = vcombine.low %v8754_v11, %v8769_v32  ;;  %v4185_v12 = vsel %vm8414_vm4, %v6169_v17, %v4184_v0  ;;  %vm4407_vm8 = vcmask 97280  }
 0x2b3   : > { %v4133_v6 = vsel %vm8649_vm6, %v4128_v1, %v4132_v54  ;;  %6362 = vmatprep.subr.msk.bf16.mxu0 %vm4490_vm2, %v6461_v21  ;;  %v4492_v46 = vsel %vm4490_vm2, %v6461_v21, 0  ;;  %v4189_v29 = vsel %vm8414_vm4, %v6170_v35, %v4188_v42  ;;  %vm4416_vm9 = vcmask 130048  }
 0x2b4   : > { %v6202_v45 = vcombine.low %v4119_v57, %v4133_v6  ;;  %6335 = vmatpush3.bf16.msra.mxu0 %v4492_v46  ;;  %v6206_v22 = vcombine.low %v4185_v12, %v4189_v29  ;;  %vm4425_vm11 = vcmask 162816   ;;  %vm4434_vm12 = vcmask 195584  }
 0x2b5   : > { %4296 = vrot.lane.b32.xlu1 %v6190_v31, %s6656_s28  ;;  %4382 = vrot.lane.b32.xlu0 %v6205_v56, %s6654_s24  ;;  %v4275_v47 = vpop.permute.xlu0 %4274  ;;  %v8897_v44 = vpop.permute.xlu1 %4344  ;;  %vm4443_vm13 = vcmask 228352   ;;  %vm9659_vm14 = vcmask 261120   ;;  %vm4481_vm15 = vcmask 293888   ;;  %vm4654_vm5 = vcmask 60416  }
 0x2b9   : > { %4364 = vrot.lane.b32.xlu1 %v6202_v45, %s6657_s22  ;;  %v4343_v31 = vpop.permute.xlu0 %4342 }
 0x2bd   : > { %4384 = vrot.lane.b32.xlu1 %v6206_v22, %s6654_s24 }
 0x2cd   : > { %v4243_v30 = vpop.permute.xlu1 %4242 }
 0x2d2   : > { %v4311_v8 = vpop.permute.xlu0 %4310 }
 0x2e0   : > { %v4379_v15 = vpop.permute.xlu0 %4378  ;;  %v4245_v38 = vpop.permute.xlu1 %4244 }
 0x2e7   : > { %v4313_v53 = vpop.permute.xlu1 %4312 }
 0x2ec   : > { %v4381_v9 = vpop.permute.xlu0 %4380 }
 0x2f0   : > { %v4247_v59 = vpop.permute.xlu0 %4246 }
 0x2fd   : > { %v4315_v23 = vpop.permute.xlu0 %4314 }
 0x301   : > { %v4223_v51 = vpop.permute.xlu0 %4222 }
 0x302   : > { %v4388_v58 = vsel %vm2718_vm3, %v6171_v49, %v4223_v51  ;;  %v4684_v51 = vld [vmem:[#allocation3 + $0x38] sm:$0x1] }
 0x303   : > { %v4400_v36 = vsel %vm4398_vm7, %v4388_v58, %v4243_v30  ;;  %v4678_v30 = vld [vmem:[#allocation3 + $0x28] sm:$0x1] }
 0x304   : > { %v4409_v19 = vsel %vm4407_vm8, %v4400_v36, %v4271_v2  ;;  %v4697_v36 = vld [vmem:[#allocation3 + $0xc] sm:$0x1] }
 0x305   : > { %v4249_v18 = vpop.permute.xlu1 %4248 }
 0x30d   : > { %v4225_v37 = vpop.permute.xlu0 %4224 }
 0x30e   : > { %v4391_v61 = vsel %vm2718_vm3, %v6172_v13, %v4225_v37  ;;  %v4687_v37 = vld [vmem:[#allocation3 + $0x40] sm:$0x1] }
 0x30f   : > { %v4402_v26 = vsel %vm4398_vm7, %v4391_v61, %v4245_v38 }
 0x310   : > { %v4411_v10 = vsel %vm4407_vm8, %v4402_v26, %v4273_v63  ;;  %v4666_v63 = vld [vmem:[#allocation3 + $0x8] sm:$0x1] }
 0x311   : > { %v4291_v16 = vpop.permute.xlu0 %4290 }
 0x312   : > { %v4418_v62 = vsel %vm4416_vm9, %v4409_v19, %v4291_v16  ;;  %v4703_v19 = vld [vmem:[#allocation3 + $0x1c] sm:$0x1] }
 0x313   : > { %v4317_v48 = vpop.permute.xlu1 %4316  ;;  %v4427_v25 = vsel %vm4425_vm11, %v4418_v62, %v4311_v8 }
 0x314   : > { %v4436_v20 = vsel %vm4434_vm12, %v4427_v25, %v4339_v40  ;;  %v4709_v25 = vld [vmem:[#allocation3 + $0x2c] sm:$0x1] }
 0x317   : > { %v4293_v28 = vpop.permute.xlu1 %4292 }
 0x318   : > { %v4420_v33 = vsel %vm4416_vm9, %v4411_v10, %v4293_v28  ;;  %v4706_v10 = vld [vmem:[#allocation3 + $0x24] sm:$0x1] }
 0x319   : > { %v4429_v1 = vsel %vm4425_vm11, %v4420_v33, %v4313_v53  ;;  %v4359_v60 = vpop.permute.xlu0 %4358  ;;  %v4681_v53 = vld [vmem:[#allocation3 + $0x30] sm:$0x1] }
 0x31a   : > { %v4438_v27 = vsel %vm4434_vm12, %v4429_v1, %v4341_v43  ;;  %v4445_v49 = vsel %vm4443_vm13, %v4436_v20, %v4359_v60  ;;  %v9815_v43 = vmov 0   ;;  %v4712_v20 = vld [vmem:[#allocation3 + $0x34] sm:$0x1]  ;;  %v4715_v1 = vld [vmem:[#allocation3 + $0x3c] sm:$0x1] }
 0x31b   : > { %v4361_v3 = vpop.permute.xlu1 %4360  ;;  %v4454_v13 = vsel %vm9659_vm14, %v4445_v49, %v4379_v15  ;;  %v4672_v15 = vld [vmem:[#allocation3 + $0x18] sm:$0x1]  ;;  %4655 = vst.msk [vmem:[#allocation3] sm:$0xf] %vm4654_vm5, %v9815_v43  ;;  %4659 = vst.msk [vmem:[#allocation3 + $0x48] sm:$0xf] %vm4654_vm5, %v9815_v43 }
 0x31c   : > { %v4447_v57 = vsel %vm4443_vm13, %v4438_v27, %v4361_v3  ;;  %6336 = vmatprep.mubr.msk.bf16.mxu0 %vm4481_vm15, %v4454_v13  ;;  %v4718_v3 = vld [vmem:[#allocation3 + $0x44] sm:$0x1] }
 0x31d   : > { %v4456_v41 = vsel %vm9659_vm14, %v4447_v57, %v4381_v9  ;;  %v4675_v9 = vld [vmem:[#allocation3 + $0x20] sm:$0x1] }
 0x31e   : > { %6337 = vmatmul.mubr.msk.bf16.vlgmr.msra.gmra.mrb[0].mxu0 %vm4481_vm15, %v4456_v41  ;;  %v4295_v52 = vpop.permute.xlu0 %4294 }
 0x31f   : > { %v4227_v5 = vpop.permute.xlu1 %4226 }
 0x320   : > { %v4394_v21 = vsel %vm2718_vm3, %v6173_v24, %v4227_v5 }
 0x321   : > { %v4404_v17 = vsel %vm4398_vm7, %v4394_v21, %v4247_v59 }
 0x322   : > { %v4413_v0 = vsel %vm4407_vm8, %v4404_v17, %v4275_v47  ;;  %v4663_v49 = vld [vmem:[#allocation3] sm:$0x1]  ;;  %v4690_v41 = vld [vmem:[#allocation3 + $0x48] sm:$0x1] }
 0x323   : > { %v4229_v14 = vpop.permute.xlu1 %4228  ;;  %v4422_v54 = vsel %vm4416_vm9, %v4413_v0, %v4295_v52  ;;  %v4363_v56 = vpop.permute.xlu0 %4362 }
 0x324   : > { %v4397_v35 = vsel %vm2718_vm3, %v6174_v34, %v4229_v14  ;;  %v4431_v42 = vsel %vm4425_vm11, %v4422_v54, %v4315_v23  ;;  %vm4656_vm3 = vcmask 57344  }
 0x325   : > { %v4406_v6 = vsel %vm4398_vm7, %v4397_v35, %v4249_v18  ;;  %v4440_v4 = vsel %vm4434_vm12, %v4431_v42, %v4343_v31  ;;  %vm8944_vm1 = vmand %vm4656_vm3, %vm3174_vm0  ;;  %v4669_v31 = vld [vmem:[#allocation3 + $0x10] sm:$0x1]  ;;  %4657 = vst.msk [vmem:[#allocation3 + $0x4] sm:$0x1] %vm4656_vm3, %v9815_v43 }
 0x326   : > { %v4415_v39 = vsel %vm4407_vm8, %v4406_v6, %v4277_v55  ;;  %v4449_v45 = vsel %vm4443_vm13, %v4440_v4, %v4363_v56  ;;  %4660 = vst.msk [vmem:[#allocation3 + $0x4c] sm:$0x1] %vm4656_vm3, %v9815_v43  ;;  %v4667_v8 = vsel %vm8944_vm1, 0, %v4666_v63  ;;  %v4670_v55 = vsel %vm8944_vm1, 0, %v4669_v31  ;;  %vm8964_vm0 = vmand %vm4656_vm3, %vm3206_vm10 }
 0x327   : > { %v4297_v24 = vpop.permute.xlu1 %4296  ;;  %v4383_v12 = vpop.permute.xlu0 %4382  ;;  %4668 = vst [vmem:[#allocation3 + $0x8] sm:$0x1] %v4667_v8  ;;  %4671 = vst [vmem:[#allocation3 + $0x10] sm:$0x1] %v4670_v55  ;;  %v4676_v38 = vsel %vm8944_vm1, 0, %v4675_v9  ;;  %v4679_v23 = vsel %vm8944_vm1, 0, %v4678_v30 }
 0x328   : > { %v4424_v46 = vsel %vm4416_vm9, %v4415_v39, %v4297_v24  ;;  %v4458_v11 = vsel %vm9659_vm14, %v4449_v45, %v4383_v12  ;;  %4677 = vst [vmem:[#allocation3 + $0x20] sm:$0x1] %v4676_v38  ;;  %4680 = vst [vmem:[#allocation3 + $0x28] sm:$0x1] %v4679_v23  ;;  %v4682_v18 = vsel %vm8944_vm1, 0, %v4681_v53  ;;  %v4685_v58 = vsel %vm8944_vm1, 0, %v4684_v51 }
 0x329   : > { %v4433_v29 = vsel %vm4425_vm11, %v4424_v46, %v4317_v48  ;;  %6340 = vmatprep.mubr.msk.bf16.mxu0 %vm4481_vm15, %v4458_v11  ;;  %4683 = vst [vmem:[#allocation3 + $0x30] sm:$0x1] %v4682_v18  ;;  %4686 = vst [vmem:[#allocation3 + $0x38] sm:$0x1] %v4685_v58  ;;  %v4688_v61 = vsel %vm8944_vm1, 0, %v4687_v37  ;;  %v4698_v26 = vsel %vm8964_vm0, 0, %v4697_v36 }
 0x32a   : > { %v4442_v34 = vsel %vm4434_vm12, %v4433_v29, %v8897_v44  ;;  %v4673_v44 = vsel %vm8944_vm1, 0, %v4672_v15  ;;  %v4700_v48 = vld [vmem:[#allocation3 + $0x14] sm:$0x1]  ;;  %4689 = vst [vmem:[#allocation3 + $0x40] sm:$0x1] %v4688_v61  ;;  %v4704_v62 = vsel %vm8964_vm0, 0, %v4703_v19 }
 0x32b   : > { %v4365_v32 = vpop.permute.xlu1 %4364  ;;  %4674 = vst [vmem:[#allocation3 + $0x18] sm:$0x1] %v4673_v44  ;;  %4699 = vst [vmem:[#allocation3 + $0xc] sm:$0x1] %v4698_v26  ;;  %v4701_v16 = vsel %vm8964_vm0, 0, %v4700_v48  ;;  %v4707_v28 = vsel %vm8964_vm0, 0, %v4706_v10 }
 0x32c   : > { %v4451_v22 = vsel %vm4443_vm13, %v4442_v34, %v4365_v32  ;;  %4702 = vst [vmem:[#allocation3 + $0x14] sm:$0x1] %v4701_v16  ;;  %4705 = vst [vmem:[#allocation3 + $0x1c] sm:$0x1] %v4704_v62  ;;  %v4710_v33 = vsel %vm8964_vm0, 0, %v4709_v25  ;;  %v4713_v60 = vsel %vm8964_vm0, 0, %v4712_v20 }
 0x32d   : > { %4708 = vst [vmem:[#allocation3 + $0x24] sm:$0x1] %v4707_v28  ;;  %4711 = vst [vmem:[#allocation3 + $0x2c] sm:$0x1] %v4710_v33  ;;  %v4716_v27 = vsel %vm8964_vm0, 0, %v4715_v1  ;;  %v4719_v13 = vsel %vm8964_vm0, 0, %v4718_v3 }
 0x32e   : > { %4714 = vst [vmem:[#allocation3 + $0x34] sm:$0x1] %v4713_v60  ;;  %4717 = vst [vmem:[#allocation3 + $0x3c] sm:$0x1] %v4716_v27  ;;  %v4664_v57 = vsel %vm8944_vm1, 0, %v4663_v49  ;;  %v4691_v52 = vsel %vm8944_vm1, 0, %v4690_v41 }
 0x32f   : > { %v4385_v2 = vpop.permute.xlu1 %4384  ;;  %4720 = vst [vmem:[#allocation3 + $0x44] sm:$0x1] %v4719_v13  ;;  %4665 = vst [vmem:[#allocation3] sm:$0x1] %v4664_v57  ;;  %v4694_v5 = vld [vmem:[#allocation3 + $0x4] sm:$0x1] }
 0x330   : > { %v4460_v40 = vsel %vm9659_vm14, %v4451_v22, %v4385_v2  ;;  %4692 = vst [vmem:[#allocation3 + $0x48] sm:$0x1] %v4691_v52  ;;  %v4695_v21 = vsel %vm8964_vm0, 0, %v4694_v5  ;;  %v4721_v19 = vld [vmem:[#allocation3 + $0x4c] sm:$0x1] }
 0x331   : > { %6341 = vmatmul.mubr.msk.bf16.gmra.mrb[4].mxu0 %vm4481_vm15, %v4460_v40  ;;  %4696 = vst [vmem:[#allocation3 + $0x4] sm:$0x1] %v4695_v21  ;;  %v4722_v20 = vsel %vm8964_vm0, 0, %v4721_v19 }
 0x332   : > { %4723 = vst [vmem:[#allocation3 + $0x4c] sm:$0x1] %v4722_v20 }
 0x3f1   : > { %v6338_v17 = vpop.f32.mrb[0].mxu0 }
 0x3f2   : > { %v4528_v0 = vpop.f32.mrb[1].mxu0  ;;  %v4562_v6 = vsel %vm4398_vm7, %v6338_v17, 0.0 }
 0x3f3   : > { %v6339_v14 = vpop.f32.mrb[2].mxu0  ;;  %v4559_v35 = vsel %vm4398_vm7, %v4528_v0, 0.0 }
 0x3f4   : > { %v4531_v54 = vpop.f32.mrb[3].mxu0  ;;  %v4564_v39 = vsel %vm4398_vm7, %v6339_v14, 0.0 }
 0x3f5   : > { %v4560_v42 = vsel %vm4398_vm7, %v4531_v54, 0.0 }
 0x3f6   : > { %v4561_v56 = vadd.f32 %v4560_v42, %v4559_v35 }
 0x3f8   : > { %v4563_v4 = vadd.f32 %v4562_v6, %v4561_v56 }
 0x3fa   : > { %v4565_v24 = vadd.f32 %v4564_v39, %v4563_v4  ;;  %v4887_v4 = vld [vmem:[#allocation3] sm:$0xf] }
 0x404   : > { %v6342_v46 = vpop.f32.mrb[4].mxu0 }
 0x405   : > { %v4544_v45 = vpop.f32.mrb[5].mxu0  ;;  %v4570_v2 = vsel %vm4398_vm7, %v6342_v46, 0.0 }
 0x406   : > { %v4566_v12 = vsel %vm4398_vm7, %v4544_v45, 0.0  ;;  %v6343_v29 = vpop.f32.mrb[6].mxu0 }
 0x407   : > { %v4567_v11 = vadd.f32 %v4566_v12, %v4565_v24  ;;  %v4547_v32 = vpop.f32.mrb[7].mxu0  ;;  %v4572_v63 = vsel %vm4398_vm7, %v6343_v29, 0.0  ;;  %v9050_v12 = vld [vmem:[#allocation3 + $0x48] sm:$0xf] }
 0x408   : > { %v4568_v34 = vsel %vm4398_vm7, %v4547_v32, 0.0 }
 0x409   : > { %v4569_v22 = vadd.f32 %v4568_v34, %v4567_v11  ;;  %v5374_v34 = vshll.u32 %v9050_v12, 16 }
 0x40b   : > { %v4571_v40 = vadd.f32 %v4570_v2, %v4569_v22  ;;  %v9054_v22 = vld [vmem:[#allocation3 + $0x4] sm:$0x1]  ;;  %v9056_v2 = vld [vmem:[#allocation3] sm:$0xe] }
 0x40d   : > { %v4573_v31 = vadd.f32 %v4572_v63, %v4571_v40  ;;  %v4913_v63 = vshll.u32 %v9054_v22, 16 }
 0x40f   : > { %v4574_v43 = vrot.slane %v4573_v31, 4 }
 0x411   : > { %v4575_v8 = vadd.f32 %v4574_v43, %v4573_v31  ;;  %v9061_v43 = vrot.slane %v5374_v34, 5 }
 0x413   : > { %v4576_v55 = vrot.slane %v4575_v8, 2 }
 0x415   : > { %v4577_v15 = vadd.f32 %v4576_v55, %v4575_v8  ;;  %v6222_v8 = vrot.slane %v9056_v2, 9  ;;  %v9064_v55 = vld [vmem:[#allocation3 + $0x4c] sm:$0x1] }
 0x416   : > { %9818 = vst [vmem:[#allocation18_spill] sm:$0xff] %v9064_v55 }
 0x417   : > { %v4578_v44 = vrot.slane %v4577_v15, 1 }
 0x419   : > { %v4579_v9 = vadd.f32 %v4578_v44, %v4577_v15  ;;  %v5041_v44 = vrot.slane %v9054_v22, 5 }
 0x41b   : > { %v4581_v30 = vmul.f32 0.015625, %v4579_v9  ;;  %v9153_v47 = vsel %vm8414_vm4, %v6222_v8, %v5041_v44 }
 0x41d   : > { %v9008_v38 = vsub.f32 %v4528_v0, %v4581_v30  ;;  %v9010_v23 = vsub.f32 %v4531_v54, %v4581_v30  ;;  %v9012_v53 = vsub.f32 %v6338_v17, %v4581_v30  ;;  %v9014_v51 = vsub.f32 %v6339_v14, %v4581_v30 }
 0x41e   : > { %v9016_v18 = vsub.f32 %v4544_v45, %v4581_v30  ;;  %v9018_v58 = vsub.f32 %v4547_v32, %v4581_v30  ;;  %v9020_v37 = vsub.f32 %v6342_v46, %v4581_v30  ;;  %v9022_v36 = vsub.f32 %v6343_v29, %v4581_v30 }
 0x41f   : > { %v4590_v61 = vmul.f32 %v9008_v38, %v9008_v38  ;;  %v4591_v26 = vmul.f32 %v9010_v23, %v9010_v23  ;;  %v4592_v48 = vmul.f32 %v9012_v53, %v9012_v53  ;;  %v4593_v16 = vmul.f32 %v9014_v51, %v9014_v51 }
 0x420   : > { %v4594_v28 = vmul.f32 %v9016_v18, %v9016_v18  ;;  %v4595_v60 = vmul.f32 %v9018_v58, %v9018_v58  ;;  %v4596_v49 = vmul.f32 %v9020_v37, %v9020_v37  ;;  %v4597_v41 = vmul.f32 %v9022_v36, %v9022_v36 }
 0x421   : > { %v4598_v62 = vsel %vm4398_vm7, %v4590_v61, 0.0  ;;  %v4599_v10 = vsel %vm4398_vm7, %v4591_v26, 0.0  ;;  %v4601_v33 = vsel %vm4398_vm7, %v4592_v48, 0.0  ;;  %v4603_v27 = vsel %vm4398_vm7, %v4593_v16, 0.0 }
 0x422   : > { %v4600_v25 = vadd.f32 %v4599_v10, %v4598_v62  ;;  %v4605_v13 = vsel %vm4398_vm7, %v4594_v28, 0.0  ;;  %v4607_v59 = vsel %vm4398_vm7, %v4595_v60, 0.0  ;;  %v4609_v5 = vsel %vm4398_vm7, %v4596_v49, 0.0 }
 0x423   : > { %v4611_v17 = vsel %vm4398_vm7, %v4597_v41, 0.0  ;;  %v4904_v46 = vshrl.u32 %v4887_v4, 16  ;;  %v4907_v45 = vshll.u32 %v4887_v4, 16  ;;  %v5371_v32 = vshrl.u32 %v9050_v12, 16 }
 0x424   : > { %v4602_v1 = vadd.f32 %v4601_v33, %v4600_v25  ;;  %v9069_v30 = vrot.slane %v4913_v63, 5  ;;  %v5380_v61 = vshll.u32 %v9064_v55, 16  ;;  %v4842_v63 = vld [vmem:[#allocation3 + $0xc] sm:$0x1] }
 0x425   : > { %v4906_v29 = vrot.slane %v4904_v46, 4  ;;  %v4909_v11 = vrot.slane %v4907_v45, 5  ;;  %v9059_v31 = vrot.slane %v5371_v32, 4 }
 0x426   : > { %v4604_v3 = vadd.f32 %v4603_v27, %v4602_v1 }
 0x427   : > { %v4910_v40 = vor.u32 %v4909_v11, %v4906_v29 }
 0x428   : > { %v4606_v57 = vadd.f32 %v4605_v13, %v4604_v3 }
 0x429   : > { %v9067_v9 = vrot.slane %v4910_v40, 4  ;;  %v4839_v40 = vld [vmem:[#allocation3 + $0x8] sm:$0xf] }
 0x42a   : > { %v4608_v52 = vadd.f32 %v4607_v59, %v4606_v57 }
 0x42c   : > { %v4610_v21 = vadd.f32 %v4609_v5, %v4608_v52 }
 0x42e   : > { %v4612_v0 = vadd.f32 %v4611_v17, %v4610_v21 }
 0x430   : > { %v4613_v14 = vrot.slane %v4612_v0, 4 }
 0x432   : > { %v4614_v54 = vadd.f32 %v4613_v14, %v4612_v0 }
 0x434   : > { %v4615_v35 = vrot.slane %v4614_v54, 2 }
 0x436   : > { %v4616_v42 = vadd.f32 %v4615_v35, %v4614_v54 }
 0x438   : > { %v4617_v56 = vrot.slane %v4616_v42, 1 }
 0x43a   : > { %v4618_v6 = vadd.f32 %v4617_v56, %v4616_v42 }
 0x43c   : > { %v4619_v39 = vmul.f32 0.015625, %v4618_v6 }
 0x43e   : > { %v4620_v24 = vadd.f32 1e-05, %v4619_v39 }
 0x440   : > { %6480 = vrsqrt.f32 %v4620_v24 }
 0x44a   : > { %v6481_v15 = vpop.eup %6480 }
 0x44b   : > { %v4622_v26 = vmul.f32 %v6481_v15, %v9008_v38  ;;  %v4623_v48 = vmul.f32 %v6481_v15, %v9010_v23  ;;  %v4624_v19 = vmul.f32 %v6481_v15, %v9012_v53  ;;  %v4625_v16 = vmul.f32 %v6481_v15, %v9014_v51 }
 0x44c   : > { %v4626_v62 = vmul.f32 %v6481_v15, %v9016_v18  ;;  %v4627_v10 = vmul.f32 %v6481_v15, %v9018_v58  ;;  %v4628_v25 = vmul.f32 %v6481_v15, %v9020_v37  ;;  %v4629_v28 = vmul.f32 %v6481_v15, %v9022_v36 }
 0x44d   : > { %vm4630_vm2 = vcmp.gt.f32.partialorder %v4622_v26, 0.0  ;;  %vm4631_vm8 = vcmp.gt.f32.partialorder %v4623_v48, 0.0  ;;  %vm4632_vm11 = vcmp.gt.f32.partialorder %v4624_v19, 0.0  ;;  %vm4633_vm13 = vcmp.gt.f32.partialorder %v4625_v16, 0.0 }
 0x44e   : > { %vm4634_vm15 = vcmp.gt.f32.partialorder %v4626_v62, 0.0  ;;  %vm4635_vm3 = vcmp.gt.f32.partialorder %v4627_v10, 0.0  ;;  %vm4636_vm0 = vcmp.gt.f32.partialorder %v4628_v25, 0.0  ;;  %vm4637_vm14 = vcmp.gt.f32.partialorder %v4629_v28, 0.0 }
 0x44f   : > { %v4638_v38 = vmul.f32 0.01, %v4622_v26  ;;  %v4639_v23 = vmul.f32 0.01, %v4623_v48  ;;  %v4640_v53 = vmul.f32 0.01, %v4624_v19  ;;  %v5377_v58 = vor.u32 %v9061_v43, %v9059_v31 }
 0x450   : > { %v4641_v51 = vmul.f32 0.01, %v4625_v16  ;;  %v4642_v33 = vmul.f32 0.01, %v4626_v62  ;;  %v4643_v18 = vmul.f32 0.01, %v4627_v10 }
 0x451   : > { %v4644_v37 = vmul.f32 0.01, %v4628_v25  ;;  %v4645_v20 = vmul.f32 0.01, %v4629_v28  ;;  %v4646_v36 = vsel %vm4630_vm2, %v4622_v26, %v4638_v38  ;;  %v4647_v1 = vsel %vm4631_vm8, %v4623_v48, %v4639_v23  ;;  %v4848_v23 = vld [vmem:[#allocation3 + $0x14] sm:$0x1] }
 0x452   : > { %v4648_v60 = vsel %vm4632_vm11, %v4624_v19, %v4640_v53  ;;  %v4649_v27 = vsel %vm4633_vm13, %v4625_v16, %v4641_v51  ;;  %v4650_v3 = vsel %vm4634_vm15, %v4626_v62, %v4642_v33  ;;  %v4651_v49 = vsel %vm4635_vm3, %v4627_v10, %v4643_v18  ;;  %v4845_v16 = vld [vmem:[#allocation3 + $0x10] sm:$0xf]  ;;  %v4851_v53 = vld [vmem:[#allocation3 + $0x18] sm:$0xf] }
 0x453   : > { %v4652_v13 = vsel %vm4636_vm0, %v4628_v25, %v4644_v37  ;;  %v4653_v57 = vsel %vm4637_vm14, %v4629_v28, %v4645_v20  ;;  %v6305_v41 = vpack.c.bf16 %v4646_v36, %v4646_v36  ;;  %v6306_v59 = vpack.c.bf16 %v4647_v1, %v4647_v1  ;;  %vm9096_vm14 = vmand %vm4654_vm5, %vm3206_vm10  ;;  %v4854_v20 = vld [vmem:[#allocation3 + $0x1c] sm:$0x1]  ;;  %v4857_v36 = vld [vmem:[#allocation3 + $0x20] sm:$0xf] }
 0x454   : > { %v6307_v52 = vpack.c.bf16 %v4648_v60, %v4648_v60  ;;  %v6308_v5 = vpack.c.bf16 %v4649_v27, %v4649_v27  ;;  %v6309_v21 = vpack.c.bf16 %v4650_v3, %v4650_v3  ;;  %v6310_v17 = vpack.c.bf16 %v4651_v49, %v4651_v49  ;;  %v4860_v49 = vld [vmem:[#allocation3 + $0x24] sm:$0x1] }
 0x455   : > { %v9090_v0 = vpack.c.bf16 %v4652_v13, %v4652_v13  ;;  %v9092_v14 = vpack.c.bf16 %v4653_v57, %v4653_v57  ;;  %v4757_v54 = vshrl.u32 %v6305_v41, 16  ;;  %v4760_v35 = vshll.u32 %v6305_v41, 16 }
 0x456   : > { %v4765_v42 = vshrl.u32 %v6306_v59, 16  ;;  %v4768_v56 = vshll.u32 %v6306_v59, 16  ;;  %v4773_v6 = vshrl.u32 %v6307_v52, 16  ;;  %v4776_v4 = vshll.u32 %v6307_v52, 16  ;;  %v4863_v52 = vld [vmem:[#allocation3 + $0x28] sm:$0xf] }
 0x457   : > { %v4759_v39 = vrot.slane %v4757_v54, 7  ;;  %v4781_v24 = vshrl.u32 %v6308_v5, 16  ;;  %v4784_v46 = vshll.u32 %v6308_v5, 16  ;;  %v4789_v45 = vshrl.u32 %v6309_v21, 16  ;;  %v4866_v5 = vld [vmem:[#allocation3 + $0x2c] sm:$0x1] }
 0x458   : > { %v4767_v29 = vrot.slane %v4765_v42, 7  ;;  %v4775_v11 = vrot.slane %v4773_v6, 7  ;;  %v4792_v32 = vshll.u32 %v6309_v21, 16  ;;  %v4797_v34 = vshrl.u32 %v6310_v17, 16  ;;  %v4872_v42 = vld [vmem:[#allocation3 + $0x34] sm:$0x1] }
 0x459   : > { %v4762_v15 = vor.u32 %v4760_v35, %v4759_v39  ;;  %v4763_v26 = vrot.slane %v4759_v39, 4  ;;  %v4783_v48 = vrot.slane %v4781_v24, 7  ;;  %v4791_v19 = vrot.slane %v4789_v45, 7  ;;  %v4869_v35 = vld [vmem:[#allocation3 + $0x30] sm:$0xf] }
 0x45a   : > { %v4770_v62 = vor.u32 %v4768_v56, %v4767_v29  ;;  %v4771_v10 = vrot.slane %v4767_v29, 4  ;;  %v4778_v25 = vor.u32 %v4776_v4, %v4775_v11  ;;  %v4779_v28 = vrot.slane %v4775_v11, 4  ;;  %v4875_v39 = vld [vmem:[#allocation3 + $0x38] sm:$0xf]  ;;  %v4878_v24 = vld [vmem:[#allocation3 + $0x3c] sm:$0x1] }
 0x45b   : > { %v4786_v51 = vor.u32 %v4784_v46, %v4783_v48  ;;  %v4787_v33 = vrot.slane %v4783_v48, 4  ;;  %v4794_v18 = vor.u32 %v4792_v32, %v4791_v19  ;;  %v4795_v37 = vrot.slane %v4791_v19, 4  ;;  %v4881_v32 = vld [vmem:[#allocation3 + $0x40] sm:$0xf] }
 0x45c   : > { %v4799_v1 = vrot.slane %v4797_v34, 7  ;;  %v4800_v60 = vshll.u32 %v6310_v17, 16  ;;  %v4805_v27 = vshrl.u32 %v9090_v0, 16  ;;  %v4808_v3 = vshll.u32 %v9090_v0, 16  ;;  %v4884_v34 = vld [vmem:[#allocation3 + $0x44] sm:$0x1] }
 0x45d   : > { %v4813_v13 = vshrl.u32 %v9092_v14, 16  ;;  %v4816_v57 = vshll.u32 %v9092_v14, 16  ;;  %v4840_v41 = vsel %vm9096_vm14, %v4762_v15, %v4839_v40  ;;  %v4843_v59 = vsel %vm8944_vm1, %v4763_v26, %v4842_v63 }
 0x45e   : > { %v4802_v21 = vor.u32 %v4800_v60, %v4799_v1  ;;  %v4803_v54 = vrot.slane %v4799_v1, 4  ;;  %v4807_v17 = vrot.slane %v4805_v27, 7  ;;  %4844 = vst [vmem:[#allocation3 + $0xc] sm:$0x1] %v4843_v59  ;;  %v4846_v0 = vsel %vm9096_vm14, %v4770_v62, %v4845_v16  ;;  %4841 = vst [vmem:[#allocation3 + $0x8] sm:$0xf] %v4840_v41 }
 0x45f   : > { %v4815_v56 = vrot.slane %v4813_v13, 7  ;;  %v4849_v14 = vsel %vm8944_vm1, %v4771_v10, %v4848_v23  ;;  %v4852_v6 = vsel %vm9096_vm14, %v4778_v25, %v4851_v53  ;;  %v4855_v4 = vsel %vm8944_vm1, %v4779_v28, %v4854_v20  ;;  %4847 = vst [vmem:[#allocation3 + $0x10] sm:$0xf] %v4846_v0  ;;  %v9145_v53 = vld [vmem:[#allocation3 + $0x48] sm:$0xe] }
 0x460   : > { %v4810_v46 = vor.u32 %v4808_v3, %v4807_v17  ;;  %v4811_v45 = vrot.slane %v4807_v17, 4  ;;  %4850 = vst [vmem:[#allocation3 + $0x14] sm:$0x1] %v4849_v14  ;;  %4853 = vst [vmem:[#allocation3 + $0x18] sm:$0xf] %v4852_v6  ;;  %v4858_v29 = vsel %vm9096_vm14, %v4786_v51, %v4857_v36  ;;  %v4861_v11 = vsel %vm8944_vm1, %v4787_v33, %v4860_v49 }
 0x461   : > { %4856 = vst [vmem:[#allocation3 + $0x1c] sm:$0x1] %v4855_v4  ;;  %v4818_v40 = vor.u32 %v4816_v57, %v4815_v56  ;;  %v4819_v63 = vrot.slane %v4815_v56, 4  ;;  %4859 = vst [vmem:[#allocation3 + $0x20] sm:$0xf] %v4858_v29  ;;  %v4864_v15 = vsel %vm9096_vm14, %v4794_v18, %v4863_v52  ;;  %v4867_v26 = vsel %vm8944_vm1, %v4795_v37, %v4866_v5 }
 0x462   : > { %4862 = vst [vmem:[#allocation3 + $0x24] sm:$0x1] %v4861_v11  ;;  %4865 = vst [vmem:[#allocation3 + $0x28] sm:$0xf] %v4864_v15  ;;  %v4870_v48 = vsel %vm9096_vm14, %v4802_v21, %v4869_v35  ;;  %v4873_v19 = vsel %vm8944_vm1, %v4803_v54, %v4872_v42  ;;  %v4876_v16 = vsel %vm9096_vm14, %v4810_v46, %v4875_v39  ;;  %v9139_v28 = vrot.slane %v5377_v58, 4 }
 0x463   : > { %4868 = vst [vmem:[#allocation3 + $0x2c] sm:$0x1] %v4867_v26  ;;  %v4879_v62 = vsel %vm8944_vm1, %v4811_v45, %v4878_v24  ;;  %4871 = vst [vmem:[#allocation3 + $0x30] sm:$0xf] %v4870_v48  ;;  %v4882_v10 = vsel %vm9096_vm14, %v4818_v40, %v4881_v32  ;;  %v4885_v25 = vsel %vm8944_vm1, %v4819_v63, %v4884_v34  ;;  %v9143_v23 = vrot.slane %v5380_v61, 5 }
 0x464   : > { %4874 = vst [vmem:[#allocation3 + $0x34] sm:$0x1] %v4873_v19  ;;  %4877 = vst [vmem:[#allocation3 + $0x38] sm:$0xf] %v4876_v16  ;;  %vm5753_vm10 = vcmask 1043456   ;;  %vm5681_vm1 = vcmask 392192  }
 0x465   : > { %4880 = vst [vmem:[#allocation3 + $0x3c] sm:$0x1] %v4879_v62  ;;  %9821 = vst [vmem:[#allocation19_spill] sm:$0xff] %v9139_v28  ;;  %v5071_v51 = vld [vmem:[#allocation3 + $0x8] sm:$0xf]  ;;  %vm5690_vm2 = vcmask 457728  }
 0x466   : > { %9822 = vst [vmem:[#allocation20_spill] sm:$0xff] %v9143_v23  ;;  %9823 = vst [vmem:[#allocation21_spill] sm:$0xff] %v9145_v53  ;;  %v5072_v43 = vld [vmem:[#allocation3 + $0x10] sm:$0xf]  ;;  %v5088_v61 = vshrl.u32 %v5071_v51, 16  ;;  %v5091_v58 = vshll.u32 %v5071_v51, 16 }
 0x467   : > { %4883 = vst [vmem:[#allocation3 + $0x40] sm:$0xf] %v4882_v10  ;;  %4886 = vst [vmem:[#allocation3 + $0x44] sm:$0x1] %v4885_v25  ;;  %v5073_v18 = vld [vmem:[#allocation3 + $0x18] sm:$0xf]  ;;  %v6258_v2 = vcombine.low %v5071_v51, %v5072_v43 }
 0x468   : > { %v5102_v22 = vshrl.u32 %v5072_v43, 16  ;;  %v5105_v37 = vshll.u32 %v5072_v43, 16  ;;  %v5256_v20 = vld [vmem:[#allocation3 + $0x10] sm:$0xf]  ;;  %v5074_v44 = vld [vmem:[#allocation3 + $0x20] sm:$0xf] }
 0x469   : > { %v5116_v36 = vshrl.u32 %v5073_v18, 16  ;;  %v5119_v1 = vshll.u32 %v5073_v18, 16  ;;  %v9165_v60 = vrot.slane %v5088_v61, 4  ;;  %v9167_v27 = vrot.slane %v5091_v58, 5  ;;  %v5257_v3 = vld [vmem:[#allocation3 + $0x18] sm:$0xf]  ;;  %5520 = vrot.lane.b32.xlu0 %v6258_v2, %s6650_s20 }
 0x46a   : > { %v5130_v49 = vshrl.u32 %v5074_v44, 16  ;;  %v5133_v13 = vshll.u32 %v5074_v44, 16  ;;  %v6259_v57 = vcombine.low %v5073_v18, %v5074_v44  ;;  %v9169_v41 = vrot.slane %v5102_v22, 4  ;;  %v5258_v59 = vld [vmem:[#allocation3 + $0x20] sm:$0xf] }
 0x46b   : > { %v9172_v52 = vrot.slane %v5116_v36, 4  ;;  %v9174_v5 = vrot.slane %v5119_v1, 5  ;;  %v9176_v21 = vrot.slane %v5105_v37, 5  ;;  %v5259_v54 = vld [vmem:[#allocation3 + $0x28] sm:$0xf]  ;;  %v5301_v17 = vshrl.u32 %v5258_v59, 16 }
 0x46c   : > { %v9178_v0 = vrot.slane %v5130_v49, 4  ;;  %v9180_v35 = vrot.slane %v5133_v13, 5  ;;  %5522 = vrot.lane.b32.xlu1 %v6259_v57, %s6650_s20  ;;  %v5304_v42 = vshll.u32 %v5258_v59, 16  ;;  %v5315_v56 = vshrl.u32 %v5259_v54, 16  ;;  %v5077_v14 = vld [vmem:[#allocation3 + $0x38] sm:$0xf] }
 0x46d   : > { %v9183_v6 = vrot.slane %v5301_v17, 4  ;;  %v5318_v4 = vshll.u32 %v5259_v54, 16  ;;  %v6271_v39 = vcombine.low %v5258_v59, %v5259_v54  ;;  %v5273_v24 = vshrl.u32 %v5256_v20, 16  ;;  %v5075_v34 = vld [vmem:[#allocation3 + $0x28] sm:$0xf] }
 0x46e   : > { %v5078_v46 = vld [vmem:[#allocation3 + $0x40] sm:$0xf]  ;;  %v9185_v45 = vrot.slane %v5304_v42, 5  ;;  %v9187_v29 = vrot.slane %v5315_v56, 4  ;;  %v5276_v11 = vshll.u32 %v5256_v20, 16  ;;  %v5287_v32 = vshrl.u32 %v5257_v3, 16 }
 0x46f   : > { %v9189_v40 = vrot.slane %v5318_v4, 5  ;;  %v9191_v63 = vrot.slane %v5273_v24, 4  ;;  %v5290_v15 = vshll.u32 %v5257_v3, 16  ;;  %v6270_v26 = vcombine.low %v5256_v20, %v5257_v3  ;;  %v5076_v48 = vld [vmem:[#allocation3 + $0x30] sm:$0xf] }
 0x470   : > { %5590 = vrot.lane.b32.xlu1 %v6271_v39, %s6658_s11  ;;  %v9194_v19 = vrot.slane %v5276_v11, 5  ;;  %v9196_v16 = vrot.slane %v5287_v32, 4  ;;  %v5172_v62 = vshrl.u32 %v5077_v14, 16  ;;  %v5175_v10 = vshll.u32 %v5077_v14, 16  ;;  %v5262_v25 = vld [vmem:[#allocation3 + $0x40] sm:$0xf] }
 0x471   : > { %v9198_v51 = vrot.slane %v5290_v15, 5  ;;  %5588 = vrot.lane.b32.xlu0 %v6270_v26, %s6658_s11  ;;  %v5186_v43 = vshrl.u32 %v5078_v46, 16  ;;  %v5189_v61 = vshll.u32 %v5078_v46, 16  ;;  %v6261_v58 = vcombine.low %v5077_v14, %v5078_v46  ;;  %v5260_v18 = vld [vmem:[#allocation3 + $0x30] sm:$0xf] }
 0x472   : > { %v9201_v22 = vrot.slane %v5172_v62, 4  ;;  %v9203_v37 = vrot.slane %v5175_v10, 5  ;;  %v5144_v2 = vshrl.u32 %v5075_v34, 16  ;;  %v5147_v20 = vshll.u32 %v5075_v34, 16  ;;  %v5261_v44 = vld [vmem:[#allocation3 + $0x38] sm:$0xf] }
 0x473   : > { %v9205_v36 = vrot.slane %v5186_v43, 4  ;;  %v9207_v1 = vrot.slane %v5189_v61, 5  ;;  %v5158_v3 = vshrl.u32 %v5076_v48, 16  ;;  %v5161_v49 = vshll.u32 %v5076_v48, 16  ;;  %v9209_v13 = vld [vmem:[#allocation3 + $0x14] sm:$0x1] }
 0x474   : > { %5526 = vrot.lane.b32.xlu1 %v6261_v58, %s6650_s20  ;;  %v9212_v57 = vrot.slane %v5144_v2, 4  ;;  %v9214_v59 = vrot.slane %v5147_v20, 5  ;;  %v6260_v54 = vcombine.low %v5075_v34, %v5076_v48  ;;  %v5357_v17 = vshrl.u32 %v5262_v25, 16  ;;  %v9216_v42 = vld [vmem:[#allocation3 + $0x1c] sm:$0x1] }
 0x475   : > { %v5016_v56 = vld [vmem:[#allocation3 + $0x8] sm:$0xe]  ;;  %v9218_v14 = vrot.slane %v5158_v3, 4  ;;  %v9220_v4 = vrot.slane %v5161_v49, 5  ;;  %v5360_v39 = vshll.u32 %v5262_v25, 16  ;;  %v6273_v24 = vcombine.low %v5262_v25, %v9050_v12 }
 0x476   : > { %v5017_v46 = vld [vmem:[#allocation3 + $0x10] sm:$0xe]  ;;  %v9223_v11 = vld [vmem:[#allocation3 + $0xc] sm:$0x1]  ;;  %5524 = vrot.lane.b32.xlu0 %v6260_v54, %s6650_s20  ;;  %v9226_v32 = vrot.slane %v5357_v17, 4  ;;  %v5329_v15 = vshrl.u32 %v5260_v18, 16  ;;  %v6272_v43 = vcombine.low %v5260_v18, %v5261_v44  ;;  %s9581_s20 = scalar_lea.hbm %s9645_s3, %s6313_s26 }
 0x477   : > { %9824 = vst [vmem:[#allocation14_spill] sm:$0xff] %v9218_v14  ;;  %9825 = vst [vmem:[#allocation15_spill] sm:$0xff] %v9220_v4  ;;  %v5332_v34 = vshll.u32 %v5260_v18, 16  ;;  %v5343_v26 = vshrl.u32 %v5261_v44, 16  ;;  %v5018_v48 = vld [vmem:[#allocation3 + $0x18] sm:$0xe] }
 0x478   : > { %9826 = vst [vmem:[#allocation22_spill] sm:$0xff] %v9226_v32  ;;  %v9228_v62 = vrot.slane %v5360_v39, 5  ;;  %v5346_v10 = vshll.u32 %v5261_v44, 16  ;;  %v6224_v61 = vrot.slane %v5017_v46, 9  ;;  %v9230_v58 = vld [vmem:[#allocation3 + $0x1c] sm:$0x1]  ;;  %5594 = vrot.lane.b32.xlu1 %v6273_v24, %s6658_s11 }
 0x479   : > { %v9233_v12 = vrot.slane %v5329_v15, 4  ;;  %v9235_v25 = vrot.slane %v5332_v34, 5  ;;  %v9237_v2 = vrot.slane %v5343_v26, 4  ;;  %v5049_v20 = vrot.slane %v9209_v13, 5  ;;  %v9240_v3 = vld [vmem:[#allocation3 + $0x24] sm:$0x1] }
 0x47a   : > { %9827 = vst [vmem:[#allocation23_spill] sm:$0xff] %v9228_v62  ;;  %v9242_v49 = vrot.slane %v5346_v10, 5  ;;  %v6225_v54 = vrot.slane %v5018_v48, 9  ;;  %v5053_v18 = vrot.slane %v9216_v42, 5  ;;  %v6223_v44 = vrot.slane %v5016_v56, 9  ;;  %5592 = vrot.lane.b32.xlu0 %v6272_v43, %s6658_s11 }
 0x47b   : > { %9828 = vst [vmem:[#allocation17_spill] sm:$0xff] %v9233_v12  ;;  %9829 = vst [vmem:[#allocation16_spill] sm:$0xff] %v9235_v25  ;;  %v5201_v17 = vld [vmem:[#allocation3 + $0x18] sm:$0xe]  ;;  %v5050_v39 = vsel %vm8414_vm4, %v6224_v61, %v5049_v20  ;;  %v5045_v24 = vrot.slane %v9223_v11, 5  ;;  %v5233_v34 = vrot.slane %v9230_v58, 5 }
 0x47c   : > { %9830 = vst [vmem:[#allocation25_spill] sm:$0xff] %v9237_v2  ;;  %9831 = vst [vmem:[#allocation26_spill] sm:$0xff] %v9242_v49  ;;  %v5202_v46 = vld [vmem:[#allocation3 + $0x20] sm:$0xe]  ;;  %v6232_v15 = vrot.slane %v5201_v17, 9  ;;  %v5054_v26 = vsel %vm8414_vm4, %v6225_v54, %v5053_v18  ;;  %v5237_v48 = vrot.slane %v9240_v3, 5 }
 0x47d   : > { %v6233_v10 = vrot.slane %v5202_v46, 9  ;;  %v9253_v8 = vld [vmem:[#allocation3 + $0xc] sm:$0x1]  ;;  %v9255_v56 = vld [vmem:[#allocation3 + $0x14] sm:$0x1]  ;;  %v6255_v61 = vcombine.low %v5050_v39, %v5054_v26  ;;  %v5046_v20 = vsel %vm8414_vm4, %v6223_v44, %v5045_v24  ;;  %vm5699_vm8 = vcmask 523264  }
 0x47e   : > { %v5234_v17 = vsel %vm8414_vm4, %v6232_v15, %v5233_v34  ;;  %v5199_v38 = vld [vmem:[#allocation3 + $0x8] sm:$0xe]  ;;  %v5200_v33 = vld [vmem:[#allocation3 + $0x10] sm:$0xe]  ;;  %v5225_v54 = vrot.slane %v9253_v8, 5  ;;  %v6254_v18 = vcombine.low %v9153_v47, %v5046_v20  ;;  %v5229_v24 = vrot.slane %v9255_v56, 5 }
 0x47f   : > { %v5238_v46 = vsel %vm8414_vm4, %v6233_v10, %v5237_v48  ;;  %v6230_v31 = vrot.slane %v5199_v38, 9  ;;  %v6231_v23 = vrot.slane %v5200_v33, 9  ;;  %v9267_v28 = vld [vmem:[#allocation3 + $0x34] sm:$0x1]  ;;  %v9269_v39 = vld [vmem:[#allocation3 + $0x3c] sm:$0x1]  ;;  %5494 = vrot.lane.b32.xlu1 %v6255_v61, %s6656_s28 }
 0x480   : > { %v6267_v44 = vcombine.low %v5234_v17, %v5238_v46  ;;  %v5021_v15 = vld [vmem:[#allocation3 + $0x30] sm:$0xe]  ;;  %v5022_v34 = vld [vmem:[#allocation3 + $0x38] sm:$0xe]  ;;  %v5065_v26 = vrot.slane %v9267_v28, 5  ;;  %5492 = vrot.lane.b32.xlu0 %v6254_v18, %s6656_s28  ;;  %v5069_v48 = vrot.slane %v9269_v39, 5 }
 0x481   : > { %v5226_v38 = vsel %vm8414_vm4, %v6230_v31, %v5225_v54  ;;  %v6228_v33 = vrot.slane %v5021_v15, 9  ;;  %v6229_v10 = vrot.slane %v5022_v34, 9  ;;  %v9280_v61 = vld [vmem:[#allocation3 + $0x14] sm:$0x1]  ;;  %v6471_v20 = vld [vmem:[#allocation9] sm:$0xff]   ;;  %v5230_v17 = vsel %vm8414_vm4, %v6231_v23, %v5229_v24 }
 0x482   : > { %v9284_v46 = vld [vmem:[#allocation3 + $0x1c] sm:$0x1]  ;;  %v5384_v43 = vld [vmem:[#allocation3 + $0x10] sm:$0xe]  ;;  %v5385_v53 = vld [vmem:[#allocation3 + $0x18] sm:$0xe]  ;;  %v6266_v15 = vcombine.low %v5226_v38, %v5230_v17  ;;  %6344 = vmatprep.subr.bf16.mxu1 %v6471_v20 }
 0x483   : > { %v5066_v34 = vsel %vm8414_vm4, %v6228_v33, %v5065_v26  ;;  %v5070_v23 = vsel %vm8414_vm4, %v6229_v10, %v5069_v48  ;;  %v6238_v24 = vrot.slane %v5384_v43, 9  ;;  %v9296_v47 = vld [vmem:[#allocation3 + $0x3c] sm:$0x1]  ;;  %v9298_v55 = vld [vmem:[#allocation3 + $0x44] sm:$0x1]  ;;  %5562 = vrot.lane.b32.xlu1 %v6267_v44, %s6659_s25  ;;  %v5410_v18 = vrot.slane %v9280_v61, 5  ;;  %6345 = vmatpush3.bf16.msra.mxu1 %v6471_v20 }
 0x484   : > { %v6257_v31 = vcombine.low %v5066_v34, %v5070_v23  ;;  %v6239_v54 = vrot.slane %v5385_v53, 9  ;;  %v5414_v38 = vrot.slane %v9284_v46, 5  ;;  %v5205_v17 = vld [vmem:[#allocation3 + $0x38] sm:$0xe]  ;;  %5560 = vrot.lane.b32.xlu0 %v6266_v15, %s6659_s25  ;;  %v5206_v26 = vld [vmem:[#allocation3 + $0x40] sm:$0xe] }
 0x485   : > { %v6236_v43 = vrot.slane %v5205_v17, 9  ;;  %v5249_v33 = vrot.slane %v9296_v47, 5  ;;  %v5253_v10 = vrot.slane %v9298_v55, 5  ;;  %v4941_v48 = vshll.u32 %v9209_v13, 16  ;;  %v9311_v23 = vld [vmem:[#allocation3 + $0x24] sm:$0x1] }
 0x486   : > { %v5411_v44 = vsel %vm8414_vm4, %v6238_v24, %v5410_v18  ;;  %v5415_v53 = vsel %vm8414_vm4, %v6239_v54, %v5414_v38  ;;  %v6237_v34 = vrot.slane %v5206_v26, 9  ;;  %v9313_v20 = vld [vmem:[#allocation3 + $0x2c] sm:$0x1]  ;;  %v4955_v15 = vshll.u32 %v9216_v42, 16  ;;  %v5386_v2 = vld [vmem:[#allocation3 + $0x20] sm:$0xe] }
 0x487   : > { %v6278_v17 = vcombine.low %v5411_v44, %v5415_v53  ;;  %v5250_v49 = vsel %vm8414_vm4, %v6236_v43, %v5249_v33  ;;  %v5387_v25 = vld [vmem:[#allocation3 + $0x28] sm:$0xe]  ;;  %v5418_v13 = vrot.slane %v9311_v23, 5  ;;  %v5422_v18 = vrot.slane %v9313_v20, 5  ;;  %5498 = vrot.lane.b32.xlu1 %v6257_v31, %s6656_s28  ;;  %v9323_v26 = vld [vmem:[#allocation3 + $0x10] sm:$0xf] }
 0x488   : > { %v5254_v54 = vsel %vm8414_vm4, %v6237_v34, %v5253_v10  ;;  %v6240_v24 = vrot.slane %v5386_v2, 9  ;;  %v6241_v38 = vrot.slane %v5387_v25, 9  ;;  %9832 = vst [vmem:[#allocation30_spill] sm:$0xff] %v9323_v26  ;;  %v9325_v42 = vld [vmem:[#allocation3 + $0x18] sm:$0xf]  ;;  %v4932_v44 = vshrl.u32 %v9323_v26, 16 }
 0x489   : > { %9833 = vst [vmem:[#allocation31_spill] sm:$0xff] %v9325_v42  ;;  %5628 = vrot.lane.b32.xlu0 %v6278_v17, %s6660_s10  ;;  %v6269_v33 = vcombine.low %v5250_v49, %v5254_v54  ;;  %v4935_v31 = vshll.u32 %v9323_v26, 16  ;;  %v4943_v53 = vrot.slane %v4941_v48, 5  ;;  %v9332_v12 = vld [vmem:[#allocation3 + $0x24] sm:$0x1]  ;;  %v6473_v2 = vld [vmem:[#allocation9 + $0x8] sm:$0xff]  }
 0x48a   : > { %v5419_v25 = vsel %vm8414_vm4, %v6240_v24, %v5418_v13  ;;  %v5423_v10 = vsel %vm8414_vm4, %v6241_v38, %v5422_v18  ;;  %v4946_v34 = vshrl.u32 %v9325_v42, 16  ;;  %v4949_v43 = vshll.u32 %v9325_v42, 16  ;;  %v9340_v17 = vld [vmem:[#allocation3 + $0x2c] sm:$0x1]  ;;  %v5019_v49 = vld [vmem:[#allocation3 + $0x20] sm:$0xe]  ;;  %6346 = vmatprep.subr.bf16.mxu1 %v6473_v2 }
 0x48b   : > { %v6279_v54 = vcombine.low %v5419_v25, %v5423_v10  ;;  %v4934_v62 = vrot.slane %v4932_v44, 4  ;;  %v4937_v26 = vrot.slane %v4935_v31, 5  ;;  %v4957_v48 = vrot.slane %v4955_v15, 5  ;;  %v5020_v32 = vld [vmem:[#allocation3 + $0x28] sm:$0xe]  ;;  %5566 = vrot.lane.b32.xlu1 %v6269_v33, %s6659_s25  ;;  %6347 = vmatpush3.bf16.msra.mxu1 %v6473_v2  ;;  %v6474_v33 = vld [vmem:[#allocation9 + $0x10] sm:$0xff]  }
 0x48c   : > { %v4948_v4 = vrot.slane %v4946_v34, 4  ;;  %v4951_v13 = vrot.slane %v4949_v43, 5  ;;  %v6226_v24 = vrot.slane %v5019_v49, 9  ;;  %v5057_v18 = vrot.slane %v9332_v12, 5  ;;  %v9344_v38 = vld [vmem:[#allocation3 + $0x2c] sm:$0x1]  ;;  %6348 = vmatprep.subr.bf16.mxu1 %v6474_v33 }
 0x48d   : > { %5630 = vrot.lane.b32.xlu0 %v6279_v54, %s6660_s10  ;;  %v4938_v42 = vor.u32 %v4937_v26, %v4934_v62  ;;  %v6227_v14 = vrot.slane %v5020_v32, 9  ;;  %v5061_v44 = vrot.slane %v9340_v17, 5  ;;  %v9834_v15 = vor.u32 %v9174_v5, %v9172_v52  ;;  %v9351_v25 = vld [vmem:[#allocation3 + $0x34] sm:$0x1]  ;;  %v5203_v32 = vld [vmem:[#allocation3 + $0x28] sm:$0xe] }
 0x48e   : > { %v4952_v43 = vor.u32 %v4951_v13, %v4948_v4  ;;  %v5058_v10 = vsel %vm8414_vm4, %v6226_v24, %v5057_v18  ;;  %v5125_v34 = vshll.u32 %v9230_v58, 16  ;;  %v9835_v2 = vor.u32 %v9180_v35, %v9178_v0  ;;  %v5204_v26 = vld [vmem:[#allocation3 + $0x30] sm:$0xe] }
 0x48f   : > { %v5123_v31 = vrot.slane %v9834_v15, 4  ;;  %v4939_v49 = vrot.slane %v4938_v42, 4  ;;  %v5062_v52 = vsel %vm8414_vm4, %v6227_v14, %v5061_v44  ;;  %v5139_v5 = vshll.u32 %v9240_v3, 16  ;;  %6349 = vmatpush3.bf16.msra.mxu1 %v6474_v33 }
 0x490   : > { %v5137_v62 = vrot.slane %v9835_v2, 4  ;;  %v6234_v54 = vrot.slane %v5203_v32, 9  ;;  %v4953_v4 = vrot.slane %v4952_v43, 4  ;;  %v6256_v13 = vcombine.low %v5058_v10, %v5062_v52  ;;  %v9383_v2 = vld [vmem:[#allocation3 + $0x20] sm:$0xf] }
 0x491   : > { %v5127_v15 = vrot.slane %v5125_v34, 5  ;;  %v5241_v24 = vrot.slane %v9344_v38, 5  ;;  %v4944_v0 = vsel %vm8649_vm6, %v4939_v49, %v4943_v53  ;;  %v5141_v35 = vrot.slane %v5139_v5, 5  ;;  %v9376_v53 = vld [vmem:[#allocation3 + $0x8] sm:$0xf] }
 0x492   : > { %v6235_v58 = vrot.slane %v5204_v26, 9  ;;  %v5245_v42 = vrot.slane %v9351_v25, 5  ;;  %v4958_v14 = vsel %vm8649_vm6, %v4953_v4, %v4957_v48  ;;  %5496 = vrot.lane.b32.xlu0 %v6256_v13, %s6656_s28  ;;  %v9836_v44 = vor.u32 %v9185_v45, %v9183_v6 }
 0x493   : > { %v5128_v3 = vsel %vm8649_vm6, %v5123_v31, %v5127_v15  ;;  %v5242_v18 = vsel %vm8414_vm4, %v6234_v54, %v5241_v24  ;;  %v6251_v43 = vcombine.low %v4944_v0, %v4958_v14  ;;  %v5142_v10 = vsel %vm8649_vm6, %v5137_v62, %v5141_v35  ;;  %v9394_v54 = vld [vmem:[#allocation3 + $0x28] sm:$0xf]  ;;  %v6476_v0 = vld [vmem:[#allocation9 + $0x18] sm:$0xff]  }
 0x494   : > { %v5308_v33 = vrot.slane %v9836_v44, 4  ;;  %v5246_v48 = vsel %vm8414_vm4, %v6235_v58, %v5245_v42  ;;  %v5310_v34 = vshll.u32 %v9311_v23, 16  ;;  %v6263_v31 = vcombine.low %v5128_v3, %v5142_v10  ;;  %6350 = vmatprep.subr.bf16.mxu1 %v6476_v0 }
 0x495   : > { %v6268_v32 = vcombine.low %v5242_v18, %v5246_v48  ;;  %v9837_v26 = vor.u32 %v9189_v40, %v9187_v29  ;;  %v5324_v45 = vshll.u32 %v9313_v20, 16  ;;  %5474 = vrot.lane.b32.xlu1 %v6251_v43, %s6652_s7  ;;  %v4918_v62 = vshrl.u32 %v9376_v53, 16  ;;  %6351 = vmatpush3.bf16.msra.mxu1 %v6476_v0 }
 0x496   : > { %v5312_v49 = vrot.slane %v5310_v34, 5  ;;  %v4921_v52 = vshll.u32 %v9376_v53, 16  ;;  %v4927_v5 = vshll.u32 %v9223_v11, 16  ;;  %v4960_v4 = vshrl.u32 %v9383_v2, 16  ;;  %v9411_v34 = vld [vmem:[#allocation3 + $0x30] sm:$0xf] }
 0x497   : > { %v5322_v6 = vrot.slane %v9837_v26, 4  ;;  %5564 = vrot.lane.b32.xlu0 %v6268_v32, %s6659_s25  ;;  %v5326_v23 = vrot.slane %v5324_v45, 5  ;;  %v4963_v29 = vshll.u32 %v9383_v2, 16  ;;  %v4969_v40 = vshll.u32 %v9332_v12, 16 }
 0x498   : > { %v5313_v20 = vsel %vm8649_vm6, %v5308_v33, %v5312_v49  ;;  %v4920_v13 = vrot.slane %v4918_v62, 4  ;;  %v4923_v15 = vrot.slane %v4921_v52, 5  ;;  %v4929_v24 = vrot.slane %v4927_v5, 5 }
 0x499   : > { %v5327_v11 = vsel %vm8649_vm6, %v5322_v6, %v5326_v23  ;;  %v4962_v35 = vrot.slane %v4960_v4, 4  ;;  %v4965_v58 = vrot.slane %v4963_v29, 5  ;;  %v4971_v42 = vrot.slane %v4969_v40, 5  ;;  %5542 = vrot.lane.b32.xlu1 %v6263_v31, %s6654_s24 }
 0x49a   : > { %v6275_v14 = vcombine.low %v5313_v20, %v5327_v11  ;;  %v4924_v3 = vor.u32 %v4923_v15, %v4920_v13  ;;  %v4974_v18 = vshrl.u32 %v9394_v54, 16  ;;  %v4977_v12 = vshll.u32 %v9394_v54, 16 }
 0x49b   : > { %v4966_v44 = vor.u32 %v4965_v58, %v4962_v35  ;;  %v4983_v33 = vshll.u32 %v9340_v17, 16  ;;  %v9838_v43 = vor.u32 %v9167_v27, %v9165_v60  ;;  %v5097_v48 = vshll.u32 %v9253_v8, 16  ;;  %v9420_v27 = vld [vmem:[#allocation3 + $0x38] sm:$0xf] }
 0x49c   : > { %v4925_v31 = vrot.slane %v4924_v3, 4  ;;  %v4976_v32 = vrot.slane %v4974_v18, 4  ;;  %v4979_v26 = vrot.slane %v4977_v12, 5  ;;  %v9839_v6 = vor.u32 %v9176_v21, %v9169_v41 }
 0x49d   : > { %v5095_v10 = vrot.slane %v9838_v43, 4  ;;  %v4967_v49 = vrot.slane %v4966_v44, 4  ;;  %v4985_v62 = vrot.slane %v4983_v33, 5  ;;  %v5099_v52 = vrot.slane %v5097_v48, 5  ;;  %5610 = vrot.lane.b32.xlu1 %v6275_v14, %s6661_s17 }
 0x49e   : > { %v5109_v45 = vrot.slane %v9839_v6, 4  ;;  %v5111_v17 = vshll.u32 %v9255_v56, 16  ;;  %v4930_v8 = vsel %vm8649_vm6, %v4925_v31, %v4929_v24  ;;  %v4980_v60 = vor.u32 %v4979_v26, %v4976_v32 }
 0x49f   : > { %v4988_v5 = vshrl.u32 %v9411_v34, 16  ;;  %v4991_v23 = vshll.u32 %v9411_v34, 16  ;;  %v9840_v41 = vsel %vm8649_vm6, %v9067_v9, %v9069_v30  ;;  %v4972_v56 = vsel %vm8649_vm6, %v4967_v49, %v4971_v42 }
 0x4a0   : > { %v6250_v21 = vcombine.low %v9840_v41, %v4930_v8  ;;  %v5100_v4 = vsel %vm8649_vm6, %v5095_v10, %v5099_v52  ;;  %v5113_v29 = vrot.slane %v5111_v17, 5  ;;  %v4981_v40 = vrot.slane %v4980_v60, 4  ;;  %v5270_v17 = vld [vmem:[#allocation3 + $0x44] sm:$0x1] }
 0x4a1   : > { %v4990_v20 = vrot.slane %v4988_v5, 4  ;;  %v4993_v13 = vrot.slane %v4991_v23, 5  ;;  %v4997_v15 = vshll.u32 %v9267_v28, 16  ;;  %v5002_v9 = vshrl.u32 %v9420_v27, 16  ;;  %v9841_v23 = vld [vmem:[#allocation14_spill] sm:$0xff] }
 0x4a2   : > { %5472 = vrot.lane.b32.xlu0 %v6250_v21, %s6652_s7  ;;  %v5114_v24 = vsel %vm8649_vm6, %v5109_v45, %v5113_v29  ;;  %v5005_v30 = vshll.u32 %v9420_v27, 16  ;;  %v5011_v0 = vshll.u32 %v9269_v39, 16  ;;  %v4986_v11 = vsel %vm8649_vm6, %v4981_v40, %v4985_v62  ;;  %v5268_v21 = vld [vmem:[#allocation3 + $0x34] sm:$0x1] }
 0x4a3   : > { %v6262_v35 = vcombine.low %v5100_v4, %v5114_v24  ;;  %v4994_v58 = vor.u32 %v4993_v13, %v4990_v20  ;;  %v4999_v42 = vrot.slane %v4997_v15, 5  ;;  %v6252_v14 = vcombine.low %v4972_v56, %v4986_v11  ;;  %v9843_v56 = vld [vmem:[#allocation22_spill] sm:$0xff]  ;;  %v9844_v4 = vld [vmem:[#allocation23_spill] sm:$0xff]  ;;  %v5269_v20 = vld [vmem:[#allocation3 + $0x3c] sm:$0x1] }
 0x4a4   : > { %v5004_v3 = vrot.slane %v5002_v9, 4  ;;  %v5007_v28 = vrot.slane %v5005_v30, 5  ;;  %v5013_v18 = vrot.slane %v5011_v0, 5  ;;  %v5279_v44 = vor.u32 %v9194_v19, %v9191_v63  ;;  %v9845_v13 = vld [vmem:[#allocation17_spill] sm:$0xff]  ;;  %v9846_v15 = vld [vmem:[#allocation16_spill] sm:$0xff] }
 0x4a5   : > { %v4995_v12 = vrot.slane %v4994_v58, 4  ;;  %v5282_v33 = vshll.u32 %v9280_v61, 16  ;;  %v5293_v43 = vor.u32 %v9198_v51, %v9196_v16  ;;  %5476 = vrot.lane.b32.xlu1 %v6252_v14, %s6652_s7  ;;  %v5296_v10 = vshll.u32 %v9284_v46, 16  ;;  %v5390_v9 = vld [vmem:[#allocation3 + $0x40] sm:$0xe] }
 0x4a6   : > { %5540 = vrot.lane.b32.xlu0 %v6262_v35, %s6654_s24  ;;  %v5008_v39 = vor.u32 %v5007_v28, %v5004_v3  ;;  %v5178_v48 = vor.u32 %v9203_v37, %v9201_v22  ;;  %v5181_v31 = vshll.u32 %v9296_v47, 16  ;;  %v5280_v19 = vrot.slane %v5279_v44, 4  ;;  %v5388_v3 = vld [vmem:[#allocation3 + $0x30] sm:$0xe] }
 0x4a7   : > { %v5000_v63 = vsel %vm8649_vm6, %v4995_v12, %v4999_v42  ;;  %v5284_v61 = vrot.slane %v5282_v33, 5  ;;  %v5294_v32 = vrot.slane %v5293_v43, 4  ;;  %v5298_v16 = vrot.slane %v5296_v10, 5  ;;  %v9848_v12 = vld [vmem:[#allocation26_spill] sm:$0xff] }
 0x4a8   : > { %v5009_v26 = vrot.slane %v5008_v39, 4  ;;  %v5179_v51 = vrot.slane %v5178_v48, 4  ;;  %v5183_v6 = vrot.slane %v5181_v31, 5  ;;  %v5192_v46 = vor.u32 %v9207_v1, %v9205_v36  ;;  %v5389_v39 = vld [vmem:[#allocation3 + $0x38] sm:$0xe] }
 0x4a9   : > { %v5285_v45 = vsel %vm8649_vm6, %v5280_v19, %v5284_v61  ;;  %v5195_v22 = vshll.u32 %v9298_v55, 16  ;;  %v5150_v37 = vor.u32 %v9214_v59, %v9212_v57  ;;  %v5299_v49 = vsel %vm8649_vm6, %v5294_v32, %v5298_v16  ;;  %v9842_v57 = vld [vmem:[#allocation15_spill] sm:$0xff]  ;;  %v9849_v32 = vld [vmem:[#allocation18_spill] sm:$0xff]  ;;  %v9851_v16 = vld [vmem:[#allocation21_spill] sm:$0xff] }
 0x4aa   : > { %v5014_v47 = vsel %vm8649_vm6, %v5009_v26, %v5013_v18  ;;  %v5184_v62 = vsel %vm8649_vm6, %v5179_v51, %v5183_v6  ;;  %v5153_v52 = vshll.u32 %v9344_v38, 16  ;;  %v6274_v60 = vcombine.low %v5285_v45, %v5299_v49  ;;  %v9847_v18 = vld [vmem:[#allocation25_spill] sm:$0xff] }
 0x4ab   : > { %v6253_v8 = vcombine.low %v5000_v63, %v5014_v47  ;;  %v5193_v36 = vrot.slane %v5192_v46, 4  ;;  %v5197_v1 = vrot.slane %v5195_v22, 5  ;;  %v5151_v55 = vrot.slane %v5150_v37, 4  ;;  %v9853_v46 = vld [vmem:[#allocation19_spill] sm:$0xff]  ;;  %v9854_v22 = vld [vmem:[#allocation20_spill] sm:$0xff] }
 0x4ac   : > { %v5155_v5 = vrot.slane %v5153_v52, 5  ;;  %v5164_v59 = vor.u32 %v9842_v57, %v9841_v23  ;;  %v5167_v41 = vshll.u32 %v9351_v25, 16  ;;  %5608 = vrot.lane.b32.xlu0 %v6274_v60, %s6661_s17  ;;  %v5363_v29 = vor.u32 %v9844_v4, %v9843_v56 }
 0x4ad   : > { %5478 = vrot.lane.b32.xlu1 %v6253_v8, %s6652_s7  ;;  %v5198_v38 = vsel %vm8649_vm6, %v5193_v36, %v5197_v1  ;;  %v5366_v40 = vshll.u32 %v5270_v17, 16  ;;  %v5335_v24 = vor.u32 %v9846_v15, %v9845_v13  ;;  %v5338_v14 = vshll.u32 %v5268_v21, 16  ;;  %v9856_v36 = vld [vmem:[#allocation31_spill] sm:$0xff]  ;;  %v9857_v1 = vld [vmem:[#allocation30_spill] sm:$0xff] }
 0x4ae   : > { %v6265_v30 = vcombine.low %v5184_v62, %v5198_v38  ;;  %v5156_v25 = vsel %vm8649_vm6, %v5151_v55, %v5155_v5  ;;  %v5165_v0 = vrot.slane %v5164_v59, 4  ;;  %v5169_v11 = vrot.slane %v5167_v41, 5  ;;  %v6478_v5 = vld [vmem:[#allocation9 + $0x20] ss:$0 sps:$4 sm:$0xff]  }
 0x4af   : > { %v5364_v35 = vrot.slane %v5363_v29, 4  ;;  %v5368_v58 = vrot.slane %v5366_v40, 5  ;;  %v5336_v42 = vrot.slane %v5335_v24, 4  ;;  %v5349_v44 = vor.u32 %v9848_v12, %v9847_v18  ;;  %6363 = vmatprep.subr.msk.bf16.mxu1 %vm5753_vm10, %v6478_v5  ;;  %v6484_v12 = vld [vmem:[#allocation3] sm:$0xf] }
 0x4b0   : > { %v5170_v28 = vsel %vm8649_vm6, %v5165_v0, %v5169_v11  ;;  %v5352_v33 = vshll.u32 %v5269_v20, 16  ;;  %v6244_v43 = vrot.slane %v5390_v9, 9  ;;  %v5340_v31 = vrot.slane %v5338_v14, 5 }
 0x4b1   : > { %5546 = vrot.lane.b32.xlu1 %v6265_v30, %s6654_s24  ;;  %v6264_v10 = vcombine.low %v5156_v25, %v5170_v28  ;;  %v5369_v48 = vsel %vm8649_vm6, %v5364_v35, %v5368_v58  ;;  %v5434_v63 = vrot.slane %v5270_v17, 5  ;;  %v5350_v19 = vrot.slane %v5349_v44, 4 }
 0x4b2   : > { %v5354_v61 = vrot.slane %v5352_v33, 5  ;;  %v9850_v26 = vrot.slane %v9849_v32, 5  ;;  %v9852_v51 = vrot.slane %v9851_v16, 9  ;;  %v6242_v45 = vrot.slane %v5388_v3, 9 }
 0x4b3   : > { %5544 = vrot.lane.b32.xlu0 %v6264_v10, %s6654_s24  ;;  %v9855_v37 = vsel %vm8649_vm6, %v9853_v46, %v9854_v22  ;;  %v5341_v49 = vsel %vm8649_vm6, %v5336_v42, %v5340_v31  ;;  %v5426_v62 = vrot.slane %v5268_v21, 5  ;;  %v6243_v52 = vrot.slane %v5389_v39, 9  ;;  %s6662_s24 = smov [#allocation10]  }
 0x4b4   : > { %v5439_v6 = vsel %vm8414_vm4, %v9852_v51, %v9850_v26  ;;  %v6277_v47 = vcombine.low %v5369_v48, %v9855_v37  ;;  %v5355_v17 = vsel %vm8649_vm6, %v5350_v19, %v5354_v61  ;;  %v5435_v8 = vsel %vm8414_vm4, %v6244_v43, %v5434_v63  ;;  %s6575_s27 = sshll.u32 %s6662_s24, 4  ;;  %s6576_s27 = int_to_ptr.vmem [resolvable:$false] %s6575_s27 }
 0x4b5   : > { %v5430_v60 = vrot.slane %v5269_v20, 5  ;;  %v6247_v55 = vcombine.low %v9857_v1, %v9856_v36  ;;  %v6276_v23 = vcombine.low %v5341_v49, %v5355_v17  ;;  %v5427_v57 = vsel %vm8414_vm4, %v6242_v45, %v5426_v62  ;;  %s6577_s28 = scalar_lea.vmem %s6576_s27, 2048  ;;  %p6578_p7 = scmp.lt.s32.totalorder %s9589_s4, %s6576_s27 }
 0x4b6   : > { %5614 = vrot.lane.b32.xlu1 %v6277_v47, %s6661_s17  ;;  %v6248_v50 = vcombine.low %v9383_v2, %v9394_v54  ;;  %v6281_v41 = vcombine.low %v5435_v8, %v5439_v6  ;;  %v6249_v21 = vcombine.low %v9411_v34, %v9420_v27  ;;  %v5755_v38 = vsel %vm5753_vm10, %v6478_v5, 0  ;;  %p6579_p9 = scmp.lt.s32.totalorder %s6577_s28, %s6571_s8 }
 0x4b7   : > { %v5431_v59 = vsel %vm8414_vm4, %v6243_v52, %v5430_v60  ;;  %5612 = vrot.lane.b32.xlu0 %v6276_v23, %s6661_s17  ;;  %6353 = vmatpush3.bf16.msra.mxu1 %v5755_v38  ;;  %v6246_v44 = vcombine.low %v6484_v12, %v9376_v53  ;;  %vm5672_vm4 = vcmask 326656   ;;  %vm9858_vm6 = vcmask 261120  }
 0x4b8   : > { %v6280_v56 = vcombine.low %v5427_v57, %v5431_v59  ;;  %vm9859_vm5 = vmmov %vm9858_vm6  ;;  %vm5744_vm11 = vcmask 588800   ;;  %p6580_p12 = por %p6579_p9, %p6578_p7 }
 0x4b9   : > { %vm9860_vm13 = vmmov %vm9859_vm5 }
 0x4ba   : > { %5634 = vrot.lane.b32.xlu1 %v6281_v41, %s6660_s10  ;;  %vm9861_vm15 = vmmov %vm9859_vm5  ;;  %p6581_p1 = pnand %p6580_p12, %p6574_p3 }
 0x4bb   : > { %5632 = vrot.lane.b32.xlu0 %v6280_v56, %s6660_s10 }
 0x4db   : > { %v5521_v7 = vpop.permute.xlu0 %5520 }
 0x4de   : > { %v5523_v4 = vpop.permute.xlu1 %5522 }
 0x4e2   : > { %v5591_v29 = vpop.permute.xlu1 %5590 }
 0x4e3   : > { %v5589_v40 = vpop.permute.xlu0 %5588 }
 0x4e6   : > { %v5527_v2 = vpop.permute.xlu1 %5526 }
 0x4e8   : > { %v5525_v54 = vpop.permute.xlu0 %5524 }
 0x4ea   : > { %v5595_v20 = vpop.permute.xlu1 %5594 }
 0x4ec   : > { %v5593_v13 = vpop.permute.xlu0 %5592 }
 0x4f1   : > { %v5495_v15 = vpop.permute.xlu1 %5494 }
 0x4f2   : > { %v5493_v24 = vpop.permute.xlu0 %5492 }
 0x4f5   : > { %v5563_v9 = vpop.permute.xlu1 %5562 }
 0x4f6   : > { %v5561_v34 = vpop.permute.xlu0 %5560 }
 0x4f9   : > { %v5499_v27 = vpop.permute.xlu1 %5498 }
 0x4fb   : > { %v5629_v30 = vpop.permute.xlu0 %5628 }
 0x4fd   : > { %v5567_v0 = vpop.permute.xlu1 %5566 }
 0x4ff   : > { %v5631_v25 = vpop.permute.xlu0 %5630 }
 0x504   : > { %v5497_v11 = vpop.permute.xlu0 %5496 }
 0x507   : > { %v5475_v35 = vpop.permute.xlu1 %5474 }
 0x508   : > { %v5641_v58 = vsel %vm4398_vm7, %v6247_v55, %v5475_v35 }
 0x509   : > { %v5565_v14 = vpop.permute.xlu0 %5564  ;;  %v5651_v3 = vsel %vm4416_vm9, %v5641_v58, %v5495_v15 }
 0x50a   : > { %v5659_v28 = vsel %vm4434_vm12, %v5651_v3, %v5523_v4 }
 0x50b   : > { %v5543_v42 = vpop.permute.xlu1 %5542 }
 0x50c   : > { %v5667_v39 = vsel %vm9858_vm6, %v5659_v28, %v5543_v42 }
 0x50d   : > { %v5676_v63 = vsel %vm5672_vm4, %v5667_v39, %v5563_v9 }
 0x50e   : > { %v5685_v53 = vsel %vm5681_vm1, %v5676_v63, %v5591_v29 }
 0x50f   : > { %v5611_v18 = vpop.permute.xlu1 %5610 }
 0x510   : > { %v5694_v16 = vsel %vm5690_vm2, %v5685_v53, %v5611_v18 }
 0x511   : > { %v5703_v52 = vsel %vm5699_vm8, %v5694_v16, %v5631_v25 }
 0x514   : > { %v5473_v33 = vpop.permute.xlu0 %5472 }
 0x515   : > { %v5638_v43 = vsel %vm4398_vm7, %v6246_v44, %v5473_v33 }
 0x516   : > { %v5649_v10 = vsel %vm4416_vm9, %v5638_v43, %v5493_v24 }
 0x517   : > { %v5657_v48 = vsel %vm4434_vm12, %v5649_v10, %v5521_v7  ;;  %v5477_v19 = vpop.permute.xlu1 %5476 }
 0x518   : > { %v5541_v31 = vpop.permute.xlu0 %5540  ;;  %v5644_v51 = vsel %vm4398_vm7, %v6248_v50, %v5477_v19 }
 0x519   : > { %v5665_v61 = vsel %vm9859_vm5, %v5657_v48, %v5541_v31  ;;  %v5653_v49 = vsel %vm4416_vm9, %v5644_v51, %v5497_v11 }
 0x51a   : > { %v5674_v32 = vsel %vm5672_vm4, %v5665_v61, %v5561_v34  ;;  %v5661_v60 = vsel %vm4434_vm12, %v5653_v49, %v5525_v54 }
 0x51b   : > { %v5683_v26 = vsel %vm5681_vm1, %v5674_v32, %v5589_v40 }
 0x51e   : > { %v5609_v45 = vpop.permute.xlu0 %5608 }
 0x51f   : > { %v5479_v6 = vpop.permute.xlu1 %5478  ;;  %v5692_v22 = vsel %vm5690_vm2, %v5683_v26, %v5609_v45 }
 0x520   : > { %v5647_v46 = vsel %vm4398_vm7, %v6249_v21, %v5479_v6  ;;  %v5701_v47 = vsel %vm5699_vm8, %v5692_v22, %v5629_v30 }
 0x521   : > { %v5655_v37 = vsel %vm4416_vm9, %v5647_v46, %v5499_v27  ;;  %6354 = vmatprep.mubr.msk.bf16.mxu1 %vm5744_vm11, %v5701_v47 }
 0x522   : > { %v5663_v62 = vsel %vm4434_vm12, %v5655_v37, %v5527_v2  ;;  %6355 = vmatmul.mubr.msk.bf16.vlgmr.msra.gmra.mrb[0].mxu1 %vm5744_vm11, %v5703_v52 }
 0x523   : > { %v5547_v17 = vpop.permute.xlu1 %5546 }
 0x524   : > { %v5671_v8 = vsel %vm9860_vm13, %v5663_v62, %v5547_v17 }
 0x525   : > { %v5545_v36 = vpop.permute.xlu0 %5544  ;;  %v5680_v1 = vsel %vm5672_vm4, %v5671_v8, %v5567_v0 }
 0x526   : > { %v5669_v55 = vsel %vm9861_vm15, %v5661_v60, %v5545_v36  ;;  %v5689_v57 = vsel %vm5681_vm1, %v5680_v1, %v5595_v20 }
 0x527   : > { %v5678_v5 = vsel %vm5672_vm4, %v5669_v55, %v5565_v14 }
 0x528   : > { %v5615_v23 = vpop.permute.xlu1 %5614  ;;  %v5687_v50 = vsel %vm5681_vm1, %v5678_v5, %v5593_v13 }
 0x529   : > { %v5613_v59 = vpop.permute.xlu0 %5612  ;;  %v5698_v21 = vsel %vm5690_vm2, %v5689_v57, %v5615_v23 }
 0x52a   : > { %v5696_v38 = vsel %vm5690_vm2, %v5687_v50, %v5613_v59 }
 0x52c   : > { %v5635_v41 = vpop.permute.xlu1 %5634 }
 0x52d   : > { %v5707_v56 = vsel %vm5699_vm8, %v5698_v21, %v5635_v41  ;;  %v5633_v7 = vpop.permute.xlu0 %5632 }
 0x52e   : > { %v5705_v4 = vsel %vm5699_vm8, %v5696_v38, %v5633_v7 }
 0x52f   : > { %6358 = vmatprep.mubr.msk.bf16.mxu1 %vm5744_vm11, %v5705_v4 }
 0x530   : > { %6359 = vmatmul.mubr.msk.bf16.gmra.mrb[4].mxu1 %vm5744_vm11, %v5707_v56 }
 0x5f5   : > { %v6356_v29 = vpop.f32.mrb[0].mxu1 }
 0x5f6   : > { %v5791_v40 = vpop.f32.mrb[1].mxu1  ;;  %v5825_v24 = vsel %vm4398_vm7, %v6356_v29, 0.0 }
 0x5f7   : > { %v6357_v2 = vpop.f32.mrb[2].mxu1  ;;  %v5822_v20 = vsel %vm4398_vm7, %v5791_v40, 0.0 }
 0x5f8   : > { %v5794_v54 = vpop.f32.mrb[3].mxu1  ;;  %v5827_v34 = vsel %vm4398_vm7, %v6357_v2, 0.0 }
 0x5f9   : > { %v5823_v13 = vsel %vm4398_vm7, %v5794_v54, 0.0 }
 0x5fa   : > { %v5824_v15 = vadd.f32 %v5823_v13, %v5822_v20 }
 0x5fc   : > { %v5826_v9 = vadd.f32 %v5825_v24, %v5824_v15 }
 0x5fe   : > { %v5828_v27 = vadd.f32 %v5827_v34, %v5826_v9 }
 0x603   : > { %v6360_v30 = vpop.f32.mrb[4].mxu1 }
 0x604   : > { %v5807_v25 = vpop.f32.mrb[5].mxu1  ;;  %v5833_v3 = vsel %vm4398_vm7, %v6360_v30, 0.0 }
 0x605   : > { %v5829_v0 = vsel %vm4398_vm7, %v5807_v25, 0.0  ;;  %v6361_v11 = vpop.f32.mrb[6].mxu1 }
 0x606   : > { %v5830_v35 = vadd.f32 %v5829_v0, %v5828_v27  ;;  %v5810_v58 = vpop.f32.mrb[7].mxu1  ;;  %v5835_v18 = vsel %vm4398_vm7, %v6361_v11, 0.0 }
 0x607   : > { %v5831_v42 = vsel %vm4398_vm7, %v5810_v58, 0.0 }
 0x608   : > { %v5832_v14 = vadd.f32 %v5831_v42, %v5830_v35 }
 0x60a   : > { %v5834_v28 = vadd.f32 %v5833_v3, %v5832_v14 }
 0x60c   : > { %v5836_v12 = vadd.f32 %v5835_v18, %v5834_v28 }
 0x60e   : > { %v5837_v44 = vrot.slane %v5836_v12, 4 }
 0x610   : > { %v5838_v33 = vadd.f32 %v5837_v44, %v5836_v12 }
 0x612   : > { %v5839_v43 = vrot.slane %v5838_v33, 2 }
 0x614   : > { %v5840_v39 = vadd.f32 %v5839_v43, %v5838_v33 }
 0x616   : > { %v5841_v10 = vrot.slane %v5840_v39, 1 }
 0x618   : > { %v5842_v48 = vadd.f32 %v5841_v10, %v5840_v39 }
 0x61a   : > { %v5843_v31 = vmul.f32 0.015625, %v5842_v48 }
 0x61c   : > { %v5844_v63 = vsub.f32 %v5791_v40, %v5843_v31  ;;  %v5845_v19 = vsub.f32 %v5794_v54, %v5843_v31  ;;  %v5846_v61 = vsub.f32 %v6356_v29, %v5843_v31  ;;  %v5847_v32 = vsub.f32 %v6357_v2, %v5843_v31 }
 0x61d   : > { %v5848_v53 = vsub.f32 %v5807_v25, %v5843_v31  ;;  %v5849_v26 = vsub.f32 %v5810_v58, %v5843_v31  ;;  %v5850_v16 = vsub.f32 %v6360_v30, %v5843_v31  ;;  %v5851_v51 = vsub.f32 %v6361_v11, %v5843_v31 }
 0x61e   : > { %v5852_v6 = vmul.f32 %v5844_v63, %v5844_v63  ;;  %v5853_v45 = vmul.f32 %v5845_v19, %v5845_v19  ;;  %v5854_v46 = vmul.f32 %v5846_v61, %v5846_v61  ;;  %v5855_v22 = vmul.f32 %v5847_v32, %v5847_v32 }
 0x61f   : > { %v5856_v62 = vmul.f32 %v5848_v53, %v5848_v53  ;;  %v5857_v8 = vmul.f32 %v5849_v26, %v5849_v26  ;;  %v5858_v1 = vmul.f32 %v5850_v16, %v5850_v16  ;;  %v5859_v23 = vmul.f32 %v5851_v51, %v5851_v51 }
 0x620   : > { %v5860_v37 = vsel %vm4398_vm7, %v5852_v6, 0.0  ;;  %v5861_v47 = vsel %vm4398_vm7, %v5853_v45, 0.0  ;;  %v5863_v52 = vsel %vm4398_vm7, %v5854_v46, 0.0  ;;  %v5865_v60 = vsel %vm4398_vm7, %v5855_v22, 0.0 }
 0x621   : > { %v5862_v49 = vadd.f32 %v5861_v47, %v5860_v37  ;;  %v5867_v55 = vsel %vm4398_vm7, %v5856_v62, 0.0  ;;  %v5869_v57 = vsel %vm4398_vm7, %v5857_v8, 0.0  ;;  %v5871_v50 = vsel %vm4398_vm7, %v5858_v1, 0.0 }
 0x622   : > { %v5873_v21 = vsel %vm4398_vm7, %v5859_v23, 0.0 }
 0x623   : > { %v5864_v17 = vadd.f32 %v5863_v52, %v5862_v49 }
 0x625   : > { %v5866_v36 = vadd.f32 %v5865_v60, %v5864_v17 }
 0x627   : > { %v5868_v5 = vadd.f32 %v5867_v55, %v5866_v36 }
 0x629   : > { %v5870_v59 = vadd.f32 %v5869_v57, %v5868_v5 }
 0x62b   : > { %v5872_v41 = vadd.f32 %v5871_v50, %v5870_v59 }
 0x62d   : > { %v5874_v38 = vadd.f32 %v5873_v21, %v5872_v41 }
 0x62f   : > { %v5875_v56 = vrot.slane %v5874_v38, 4 }
 0x631   : > { %v5876_v7 = vadd.f32 %v5875_v56, %v5874_v38 }
 0x633   : > { %v5877_v4 = vrot.slane %v5876_v7, 2 }
 0x635   : > { %v5878_v29 = vadd.f32 %v5877_v4, %v5876_v7 }
 0x637   : > { %v5879_v40 = vrot.slane %v5878_v29, 1 }
 0x639   : > { %v5880_v2 = vadd.f32 %v5879_v40, %v5878_v29 }
 0x63b   : > { %v5881_v54 = vmul.f32 0.015625, %v5880_v2 }
 0x63d   : > { %v5882_v20 = vadd.f32 1e-05, %v5881_v54 }
 0x63f   : > { %6482 = vrsqrt.f32 %v5882_v20 }
 0x649   : > { %v6483_v13 = vpop.eup %6482 }
 0x64a   : > { %v5884_v15 = vmul.f32 %v6483_v13, %v5844_v63  ;;  %v5885_v24 = vmul.f32 %v6483_v13, %v5845_v19  ;;  %v5886_v9 = vmul.f32 %v6483_v13, %v5846_v61  ;;  %v5887_v34 = vmul.f32 %v6483_v13, %v5847_v32 }
 0x64b   : > { %v5888_v27 = vmul.f32 %v6483_v13, %v5848_v53  ;;  %v5889_v30 = vmul.f32 %v6483_v13, %v5849_v26  ;;  %v5890_v25 = vmul.f32 %v6483_v13, %v5850_v16  ;;  %v5891_v0 = vmul.f32 %v6483_v13, %v5851_v51 }
 0x64c   : > { %vm5892_vm9 = vcmp.gt.f32.partialorder %v5884_v15, 0.0  ;;  %vm5893_vm12 = vcmp.gt.f32.partialorder %v5885_v24, 0.0  ;;  %vm5894_vm3 = vcmp.gt.f32.partialorder %v5886_v9, 0.0  ;;  %vm5895_vm0 = vcmp.gt.f32.partialorder %v5887_v34, 0.0 }
 0x64d   : > { %vm5896_vm14 = vcmp.gt.f32.partialorder %v5888_v27, 0.0  ;;  %vm5897_vm10 = vcmp.gt.f32.partialorder %v5889_v30, 0.0  ;;  %vm5898_vm4 = vcmp.gt.f32.partialorder %v5890_v25, 0.0  ;;  %vm5899_vm6 = vcmp.gt.f32.partialorder %v5891_v0, 0.0 }
 0x64e   : > { %v5900_v11 = vmul.f32 0.01, %v5884_v15  ;;  %v5901_v35 = vmul.f32 0.01, %v5885_v24  ;;  %v5902_v58 = vmul.f32 0.01, %v5886_v9 }
 0x64f   : > { %v5903_v42 = vmul.f32 0.01, %v5887_v34  ;;  %v5904_v14 = vmul.f32 0.01, %v5888_v27  ;;  %v5905_v3 = vmul.f32 0.01, %v5889_v30 }
 0x650   : > { %v5906_v28 = vmul.f32 0.01, %v5890_v25  ;;  %v5907_v18 = vmul.f32 0.01, %v5891_v0  ;;  %v5908_v12 = vsel %vm5892_vm9, %v5884_v15, %v5900_v11  ;;  %v5909_v44 = vsel %vm5893_vm12, %v5885_v24, %v5901_v35 }
 0x651   : > { %v5910_v33 = vsel %vm5894_vm3, %v5886_v9, %v5902_v58  ;;  %v5911_v43 = vsel %vm5895_vm0, %v5887_v34, %v5903_v42  ;;  %v5912_v39 = vsel %vm5896_vm14, %v5888_v27, %v5904_v14  ;;  %v5913_v10 = vsel %vm5897_vm10, %v5889_v30, %v5905_v3  ;;  %5916 = vst.msk [vmem:[%s217_s30] sm:$0xff] %vm4398_vm7, %v5908_v12 }
 0x652   : > { %5917 = vst.msk [vmem:[%s217_s30 + $0x8] sm:$0xff] %vm4398_vm7, %v5909_v44  ;;  %v5914_v48 = vsel %vm5898_vm4, %v5890_v25, %v5906_v28  ;;  %v5915_v31 = vsel %vm5899_vm6, %v5891_v0, %v5907_v18  ;;  %5918 = vst.msk [vmem:[%s217_s30 + $0x10] sm:$0xff] %vm4398_vm7, %v5910_v33 }
 0x653   : > { %5919 = vst.msk [vmem:[%s217_s30 + $0x18] sm:$0xff] %vm4398_vm7, %v5911_v43  ;;  %5920 = vst.msk [vmem:[%s217_s30 + $0x20] sm:$0xff] %vm4398_vm7, %v5912_v39 }
 0x654   : > { %5921 = vst.msk [vmem:[%s217_s30 + $0x28] sm:$0xff] %vm4398_vm7, %v5913_v10  ;;  %5922 = vst.msk [vmem:[%s217_s30 + $0x30] sm:$0xff] %vm4398_vm7, %v5914_v48 }
 0x655   : > { %5923 = vst.msk [vmem:[%s217_s30 + $0x38] sm:$0xff] %vm4398_vm7, %v5915_v31 }
 0x656   : > { %6584 = shalt.err (!%p6581_p1)
}
 0x657   : > { %s6585_s22 = scalar_lea.hbm %s9581_s20, 1024  ;;  %s6589_s10 = scalar_lea.hbm %s9645_s3, 2048 }
 0x658   : > { %p6586_p13 = scmp.ne.s32.totalorder %s9581_s20, %s6585_s22  ;;  %p6590_p4 = scmp.lt.u32.totalorder %s9581_s20, %s9645_s3 }
 0x659   : > { %p6591_p5 = scmp.lt.u32.totalorder %s6589_s10, %s6585_s22  ;;  %p6593_p11 = scmp.lt.u32.totalorder %s6585_s22, %s9581_s20 }
 0x65a   : > { %p6587_p6 = pnand %p6586_p13, %p9862_p0 }
 0x65b   : > { %p6592_p8 = por %p6591_p5, %p6590_p4 }
 0x65c   : > { %p6588_p10 = pneg %p6587_p6 }
 0x65d   : > { %p6594_p2 = por %p6593_p11, %p6592_p8 }
 0x65f   : > { %p6595_p3 = pnand %p6594_p2, %p6588_p10 }
 0x661   : > { %6598 = shalt.err (!%p6595_p3)
}
 0x662   : > { %s6663_s26 = smov 128  }
 0x663   : > { %6374 = dma.vmem_to_hbm [thread:$0]  (%p9862_p0), %s9589_s4, 1024, %s9581_s20, %s5925_s16, %s6663_s26, %s6663_s26, %s6652_s7  }
 0x664 PF: > { %s5953_s30 = sand.u32 1, %s6629_s12   ;;  %p9863_p7 = scmp.ne.s32.totalorder %s9667_s19, 0 }
 0x665   : > { %p9864_p9 = scmp.ge.s32.totalorder %s6641_s15, 2  ;;  %s5954_s5 = scalar_lea.sflag [#allocation6], %s5953_s30 }
 0x667   : > { %p6388_p12 = pnand %p9864_p9, %p9863_p7 }
 0x669   : > { %6624 = dma.done.wait (!%p6388_p12), %s5954_s5, 1024  }
 0x66a   : > { %6626 = vsyncadd (!%p6388_p12), %s5954_s5, 4294966272  ;;  %p17_p1 = scmp.ge.s32.totalorder %s6800_s23, 4   ;;  %s9865_s12 = smov %s6633_s13 }
 0x66b   : > { %s9866_s13 = smov %s6637_s14  ;;  %s9867_s14 = smov %s6816_s9 }
 0x66c   : > { %s9868_s15 = smov %s6800_s23  ;;  %19 = sbr.rel (!%p17_p1) target bundleno = 6 (0x6), region = 91 }
 0x673   :  { %5959 = vsyncpa [#allocation5], 1 }
 0x674   :  { %5961 = vsyncpa [#allocation5 + $0x1], 1 }
 0x675   :  { %5962 = vsyncpa [#allocation8], 1 }
 0x676   :  { %5963 = vsyncpa [#allocation6], 1 }
 0x677   :  { %5965 = vsyncpa [#allocation6 + $0x1], 1 }

</bundles_post_ra>
